<compile_context>
chip_gen: v5e
topology: v5e:2x2
jax: 0.10.0
libtpu: 0.0.40
codegen_flags: <defaults>
</compile_context>

<pallas_src>
import functools

import jax
import jax.numpy as jnp
import numpy as np
from jax.experimental import pallas as pl
from jax.experimental.pallas import tpu as pltpu


# ----------------------------------------------------------------------------
# Pallas kernel: one grid step == K GRU timesteps (all layers, both directions).
# Hidden state for every layer lives in a VMEM scratch persisting across grid
# iterations; the output is a resident accumulator (constant block index) and
# row b is overwritten at global step t iff t == seq_len[b] - 1, reproducing
# `hidden[0, b, :] = encoder_hidden[b, seq_len[b]-1, :]`.
# ----------------------------------------------------------------------------
def _gru_chunk_kernel(x_ref, sl_ref, w_ih_ref, w_hh_ref, b_ih_ref, b_hh_ref,
                      out_ref, h_ref, *, num_layers, hidden, steps, in0_rows,
                      out_w):
    H = hidden
    H2, H4, H6 = 2 * H, 4 * H, 6 * H
    L = num_layers
    B = x_ref.shape[1]
    chunk = pl.program_id(0)

    @pl.when(chunk == 0)
    def _init():
        h_ref[...] = jnp.zeros_like(h_ref)
        out_ref[...] = jnp.zeros_like(out_ref)

    sl = sl_ref[...]                                     # (B, 1) int32 (hoisted)
    # hoist the lane-padding zeros out of the step loop (no per-iter broadcast)
    lane_pad = (jnp.zeros((B, out_w - H2), jnp.float32)
                if out_w > H2 else None)

    def step_body(s, carry):
        t = chunk * steps + s                            # global timestep
        cur = x_ref[s]                                   # (B, in0_rows) f32
        rows = in0_rows
        cat = None
        for layer in range(L):
            h_prev = h_ref[layer]                        # (B, 2H) f32 = [h_fwd|h_rev]
            w_ih = w_ih_ref[layer][0:rows, :]            # (rows, 6H) bf16
            w_hh = w_hh_ref[layer]                       # (2H, 6H)  bf16 (block-diag)
            b_ih = b_ih_ref[layer]                       # (1, 6H) f32
            b_hh = b_hh_ref[layer]                       # (1, 6H) f32

            # bf16 MXU operands, f32 accumulation; gate layout [r0 r1 | z0 z1 | n0 n1]
            gi = jnp.dot(cur.astype(jnp.bfloat16), w_ih,
                         preferred_element_type=jnp.float32) + b_ih
            gh = jnp.dot(h_prev.astype(jnp.bfloat16), w_hh,
                         preferred_element_type=jnp.float32) + b_hh

            rz = jax.nn.sigmoid(gi[:, 0:H4] + gh[:, 0:H4])   # fused r+z sigmoid
            r = rz[:, 0:H2]
            z = rz[:, H2:H4]
            n = jnp.tanh(gi[:, H4:H6] + r * gh[:, H4:H6])
            h_new = (1.0 - z) * n + z * h_prev           # f32 gate math (v5e-safe)

            h_ref[layer] = h_new
            cat = h_new
            cur = h_new                                  # next layer input (B, 2H)
            rows = H2
        if lane_pad is not None:
            cat = jnp.concatenate([cat, lane_pad], axis=-1)   # lane-dense store
        mask = sl == (t + 1)                             # rows whose last step is t
        out_ref[...] = jnp.where(mask, cat, out_ref[...])
        return carry

    jax.lax.fori_loop(0, steps, step_body, 0, unroll=True)


# ----------------------------------------------------------------------------
# Wrapper: padding, direction-fused weight stacking, pallas_call plumbing.
# ----------------------------------------------------------------------------
def encoder_rnn_forward(x, seq_len, params, *, steps_per_block=16):
    x = jnp.asarray(x, jnp.float32)
    B, T_in, D = x.shape
    L = params["num_layers"]
    H = params["hidden_size"]
    H2, H6 = 2 * H, 6 * H

    seq_len = np.asarray(seq_len, dtype=np.int32)
    T = int(seq_len.max())
    assert T <= T_in and seq_len.min() >= 1

    # Padded sizes: batch -> 8-sublane tile, features -> mult of 8,
    # time -> mult of the per-grid chunk, output lanes -> mult of 128.
    B_pad = max(8, -(-B // 8) * 8)
    D8 = -(-D // 8) * 8
    K = int(min(steps_per_block, T))
    T_pad = -(-T // K) * K
    out_w = -(-H2 // 128) * 128
    in_max = max(D8, H2)

    # time-major zero-padded input: (T_pad, B_pad, D8); padded steps are zeros and
    # are never selected by the seq_len mask, so they cannot affect the output.
    x_tm = jnp.transpose(x[:, :T, :], (1, 0, 2))
    x_tm = jnp.pad(x_tm, ((0, T_pad - T), (0, B_pad - B), (0, D8 - D)))

    # Direction-fused weights.  Column layout per layer: [r0 r1 | z0 z1 | n0 n1],
    # each block of width H; w_hh is block-diagonal over directions so one matmul
    # with h_cat = [h0 | h1] produces both directions' hidden gates.
    w_ih_big = np.zeros((L, in_max, H6), np.float32)
    w_hh_big = np.zeros((L, H2, H6), np.float32)
    b_ih_big = np.zeros((L, 1, H6), np.float32)
    b_hh_big = np.zeros((L, 1, H6), np.float32)
    for l in range(L):
        in_l = D if l == 0 else H2
        for d in range(2):
            Wi = np.asarray(params["w_ih"][l][d], np.float32)   # (3H, in_l)
            Wh = np.asarray(params["w_hh"][l][d], np.float32)   # (3H, H)
            bi = np.asarray(params["b_ih"][l][d], np.float32)   # (3H,)
            bh = np.asarray(params["b_hh"][l][d], np.float32)
            for g in range(3):                                  # r, z, n
                col = g * H2 + d * H
                w_ih_big[l, :in_l, col:col + H] = Wi[g * H:(g + 1) * H, :].T
                w_hh_big[l, d * H:(d + 1) * H, col:col + H] = Wh[g * H:(g + 1) * H, :].T
                b_ih_big[l, 0, col:col + H] = bi[g * H:(g + 1) * H]
                b_hh_big[l, 0, col:col + H] = bh[g * H:(g + 1) * H]

    sl = np.zeros((B_pad, 1), np.int32)     # padded rows get 0 -> never selected
    sl[:B, 0] = seq_len

    kernel = functools.partial(_gru_chunk_kernel, num_layers=L, hidden=H,
                               steps=K, in0_rows=D8, out_w=out_w)

    out = pl.pallas_call(
        kernel,
        out_shape=jax.ShapeDtypeStruct((B_pad, out_w), jnp.float32),
        grid=(T_pad // K,),
        in_specs=[
            pl.BlockSpec((K, B_pad, D8), lambda t: (t, 0, 0)),     # x chunk
            pl.BlockSpec((B_pad, 1), lambda t: (0, 0)),            # seq_len
            pl.BlockSpec((L, in_max, H6), lambda t: (0, 0, 0)),    # W_ih (bf16)
            pl.BlockSpec((L, H2, H6), lambda t: (0, 0, 0)),        # W_hh (bf16)
            pl.BlockSpec((L, 1, H6), lambda t: (0, 0, 0)),         # b_ih
            pl.BlockSpec((L, 1, H6), lambda t: (0, 0, 0)),         # b_hh
        ],
        out_specs=pl.BlockSpec((B_pad, out_w), lambda t: (0, 0)),
        scratch_shapes=[pltpu.VMEM((L, B_pad, H2), jnp.float32)],  # hidden state
        compiler_params=pltpu.CompilerParams(
            dimension_semantics=("arbitrary",)),
        # NOTE: for large H on v6e raise vmem_limit_bytes here; at these test shapes
        # the default scoped limit is more than sufficient.
    )(x_tm, jnp.asarray(sl),
      jnp.asarray(w_ih_big, jnp.bfloat16), jnp.asarray(w_hh_big, jnp.bfloat16),
      jnp.asarray(b_ih_big), jnp.asarray(b_hh_big))

    return out[:B, :H2][None]   # (1, B, 2H) -- matches the PyTorch module's return


# ----------------------------------------------------------------------------
# Deterministic parameter init (PyTorch GRU default: U(-1/sqrt(H), 1/sqrt(H)))
# ----------------------------------------------------------------------------
def init_params(key, input_size, hidden_size, num_layers):
    k = 1.0 / np.sqrt(hidden_size)
    params = {"num_layers": num_layers, "hidden_size": hidden_size,
              "w_ih": [], "w_hh": [], "b_ih": [], "b_hh": []}
    for layer in range(num_layers):
        in_l = input_size if layer == 0 else 2 * hidden_size
        wi, wh, bi, bh = [], [], [], []
        for _ in range(2):  # forward / reverse direction
            key, k1, k2, k3, k4 = jax.random.split(key, 5)
            wi.append(np.asarray(jax.random.uniform(
                k1, (3 * hidden_size, in_l), jnp.float32, -k, k)))
            wh.append(np.asarray(jax.random.uniform(
                k2, (3 * hidden_size, hidden_size), jnp.float32, -k, k)))
            bi.append(np.asarray(jax.random.uniform(
                k3, (3 * hidden_size,), jnp.float32, -k, k)))
            bh.append(np.asarray(jax.random.uniform(
                k4, (3 * hidden_size,), jnp.float32, -k, k)))
        params["w_ih"].append(wi)
        params["w_hh"].append(wh)
        params["b_ih"].append(bi)
        params["b_hh"].append(bh)
    return params, key


# ----------------------------------------------------------------------------
# Pure-numpy reference: exact eval-mode semantics of the PyTorch forward, which
# feeds the GRU one timestep at a time (so both directions advance forward in t).
# ----------------------------------------------------------------------------
def ref_encoder_rnn(x, seq_len, params):
    x = np.asarray(x, np.float32)
    B, _, _ = x.shape
    L = params["num_layers"]
    H = params["hidden_size"]
    T = int(max(seq_len))

    def sig(v):
        return 1.0 / (1.0 + np.exp(-v))

    h = np.zeros((L, 2, B, H), np.float32)
    enc = np.zeros((B, T, 2 * H), np.float32)
    for t in range(T):
        cur = x[:, t, :]
        for layer in range(L):
            outs = []
            for d in range(2):
                Wi = params["w_ih"][layer][d]
                Wh = params["w_hh"][layer][d]
                bi = params["b_ih"][layer][d]
                bh = params["b_hh"][layer][d]
                gi = cur @ Wi.T + bi
                gh = h[layer, d] @ Wh.T + bh
                r = sig(gi[:, :H] + gh[:, :H])
                z = sig(gi[:, H:2 * H] + gh[:, H:2 * H])
                n = np.tanh(gi[:, 2 * H:] + r * gh[:, 2 * H:])
                h[layer, d] = (1.0 - z) * n + z * h[layer, d]
                outs.append(h[layer, d].copy())
            cur = np.concatenate(outs, axis=-1)
        enc[:, t, :] = cur
    hidden = np.stack([enc[b, int(seq_len[b]) - 1, :] for b in range(B)], 0)
    return hidden[None]


if __name__ == "__main__":
    # small shapes: batch=4, seq=8, input_size=16, hidden=32, num_layers=2
    B, T, D, H, L = 4, 8, 16, 32, 2
    key = jax.random.PRNGKey(0)
    params, key = init_params(key, input_size=D, hidden_size=H, num_layers=L)

    key, kx = jax.random.split(key)
    x = jax.random.normal(kx, (B, T, D), jnp.float32)
    seq_len = [8, 5, 3, 6]

    out = encoder_rnn_forward(x, seq_len, params)
    out = jax.block_until_ready(out)

    ref = ref_encoder_rnn(np.asarray(x), seq_len, params)
    assert out.shape == (1, B, 2 * H), out.shape
    # bf16 MXU operands (f32 accumulate / f32 gate math) vs a full-f32 reference:
    # tolerance reflects bf16 input rounding propagated through the recurrence.
    max_err = float(np.max(np.abs(np.asarray(out) - ref)))
    assert max_err < 5e-2, f"mismatch vs reference: {max_err}"

    print("KERNEL_OK")
</pallas_src>

<mosaic_0001>
module attributes {stable_mosaic.version = 11 : i64} {
  func.func @_gru_chunk_kernel(%arg0: i32, %arg1: memref<8x8x16xf32, #tpu.memory_space<vmem>>, %arg2: memref<8x1xi32, #tpu.memory_space<vmem>>, %arg3: memref<2x64x192xbf16, #tpu.memory_space<vmem>>, %arg4: memref<2x64x192xbf16, #tpu.memory_space<vmem>>, %arg5: memref<2x1x192xf32, #tpu.memory_space<vmem>>, %arg6: memref<2x1x192xf32, #tpu.memory_space<vmem>>, %arg7: memref<8x128xf32, #tpu.memory_space<vmem>>, %arg8: memref<2x8x64xf32, #tpu.memory_space<vmem>>) attributes {dimension_semantics = [#tpu.dimension_semantics<arbitrary>], iteration_bounds = array<i64: 1>, scalar_prefetch = 0 : i64, scratch_operands = 1 : i64, tpu.core_type = #tpu.core_type<tc>, window_params = [{transform_indices = @transform_0, window_bounds = array<i64: 8, 8, 16>}, {pipeline_mode = #tpu.pipeline_mode<synchronous>, transform_indices = @transform_1, window_bounds = array<i64: 8, 1>}, {pipeline_mode = #tpu.pipeline_mode<synchronous>, transform_indices = @transform_2, window_bounds = array<i64: 2, 64, 192>}, {pipeline_mode = #tpu.pipeline_mode<synchronous>, transform_indices = @transform_3, window_bounds = array<i64: 2, 64, 192>}, {pipeline_mode = #tpu.pipeline_mode<synchronous>, transform_indices = @transform_4, window_bounds = array<i64: 2, 1, 192>}, {pipeline_mode = #tpu.pipeline_mode<synchronous>, transform_indices = @transform_5, window_bounds = array<i64: 2, 1, 192>}, {pipeline_mode = #tpu.pipeline_mode<synchronous>, transform_indices = @transform_6, window_bounds = array<i64: 8, 128>}]} {
    %c0_i32 = arith.constant 0 : i32
    %0 = arith.cmpi eq, %arg0, %c0_i32 : i32
    %1 = arith.extui %0 : i1 to i32
    %c0_i32_0 = arith.constant 0 : i32
    %2 = arith.cmpi ne, %1, %c0_i32_0 : i32
    scf.if %2 {
      %cst_418 = arith.constant 0.000000e+00 : f32
      %781 = vector.broadcast %cst_418 : f32 to vector<2x8x64xf32>
      %c0_419 = arith.constant 0 : index
      %c0_420 = arith.constant 0 : index
      %c0_421 = arith.constant 0 : index
      %782 = vector.load %arg8[%c0_419, %c0_420, %c0_421] : memref<2x8x64xf32, #tpu.memory_space<vmem>>, vector<2x8x64xf32>
      tpu.vector_store %arg8[%c0_419, %c0_420, %c0_421], %781 {strides = array<i32>} : memref<2x8x64xf32, #tpu.memory_space<vmem>>, vector<2x8x64xf32>,
      %cst_422 = arith.constant 0.000000e+00 : f32
      %783 = vector.broadcast %cst_422 : f32 to vector<8x128xf32>
      %c0_423 = arith.constant 0 : index
      %c0_424 = arith.constant 0 : index
      %784 = vector.load %arg7[%c0_423, %c0_424] : memref<8x128xf32, #tpu.memory_space<vmem>>, vector<8x128xf32>
      tpu.vector_store %arg7[%c0_423, %c0_424], %783 {strides = array<i32>} : memref<8x128xf32, #tpu.memory_space<vmem>>, vector<8x128xf32>,
    } else {
    }
    %c0 = arith.constant 0 : index
    %c0_1 = arith.constant 0 : index
    %3 = vector.load %arg2[%c0, %c0_1] : memref<8x1xi32, #tpu.memory_space<vmem>>, vector<8x1xi32>
    %cst = arith.constant 0.000000e+00 : f32
    %4 = vector.broadcast %cst : f32 to vector<8x64xf32>
    %c0_i32_2 = arith.constant 0 : i32
    %c8_i32 = arith.constant 8 : i32
    %5 = arith.muli %arg0, %c8_i32 : i32
    %6 = arith.addi %5, %c0_i32_2 : i32
    %7 = arith.index_cast %c0_i32_2 : i32 to index
    %c0_3 = arith.constant 0 : index
    %c0_4 = arith.constant 0 : index
    %8 = vector.load %arg1[%7, %c0_3, %c0_4] : memref<8x8x16xf32, #tpu.memory_space<vmem>>, vector<1x8x16xf32>
    %9 = vector.shape_cast %8 : vector<1x8x16xf32> to vector<8x16xf32>
    %c0_5 = arith.constant 0 : index
    %c0_6 = arith.constant 0 : index
    %c0_7 = arith.constant 0 : index
    %10 = vector.load %arg8[%c0_5, %c0_6, %c0_7] : memref<2x8x64xf32, #tpu.memory_space<vmem>>, vector<1x8x64xf32>
    %11 = vector.shape_cast %10 : vector<1x8x64xf32> to vector<8x64xf32>
    %c0_8 = arith.constant 0 : index
    %c0_9 = arith.constant 0 : index
    %c0_10 = arith.constant 0 : index
    %12 = vector.load %arg3[%c0_8, %c0_9, %c0_10] : memref<2x64x192xbf16, #tpu.memory_space<vmem>>, vector<1x64x192xbf16>
    %13 = vector.shape_cast %12 : vector<1x64x192xbf16> to vector<64x192xbf16>
    %14 = vector.extract_strided_slice %13 {offsets = [0, 0], sizes = [16, 192], strides = [1, 1]} : vector<64x192xbf16> to vector<16x192xbf16>
    %c0_11 = arith.constant 0 : index
    %c0_12 = arith.constant 0 : index
    %c0_13 = arith.constant 0 : index
    %15 = vector.load %arg4[%c0_11, %c0_12, %c0_13] : memref<2x64x192xbf16, #tpu.memory_space<vmem>>, vector<1x64x192xbf16>
    %16 = vector.shape_cast %15 : vector<1x64x192xbf16> to vector<64x192xbf16>
    %c0_14 = arith.constant 0 : index
    %c0_15 = arith.constant 0 : index
    %c0_16 = arith.constant 0 : index
    %17 = vector.load %arg5[%c0_14, %c0_15, %c0_16] : memref<2x1x192xf32, #tpu.memory_space<vmem>>, vector<1x1x192xf32>
    %18 = vector.shape_cast %17 : vector<1x1x192xf32> to vector<1x192xf32>
    %c0_17 = arith.constant 0 : index
    %c0_18 = arith.constant 0 : index
    %c0_19 = arith.constant 0 : index
    %19 = vector.load %arg6[%c0_17, %c0_18, %c0_19] : memref<2x1x192xf32, #tpu.memory_space<vmem>>, vector<1x1x192xf32>
    %20 = vector.shape_cast %19 : vector<1x1x192xf32> to vector<1x192xf32>
    %21 = arith.truncf %9 : vector<8x16xf32> to vector<8x16xbf16>
    %cst_20 = arith.constant dense<0.000000e+00> : vector<8x192xf32>
    %22 = tpu.matmul %21, %14, %cst_20 {dimension_numbers = #tpu.dot_dimension_numbers<[1], [0], [0], [1], [0, 0, 1, 1], [], []>} : vector<8x16xbf16>, vector<16x192xbf16>, vector<8x192xf32> -> vector<8x192xf32>
    %23 = vector.broadcast %18 : vector<1x192xf32> to vector<8x192xf32>
    %24 = arith.addf %22, %23 : vector<8x192xf32>
    %25 = arith.truncf %11 : vector<8x64xf32> to vector<8x64xbf16>
    %cst_21 = arith.constant dense<0.000000e+00> : vector<8x192xf32>
    %26 = tpu.matmul %25, %16, %cst_21 {dimension_numbers = #tpu.dot_dimension_numbers<[1], [0], [0], [1], [0, 0, 1, 1], [], []>} : vector<8x64xbf16>, vector<64x192xbf16>, vector<8x192xf32> -> vector<8x192xf32>
    %27 = vector.broadcast %20 : vector<1x192xf32> to vector<8x192xf32>
    %28 = arith.addf %26, %27 : vector<8x192xf32>
    %29 = vector.extract_strided_slice %24 {offsets = [0, 0], sizes = [8, 128], strides = [1, 1]} : vector<8x192xf32> to vector<8x128xf32>
    %30 = vector.extract_strided_slice %28 {offsets = [0, 0], sizes = [8, 128], strides = [1, 1]} : vector<8x192xf32> to vector<8x128xf32>
    %31 = arith.addf %29, %30 : vector<8x128xf32>
    %32 = arith.negf %31 : vector<8x128xf32>
    %33 = math.exp %32 : vector<8x128xf32>
    %cst_22 = arith.constant 1.000000e+00 : f32
    %34 = vector.broadcast %cst_22 : f32 to vector<8x128xf32>
    %35 = arith.addf %34, %33 : vector<8x128xf32>
    %36 = arith.divf %34, %35 : vector<8x128xf32>
    %37 = vector.extract_strided_slice %36 {offsets = [0, 0], sizes = [8, 64], strides = [1, 1]} : vector<8x128xf32> to vector<8x64xf32>
    %38 = vector.extract_strided_slice %36 {offsets = [0, 64], sizes = [8, 64], strides = [1, 1]} : vector<8x128xf32> to vector<8x64xf32>
    %39 = vector.extract_strided_slice %24 {offsets = [0, 128], sizes = [8, 64], strides = [1, 1]} : vector<8x192xf32> to vector<8x64xf32>
    %40 = vector.extract_strided_slice %28 {offsets = [0, 128], sizes = [8, 64], strides = [1, 1]} : vector<8x192xf32> to vector<8x64xf32>
    %41 = arith.mulf %37, %40 : vector<8x64xf32>
    %42 = arith.addf %39, %41 : vector<8x64xf32>
    %43 = math.tanh %42 : vector<8x64xf32>
    %cst_23 = arith.constant 1.000000e+00 : f32
    %44 = vector.broadcast %cst_23 : f32 to vector<8x64xf32>
    %45 = arith.subf %44, %38 : vector<8x64xf32>
    %46 = arith.mulf %45, %43 : vector<8x64xf32>
    %47 = arith.mulf %38, %11 : vector<8x64xf32>
    %48 = arith.addf %46, %47 : vector<8x64xf32>
    %c0_24 = arith.constant 0 : index
    %c0_25 = arith.constant 0 : index
    %c0_26 = arith.constant 0 : index
    %49 = vector.load %arg8[%c0_24, %c0_25, %c0_26] : memref<2x8x64xf32, #tpu.memory_space<vmem>>, vector<1x8x64xf32>
    %50 = vector.shape_cast %49 : vector<1x8x64xf32> to vector<8x64xf32>
    %51 = vector.shape_cast %48 : vector<8x64xf32> to vector<1x8x64xf32>
    tpu.vector_store %arg8[%c0_24, %c0_25, %c0_26], %51 {strides = array<i32>} : memref<2x8x64xf32, #tpu.memory_space<vmem>>, vector<1x8x64xf32>,
    %c1 = arith.constant 1 : index
    %c0_27 = arith.constant 0 : index
    %c0_28 = arith.constant 0 : index
    %52 = vector.load %arg8[%c1, %c0_27, %c0_28] : memref<2x8x64xf32, #tpu.memory_space<vmem>>, vector<1x8x64xf32>
    %53 = vector.shape_cast %52 : vector<1x8x64xf32> to vector<8x64xf32>
    %c1_29 = arith.constant 1 : index
    %c0_30 = arith.constant 0 : index
    %c0_31 = arith.constant 0 : index
    %54 = vector.load %arg3[%c1_29, %c0_30, %c0_31] : memref<2x64x192xbf16, #tpu.memory_space<vmem>>, vector<1x64x192xbf16>
    %55 = vector.shape_cast %54 : vector<1x64x192xbf16> to vector<64x192xbf16>
    %c1_32 = arith.constant 1 : index
    %c0_33 = arith.constant 0 : index
    %c0_34 = arith.constant 0 : index
    %56 = vector.load %arg4[%c1_32, %c0_33, %c0_34] : memref<2x64x192xbf16, #tpu.memory_space<vmem>>, vector<1x64x192xbf16>
    %57 = vector.shape_cast %56 : vector<1x64x192xbf16> to vector<64x192xbf16>
    %c1_35 = arith.constant 1 : index
    %c0_36 = arith.constant 0 : index
    %c0_37 = arith.constant 0 : index
    %58 = vector.load %arg5[%c1_35, %c0_36, %c0_37] : memref<2x1x192xf32, #tpu.memory_space<vmem>>, vector<1x1x192xf32>
    %59 = vector.shape_cast %58 : vector<1x1x192xf32> to vector<1x192xf32>
    %c1_38 = arith.constant 1 : index
    %c0_39 = arith.constant 0 : index
    %c0_40 = arith.constant 0 : index
    %60 = vector.load %arg6[%c1_38, %c0_39, %c0_40] : memref<2x1x192xf32, #tpu.memory_space<vmem>>, vector<1x1x192xf32>
    %61 = vector.shape_cast %60 : vector<1x1x192xf32> to vector<1x192xf32>
    %62 = arith.truncf %48 : vector<8x64xf32> to vector<8x64xbf16>
    %cst_41 = arith.constant dense<0.000000e+00> : vector<8x192xf32>
    %63 = tpu.matmul %62, %55, %cst_41 {dimension_numbers = #tpu.dot_dimension_numbers<[1], [0], [0], [1], [0, 0, 1, 1], [], []>} : vector<8x64xbf16>, vector<64x192xbf16>, vector<8x192xf32> -> vector<8x192xf32>
    %64 = vector.broadcast %59 : vector<1x192xf32> to vector<8x192xf32>
    %65 = arith.addf %63, %64 : vector<8x192xf32>
    %66 = arith.truncf %53 : vector<8x64xf32> to vector<8x64xbf16>
    %cst_42 = arith.constant dense<0.000000e+00> : vector<8x192xf32>
    %67 = tpu.matmul %66, %57, %cst_42 {dimension_numbers = #tpu.dot_dimension_numbers<[1], [0], [0], [1], [0, 0, 1, 1], [], []>} : vector<8x64xbf16>, vector<64x192xbf16>, vector<8x192xf32> -> vector<8x192xf32>
    %68 = vector.broadcast %61 : vector<1x192xf32> to vector<8x192xf32>
    %69 = arith.addf %67, %68 : vector<8x192xf32>
    %70 = vector.extract_strided_slice %65 {offsets = [0, 0], sizes = [8, 128], strides = [1, 1]} : vector<8x192xf32> to vector<8x128xf32>
    %71 = vector.extract_strided_slice %69 {offsets = [0, 0], sizes = [8, 128], strides = [1, 1]} : vector<8x192xf32> to vector<8x128xf32>
    %72 = arith.addf %70, %71 : vector<8x128xf32>
    %73 = arith.negf %72 : vector<8x128xf32>
    %74 = math.exp %73 : vector<8x128xf32>
    %cst_43 = arith.constant 1.000000e+00 : f32
    %75 = vector.broadcast %cst_43 : f32 to vector<8x128xf32>
    %76 = arith.addf %75, %74 : vector<8x128xf32>
    %77 = arith.divf %75, %76 : vector<8x128xf32>
    %78 = vector.extract_strided_slice %77 {offsets = [0, 0], sizes = [8, 64], strides = [1, 1]} : vector<8x128xf32> to vector<8x64xf32>
    %79 = vector.extract_strided_slice %77 {offsets = [0, 64], sizes = [8, 64], strides = [1, 1]} : vector<8x128xf32> to vector<8x64xf32>
    %80 = vector.extract_strided_slice %65 {offsets = [0, 128], sizes = [8, 64], strides = [1, 1]} : vector<8x192xf32> to vector<8x64xf32>
    %81 = vector.extract_strided_slice %69 {offsets = [0, 128], sizes = [8, 64], strides = [1, 1]} : vector<8x192xf32> to vector<8x64xf32>
    %82 = arith.mulf %78, %81 : vector<8x64xf32>
    %83 = arith.addf %80, %82 : vector<8x64xf32>
    %84 = math.tanh %83 : vector<8x64xf32>
    %cst_44 = arith.constant 1.000000e+00 : f32
    %85 = vector.broadcast %cst_44 : f32 to vector<8x64xf32>
    %86 = arith.subf %85, %79 : vector<8x64xf32>
    %87 = arith.mulf %86, %84 : vector<8x64xf32>
    %88 = arith.mulf %79, %53 : vector<8x64xf32>
    %89 = arith.addf %87, %88 : vector<8x64xf32>
    %c1_45 = arith.constant 1 : index
    %c0_46 = arith.constant 0 : index
    %c0_47 = arith.constant 0 : index
    %90 = vector.load %arg8[%c1_45, %c0_46, %c0_47] : memref<2x8x64xf32, #tpu.memory_space<vmem>>, vector<1x8x64xf32>
    %91 = vector.shape_cast %90 : vector<1x8x64xf32> to vector<8x64xf32>
    %92 = vector.shape_cast %89 : vector<8x64xf32> to vector<1x8x64xf32>
    tpu.vector_store %arg8[%c1_45, %c0_46, %c0_47], %92 {strides = array<i32>} : memref<2x8x64xf32, #tpu.memory_space<vmem>>, vector<1x8x64xf32>,
    %93 = tpu.concatenate %89, %4 in 1 : vector<8x64xf32>, vector<8x64xf32> -> vector<8x128xf32>
    %c1_i32 = arith.constant 1 : i32
    %94 = arith.addi %6, %c1_i32 : i32
    %95 = vector.broadcast %94 : i32 to vector<8x1xi32>
    %96 = arith.cmpi eq, %3, %95 : vector<8x1xi32>
    %c0_48 = arith.constant 0 : index
    %c0_49 = arith.constant 0 : index
    %97 = vector.load %arg7[%c0_48, %c0_49] : memref<8x128xf32, #tpu.memory_space<vmem>>, vector<8x128xf32>
    %98 = vector.shape_cast %96 : vector<8x1xi1> to vector<8x1xi1>
    %99 = vector.broadcast %98 : vector<8x1xi1> to vector<8x128xi1>
    %100 = arith.select %99, %93, %97 : vector<8x128xi1>, vector<8x128xf32>
    %c0_50 = arith.constant 0 : index
    %c0_51 = arith.constant 0 : index
    %101 = vector.load %arg7[%c0_50, %c0_51] : memref<8x128xf32, #tpu.memory_space<vmem>>, vector<8x128xf32>
    tpu.vector_store %arg7[%c0_50, %c0_51], %100 {strides = array<i32>} : memref<8x128xf32, #tpu.memory_space<vmem>>, vector<8x128xf32>,
    %c1_i32_52 = arith.constant 1 : i32
    %c8_i32_53 = arith.constant 8 : i32
    %102 = arith.muli %arg0, %c8_i32_53 : i32
    %103 = arith.addi %102, %c1_i32_52 : i32
    %104 = arith.index_cast %c1_i32_52 : i32 to index
    %c0_54 = arith.constant 0 : index
    %c0_55 = arith.constant 0 : index
    %105 = vector.load %arg1[%104, %c0_54, %c0_55] : memref<8x8x16xf32, #tpu.memory_space<vmem>>, vector<1x8x16xf32>
    %106 = vector.shape_cast %105 : vector<1x8x16xf32> to vector<8x16xf32>
    %c0_56 = arith.constant 0 : index
    %c0_57 = arith.constant 0 : index
    %c0_58 = arith.constant 0 : index
    %107 = vector.load %arg8[%c0_56, %c0_57, %c0_58] : memref<2x8x64xf32, #tpu.memory_space<vmem>>, vector<1x8x64xf32>
    %108 = vector.shape_cast %107 : vector<1x8x64xf32> to vector<8x64xf32>
    %c0_59 = arith.constant 0 : index
    %c0_60 = arith.constant 0 : index
    %c0_61 = arith.constant 0 : index
    %109 = vector.load %arg3[%c0_59, %c0_60, %c0_61] : memref<2x64x192xbf16, #tpu.memory_space<vmem>>, vector<1x64x192xbf16>
    %110 = vector.shape_cast %109 : vector<1x64x192xbf16> to vector<64x192xbf16>
    %111 = vector.extract_strided_slice %110 {offsets = [0, 0], sizes = [16, 192], strides = [1, 1]} : vector<64x192xbf16> to vector<16x192xbf16>
    %c0_62 = arith.constant 0 : index
    %c0_63 = arith.constant 0 : index
    %c0_64 = arith.constant 0 : index
    %112 = vector.load %arg4[%c0_62, %c0_63, %c0_64] : memref<2x64x192xbf16, #tpu.memory_space<vmem>>, vector<1x64x192xbf16>
    %113 = vector.shape_cast %112 : vector<1x64x192xbf16> to vector<64x192xbf16>
    %c0_65 = arith.constant 0 : index
    %c0_66 = arith.constant 0 : index
    %c0_67 = arith.constant 0 : index
    %114 = vector.load %arg5[%c0_65, %c0_66, %c0_67] : memref<2x1x192xf32, #tpu.memory_space<vmem>>, vector<1x1x192xf32>
    %115 = vector.shape_cast %114 : vector<1x1x192xf32> to vector<1x192xf32>
    %c0_68 = arith.constant 0 : index
    %c0_69 = arith.constant 0 : index
    %c0_70 = arith.constant 0 : index
    %116 = vector.load %arg6[%c0_68, %c0_69, %c0_70] : memref<2x1x192xf32, #tpu.memory_space<vmem>>, vector<1x1x192xf32>
    %117 = vector.shape_cast %116 : vector<1x1x192xf32> to vector<1x192xf32>
    %118 = arith.truncf %106 : vector<8x16xf32> to vector<8x16xbf16>
    %cst_71 = arith.constant dense<0.000000e+00> : vector<8x192xf32>
    %119 = tpu.matmul %118, %111, %cst_71 {dimension_numbers = #tpu.dot_dimension_numbers<[1], [0], [0], [1], [0, 0, 1, 1], [], []>} : vector<8x16xbf16>, vector<16x192xbf16>, vector<8x192xf32> -> vector<8x192xf32>
    %120 = vector.broadcast %115 : vector<1x192xf32> to vector<8x192xf32>
    %121 = arith.addf %119, %120 : vector<8x192xf32>
    %122 = arith.truncf %108 : vector<8x64xf32> to vector<8x64xbf16>
    %cst_72 = arith.constant dense<0.000000e+00> : vector<8x192xf32>
    %123 = tpu.matmul %122, %113, %cst_72 {dimension_numbers = #tpu.dot_dimension_numbers<[1], [0], [0], [1], [0, 0, 1, 1], [], []>} : vector<8x64xbf16>, vector<64x192xbf16>, vector<8x192xf32> -> vector<8x192xf32>
    %124 = vector.broadcast %117 : vector<1x192xf32> to vector<8x192xf32>
    %125 = arith.addf %123, %124 : vector<8x192xf32>
    %126 = vector.extract_strided_slice %121 {offsets = [0, 0], sizes = [8, 128], strides = [1, 1]} : vector<8x192xf32> to vector<8x128xf32>
    %127 = vector.extract_strided_slice %125 {offsets = [0, 0], sizes = [8, 128], strides = [1, 1]} : vector<8x192xf32> to vector<8x128xf32>
    %128 = arith.addf %126, %127 : vector<8x128xf32>
    %129 = arith.negf %128 : vector<8x128xf32>
    %130 = math.exp %129 : vector<8x128xf32>
    %cst_73 = arith.constant 1.000000e+00 : f32
    %131 = vector.broadcast %cst_73 : f32 to vector<8x128xf32>
    %132 = arith.addf %131, %130 : vector<8x128xf32>
    %133 = arith.divf %131, %132 : vector<8x128xf32>
    %134 = vector.extract_strided_slice %133 {offsets = [0, 0], sizes = [8, 64], strides = [1, 1]} : vector<8x128xf32> to vector<8x64xf32>
    %135 = vector.extract_strided_slice %133 {offsets = [0, 64], sizes = [8, 64], strides = [1, 1]} : vector<8x128xf32> to vector<8x64xf32>
    %136 = vector.extract_strided_slice %121 {offsets = [0, 128], sizes = [8, 64], strides = [1, 1]} : vector<8x192xf32> to vector<8x64xf32>
    %137 = vector.extract_strided_slice %125 {offsets = [0, 128], sizes = [8, 64], strides = [1, 1]} : vector<8x192xf32> to vector<8x64xf32>
    %138 = arith.mulf %134, %137 : vector<8x64xf32>
    %139 = arith.addf %136, %138 : vector<8x64xf32>
    %140 = math.tanh %139 : vector<8x64xf32>
    %cst_74 = arith.constant 1.000000e+00 : f32
    %141 = vector.broadcast %cst_74 : f32 to vector<8x64xf32>
    %142 = arith.subf %141, %135 : vector<8x64xf32>
    %143 = arith.mulf %142, %140 : vector<8x64xf32>
    %144 = arith.mulf %135, %108 : vector<8x64xf32>
    %145 = arith.addf %143, %144 : vector<8x64xf32>
    %c0_75 = arith.constant 0 : index
    %c0_76 = arith.constant 0 : index
    %c0_77 = arith.constant 0 : index
    %146 = vector.load %arg8[%c0_75, %c0_76, %c0_77] : memref<2x8x64xf32, #tpu.memory_space<vmem>>, vector<1x8x64xf32>
    %147 = vector.shape_cast %146 : vector<1x8x64xf32> to vector<8x64xf32>
    %148 = vector.shape_cast %145 : vector<8x64xf32> to vector<1x8x64xf32>
    tpu.vector_store %arg8[%c0_75, %c0_76, %c0_77], %148 {strides = array<i32>} : memref<2x8x64xf32, #tpu.memory_space<vmem>>, vector<1x8x64xf32>,
    %c1_78 = arith.constant 1 : index
    %c0_79 = arith.constant 0 : index
    %c0_80 = arith.constant 0 : index
    %149 = vector.load %arg8[%c1_78, %c0_79, %c0_80] : memref<2x8x64xf32, #tpu.memory_space<vmem>>, vector<1x8x64xf32>
    %150 = vector.shape_cast %149 : vector<1x8x64xf32> to vector<8x64xf32>
    %c1_81 = arith.constant 1 : index
    %c0_82 = arith.constant 0 : index
    %c0_83 = arith.constant 0 : index
    %151 = vector.load %arg3[%c1_81, %c0_82, %c0_83] : memref<2x64x192xbf16, #tpu.memory_space<vmem>>, vector<1x64x192xbf16>
    %152 = vector.shape_cast %151 : vector<1x64x192xbf16> to vector<64x192xbf16>
    %c1_84 = arith.constant 1 : index
    %c0_85 = arith.constant 0 : index
    %c0_86 = arith.constant 0 : index
    %153 = vector.load %arg4[%c1_84, %c0_85, %c0_86] : memref<2x64x192xbf16, #tpu.memory_space<vmem>>, vector<1x64x192xbf16>
    %154 = vector.shape_cast %153 : vector<1x64x192xbf16> to vector<64x192xbf16>
    %c1_87 = arith.constant 1 : index
    %c0_88 = arith.constant 0 : index
    %c0_89 = arith.constant 0 : index
    %155 = vector.load %arg5[%c1_87, %c0_88, %c0_89] : memref<2x1x192xf32, #tpu.memory_space<vmem>>, vector<1x1x192xf32>
    %156 = vector.shape_cast %155 : vector<1x1x192xf32> to vector<1x192xf32>
    %c1_90 = arith.constant 1 : index
    %c0_91 = arith.constant 0 : index
    %c0_92 = arith.constant 0 : index
    %157 = vector.load %arg6[%c1_90, %c0_91, %c0_92] : memref<2x1x192xf32, #tpu.memory_space<vmem>>, vector<1x1x192xf32>
    %158 = vector.shape_cast %157 : vector<1x1x192xf32> to vector<1x192xf32>
    %159 = arith.truncf %145 : vector<8x64xf32> to vector<8x64xbf16>
    %cst_93 = arith.constant dense<0.000000e+00> : vector<8x192xf32>
    %160 = tpu.matmul %159, %152, %cst_93 {dimension_numbers = #tpu.dot_dimension_numbers<[1], [0], [0], [1], [0, 0, 1, 1], [], []>} : vector<8x64xbf16>, vector<64x192xbf16>, vector<8x192xf32> -> vector<8x192xf32>
    %161 = vector.broadcast %156 : vector<1x192xf32> to vector<8x192xf32>
    %162 = arith.addf %160, %161 : vector<8x192xf32>
    %163 = arith.truncf %150 : vector<8x64xf32> to vector<8x64xbf16>
    %cst_94 = arith.constant dense<0.000000e+00> : vector<8x192xf32>
    %164 = tpu.matmul %163, %154, %cst_94 {dimension_numbers = #tpu.dot_dimension_numbers<[1], [0], [0], [1], [0, 0, 1, 1], [], []>} : vector<8x64xbf16>, vector<64x192xbf16>, vector<8x192xf32> -> vector<8x192xf32>
    %165 = vector.broadcast %158 : vector<1x192xf32> to vector<8x192xf32>
    %166 = arith.addf %164, %165 : vector<8x192xf32>
    %167 = vector.extract_strided_slice %162 {offsets = [0, 0], sizes = [8, 128], strides = [1, 1]} : vector<8x192xf32> to vector<8x128xf32>
    %168 = vector.extract_strided_slice %166 {offsets = [0, 0], sizes = [8, 128], strides = [1, 1]} : vector<8x192xf32> to vector<8x128xf32>
    %169 = arith.addf %167, %168 : vector<8x128xf32>
    %170 = arith.negf %169 : vector<8x128xf32>
    %171 = math.exp %170 : vector<8x128xf32>
    %cst_95 = arith.constant 1.000000e+00 : f32
    %172 = vector.broadcast %cst_95 : f32 to vector<8x128xf32>
    %173 = arith.addf %172, %171 : vector<8x128xf32>
    %174 = arith.divf %172, %173 : vector<8x128xf32>
    %175 = vector.extract_strided_slice %174 {offsets = [0, 0], sizes = [8, 64], strides = [1, 1]} : vector<8x128xf32> to vector<8x64xf32>
    %176 = vector.extract_strided_slice %174 {offsets = [0, 64], sizes = [8, 64], strides = [1, 1]} : vector<8x128xf32> to vector<8x64xf32>
    %177 = vector.extract_strided_slice %162 {offsets = [0, 128], sizes = [8, 64], strides = [1, 1]} : vector<8x192xf32> to vector<8x64xf32>
    %178 = vector.extract_strided_slice %166 {offsets = [0, 128], sizes = [8, 64], strides = [1, 1]} : vector<8x192xf32> to vector<8x64xf32>
    %179 = arith.mulf %175, %178 : vector<8x64xf32>
    %180 = arith.addf %177, %179 : vector<8x64xf32>
    %181 = math.tanh %180 : vector<8x64xf32>
    %cst_96 = arith.constant 1.000000e+00 : f32
    %182 = vector.broadcast %cst_96 : f32 to vector<8x64xf32>
    %183 = arith.subf %182, %176 : vector<8x64xf32>
    %184 = arith.mulf %183, %181 : vector<8x64xf32>
    %185 = arith.mulf %176, %150 : vector<8x64xf32>
    %186 = arith.addf %184, %185 : vector<8x64xf32>
    %c1_97 = arith.constant 1 : index
    %c0_98 = arith.constant 0 : index
    %c0_99 = arith.constant 0 : index
    %187 = vector.load %arg8[%c1_97, %c0_98, %c0_99] : memref<2x8x64xf32, #tpu.memory_space<vmem>>, vector<1x8x64xf32>
    %188 = vector.shape_cast %187 : vector<1x8x64xf32> to vector<8x64xf32>
    %189 = vector.shape_cast %186 : vector<8x64xf32> to vector<1x8x64xf32>
    tpu.vector_store %arg8[%c1_97, %c0_98, %c0_99], %189 {strides = array<i32>} : memref<2x8x64xf32, #tpu.memory_space<vmem>>, vector<1x8x64xf32>,
    %190 = tpu.concatenate %186, %4 in 1 : vector<8x64xf32>, vector<8x64xf32> -> vector<8x128xf32>
    %c1_i32_100 = arith.constant 1 : i32
    %191 = arith.addi %103, %c1_i32_100 : i32
    %192 = vector.broadcast %191 : i32 to vector<8x1xi32>
    %193 = arith.cmpi eq, %3, %192 : vector<8x1xi32>
    %c0_101 = arith.constant 0 : index
    %c0_102 = arith.constant 0 : index
    %194 = vector.load %arg7[%c0_101, %c0_102] : memref<8x128xf32, #tpu.memory_space<vmem>>, vector<8x128xf32>
    %195 = vector.shape_cast %193 : vector<8x1xi1> to vector<8x1xi1>
    %196 = vector.broadcast %195 : vector<8x1xi1> to vector<8x128xi1>
    %197 = arith.select %196, %190, %194 : vector<8x128xi1>, vector<8x128xf32>
    %c0_103 = arith.constant 0 : index
    %c0_104 = arith.constant 0 : index
    %198 = vector.load %arg7[%c0_103, %c0_104] : memref<8x128xf32, #tpu.memory_space<vmem>>, vector<8x128xf32>
    tpu.vector_store %arg7[%c0_103, %c0_104], %197 {strides = array<i32>} : memref<8x128xf32, #tpu.memory_space<vmem>>, vector<8x128xf32>,
    %c2_i32 = arith.constant 2 : i32
    %c8_i32_105 = arith.constant 8 : i32
    %199 = arith.muli %arg0, %c8_i32_105 : i32
    %200 = arith.addi %199, %c2_i32 : i32
    %201 = arith.index_cast %c2_i32 : i32 to index
    %c0_106 = arith.constant 0 : index
    %c0_107 = arith.constant 0 : index
    %202 = vector.load %arg1[%201, %c0_106, %c0_107] : memref<8x8x16xf32, #tpu.memory_space<vmem>>, vector<1x8x16xf32>
    %203 = vector.shape_cast %202 : vector<1x8x16xf32> to vector<8x16xf32>
    %c0_108 = arith.constant 0 : index
    %c0_109 = arith.constant 0 : index
    %c0_110 = arith.constant 0 : index
    %204 = vector.load %arg8[%c0_108, %c0_109, %c0_110] : memref<2x8x64xf32, #tpu.memory_space<vmem>>, vector<1x8x64xf32>
    %205 = vector.shape_cast %204 : vector<1x8x64xf32> to vector<8x64xf32>
    %c0_111 = arith.constant 0 : index
    %c0_112 = arith.constant 0 : index
    %c0_113 = arith.constant 0 : index
    %206 = vector.load %arg3[%c0_111, %c0_112, %c0_113] : memref<2x64x192xbf16, #tpu.memory_space<vmem>>, vector<1x64x192xbf16>
    %207 = vector.shape_cast %206 : vector<1x64x192xbf16> to vector<64x192xbf16>
    %208 = vector.extract_strided_slice %207 {offsets = [0, 0], sizes = [16, 192], strides = [1, 1]} : vector<64x192xbf16> to vector<16x192xbf16>
    %c0_114 = arith.constant 0 : index
    %c0_115 = arith.constant 0 : index
    %c0_116 = arith.constant 0 : index
    %209 = vector.load %arg4[%c0_114, %c0_115, %c0_116] : memref<2x64x192xbf16, #tpu.memory_space<vmem>>, vector<1x64x192xbf16>
    %210 = vector.shape_cast %209 : vector<1x64x192xbf16> to vector<64x192xbf16>
    %c0_117 = arith.constant 0 : index
    %c0_118 = arith.constant 0 : index
    %c0_119 = arith.constant 0 : index
    %211 = vector.load %arg5[%c0_117, %c0_118, %c0_119] : memref<2x1x192xf32, #tpu.memory_space<vmem>>, vector<1x1x192xf32>
    %212 = vector.shape_cast %211 : vector<1x1x192xf32> to vector<1x192xf32>
    %c0_120 = arith.constant 0 : index
    %c0_121 = arith.constant 0 : index
    %c0_122 = arith.constant 0 : index
    %213 = vector.load %arg6[%c0_120, %c0_121, %c0_122] : memref<2x1x192xf32, #tpu.memory_space<vmem>>, vector<1x1x192xf32>
    %214 = vector.shape_cast %213 : vector<1x1x192xf32> to vector<1x192xf32>
    %215 = arith.truncf %203 : vector<8x16xf32> to vector<8x16xbf16>
    %cst_123 = arith.constant dense<0.000000e+00> : vector<8x192xf32>
    %216 = tpu.matmul %215, %208, %cst_123 {dimension_numbers = #tpu.dot_dimension_numbers<[1], [0], [0], [1], [0, 0, 1, 1], [], []>} : vector<8x16xbf16>, vector<16x192xbf16>, vector<8x192xf32> -> vector<8x192xf32>
    %217 = vector.broadcast %212 : vector<1x192xf32> to vector<8x192xf32>
    %218 = arith.addf %216, %217 : vector<8x192xf32>
    %219 = arith.truncf %205 : vector<8x64xf32> to vector<8x64xbf16>
    %cst_124 = arith.constant dense<0.000000e+00> : vector<8x192xf32>
    %220 = tpu.matmul %219, %210, %cst_124 {dimension_numbers = #tpu.dot_dimension_numbers<[1], [0], [0], [1], [0, 0, 1, 1], [], []>} : vector<8x64xbf16>, vector<64x192xbf16>, vector<8x192xf32> -> vector<8x192xf32>
    %221 = vector.broadcast %214 : vector<1x192xf32> to vector<8x192xf32>
    %222 = arith.addf %220, %221 : vector<8x192xf32>
    %223 = vector.extract_strided_slice %218 {offsets = [0, 0], sizes = [8, 128], strides = [1, 1]} : vector<8x192xf32> to vector<8x128xf32>
    %224 = vector.extract_strided_slice %222 {offsets = [0, 0], sizes = [8, 128], strides = [1, 1]} : vector<8x192xf32> to vector<8x128xf32>
    %225 = arith.addf %223, %224 : vector<8x128xf32>
    %226 = arith.negf %225 : vector<8x128xf32>
    %227 = math.exp %226 : vector<8x128xf32>
    %cst_125 = arith.constant 1.000000e+00 : f32
    %228 = vector.broadcast %cst_125 : f32 to vector<8x128xf32>
    %229 = arith.addf %228, %227 : vector<8x128xf32>
    %230 = arith.divf %228, %229 : vector<8x128xf32>
    %231 = vector.extract_strided_slice %230 {offsets = [0, 0], sizes = [8, 64], strides = [1, 1]} : vector<8x128xf32> to vector<8x64xf32>
    %232 = vector.extract_strided_slice %230 {offsets = [0, 64], sizes = [8, 64], strides = [1, 1]} : vector<8x128xf32> to vector<8x64xf32>
    %233 = vector.extract_strided_slice %218 {offsets = [0, 128], sizes = [8, 64], strides = [1, 1]} : vector<8x192xf32> to vector<8x64xf32>
    %234 = vector.extract_strided_slice %222 {offsets = [0, 128], sizes = [8, 64], strides = [1, 1]} : vector<8x192xf32> to vector<8x64xf32>
    %235 = arith.mulf %231, %234 : vector<8x64xf32>
    %236 = arith.addf %233, %235 : vector<8x64xf32>
    %237 = math.tanh %236 : vector<8x64xf32>
    %cst_126 = arith.constant 1.000000e+00 : f32
    %238 = vector.broadcast %cst_126 : f32 to vector<8x64xf32>
    %239 = arith.subf %238, %232 : vector<8x64xf32>
    %240 = arith.mulf %239, %237 : vector<8x64xf32>
    %241 = arith.mulf %232, %205 : vector<8x64xf32>
    %242 = arith.addf %240, %241 : vector<8x64xf32>
    %c0_127 = arith.constant 0 : index
    %c0_128 = arith.constant 0 : index
    %c0_129 = arith.constant 0 : index
    %243 = vector.load %arg8[%c0_127, %c0_128, %c0_129] : memref<2x8x64xf32, #tpu.memory_space<vmem>>, vector<1x8x64xf32>
    %244 = vector.shape_cast %243 : vector<1x8x64xf32> to vector<8x64xf32>
    %245 = vector.shape_cast %242 : vector<8x64xf32> to vector<1x8x64xf32>
    tpu.vector_store %arg8[%c0_127, %c0_128, %c0_129], %245 {strides = array<i32>} : memref<2x8x64xf32, #tpu.memory_space<vmem>>, vector<1x8x64xf32>,
    %c1_130 = arith.constant 1 : index
    %c0_131 = arith.constant 0 : index
    %c0_132 = arith.constant 0 : index
    %246 = vector.load %arg8[%c1_130, %c0_131, %c0_132] : memref<2x8x64xf32, #tpu.memory_space<vmem>>, vector<1x8x64xf32>
    %247 = vector.shape_cast %246 : vector<1x8x64xf32> to vector<8x64xf32>
    %c1_133 = arith.constant 1 : index
    %c0_134 = arith.constant 0 : index
    %c0_135 = arith.constant 0 : index
    %248 = vector.load %arg3[%c1_133, %c0_134, %c0_135] : memref<2x64x192xbf16, #tpu.memory_space<vmem>>, vector<1x64x192xbf16>
    %249 = vector.shape_cast %248 : vector<1x64x192xbf16> to vector<64x192xbf16>
    %c1_136 = arith.constant 1 : index
    %c0_137 = arith.constant 0 : index
    %c0_138 = arith.constant 0 : index
    %250 = vector.load %arg4[%c1_136, %c0_137, %c0_138] : memref<2x64x192xbf16, #tpu.memory_space<vmem>>, vector<1x64x192xbf16>
    %251 = vector.shape_cast %250 : vector<1x64x192xbf16> to vector<64x192xbf16>
    %c1_139 = arith.constant 1 : index
    %c0_140 = arith.constant 0 : index
    %c0_141 = arith.constant 0 : index
    %252 = vector.load %arg5[%c1_139, %c0_140, %c0_141] : memref<2x1x192xf32, #tpu.memory_space<vmem>>, vector<1x1x192xf32>
    %253 = vector.shape_cast %252 : vector<1x1x192xf32> to vector<1x192xf32>
    %c1_142 = arith.constant 1 : index
    %c0_143 = arith.constant 0 : index
    %c0_144 = arith.constant 0 : index
    %254 = vector.load %arg6[%c1_142, %c0_143, %c0_144] : memref<2x1x192xf32, #tpu.memory_space<vmem>>, vector<1x1x192xf32>
    %255 = vector.shape_cast %254 : vector<1x1x192xf32> to vector<1x192xf32>
    %256 = arith.truncf %242 : vector<8x64xf32> to vector<8x64xbf16>
    %cst_145 = arith.constant dense<0.000000e+00> : vector<8x192xf32>
    %257 = tpu.matmul %256, %249, %cst_145 {dimension_numbers = #tpu.dot_dimension_numbers<[1], [0], [0], [1], [0, 0, 1, 1], [], []>} : vector<8x64xbf16>, vector<64x192xbf16>, vector<8x192xf32> -> vector<8x192xf32>
    %258 = vector.broadcast %253 : vector<1x192xf32> to vector<8x192xf32>
    %259 = arith.addf %257, %258 : vector<8x192xf32>
    %260 = arith.truncf %247 : vector<8x64xf32> to vector<8x64xbf16>
    %cst_146 = arith.constant dense<0.000000e+00> : vector<8x192xf32>
    %261 = tpu.matmul %260, %251, %cst_146 {dimension_numbers = #tpu.dot_dimension_numbers<[1], [0], [0], [1], [0, 0, 1, 1], [], []>} : vector<8x64xbf16>, vector<64x192xbf16>, vector<8x192xf32> -> vector<8x192xf32>
    %262 = vector.broadcast %255 : vector<1x192xf32> to vector<8x192xf32>
    %263 = arith.addf %261, %262 : vector<8x192xf32>
    %264 = vector.extract_strided_slice %259 {offsets = [0, 0], sizes = [8, 128], strides = [1, 1]} : vector<8x192xf32> to vector<8x128xf32>
    %265 = vector.extract_strided_slice %263 {offsets = [0, 0], sizes = [8, 128], strides = [1, 1]} : vector<8x192xf32> to vector<8x128xf32>
    %266 = arith.addf %264, %265 : vector<8x128xf32>
    %267 = arith.negf %266 : vector<8x128xf32>
    %268 = math.exp %267 : vector<8x128xf32>
    %cst_147 = arith.constant 1.000000e+00 : f32
    %269 = vector.broadcast %cst_147 : f32 to vector<8x128xf32>
    %270 = arith.addf %269, %268 : vector<8x128xf32>
    %271 = arith.divf %269, %270 : vector<8x128xf32>
    %272 = vector.extract_strided_slice %271 {offsets = [0, 0], sizes = [8, 64], strides = [1, 1]} : vector<8x128xf32> to vector<8x64xf32>
    %273 = vector.extract_strided_slice %271 {offsets = [0, 64], sizes = [8, 64], strides = [1, 1]} : vector<8x128xf32> to vector<8x64xf32>
    %274 = vector.extract_strided_slice %259 {offsets = [0, 128], sizes = [8, 64], strides = [1, 1]} : vector<8x192xf32> to vector<8x64xf32>
    %275 = vector.extract_strided_slice %263 {offsets = [0, 128], sizes = [8, 64], strides = [1, 1]} : vector<8x192xf32> to vector<8x64xf32>
    %276 = arith.mulf %272, %275 : vector<8x64xf32>
    %277 = arith.addf %274, %276 : vector<8x64xf32>
    %278 = math.tanh %277 : vector<8x64xf32>
    %cst_148 = arith.constant 1.000000e+00 : f32
    %279 = vector.broadcast %cst_148 : f32 to vector<8x64xf32>
    %280 = arith.subf %279, %273 : vector<8x64xf32>
    %281 = arith.mulf %280, %278 : vector<8x64xf32>
    %282 = arith.mulf %273, %247 : vector<8x64xf32>
    %283 = arith.addf %281, %282 : vector<8x64xf32>
    %c1_149 = arith.constant 1 : index
    %c0_150 = arith.constant 0 : index
    %c0_151 = arith.constant 0 : index
    %284 = vector.load %arg8[%c1_149, %c0_150, %c0_151] : memref<2x8x64xf32, #tpu.memory_space<vmem>>, vector<1x8x64xf32>
    %285 = vector.shape_cast %284 : vector<1x8x64xf32> to vector<8x64xf32>
    %286 = vector.shape_cast %283 : vector<8x64xf32> to vector<1x8x64xf32>
    tpu.vector_store %arg8[%c1_149, %c0_150, %c0_151], %286 {strides = array<i32>} : memref<2x8x64xf32, #tpu.memory_space<vmem>>, vector<1x8x64xf32>,
    %287 = tpu.concatenate %283, %4 in 1 : vector<8x64xf32>, vector<8x64xf32> -> vector<8x128xf32>
    %c1_i32_152 = arith.constant 1 : i32
    %288 = arith.addi %200, %c1_i32_152 : i32
    %289 = vector.broadcast %288 : i32 to vector<8x1xi32>
    %290 = arith.cmpi eq, %3, %289 : vector<8x1xi32>
    %c0_153 = arith.constant 0 : index
    %c0_154 = arith.constant 0 : index
    %291 = vector.load %arg7[%c0_153, %c0_154] : memref<8x128xf32, #tpu.memory_space<vmem>>, vector<8x128xf32>
    %292 = vector.shape_cast %290 : vector<8x1xi1> to vector<8x1xi1>
    %293 = vector.broadcast %292 : vector<8x1xi1> to vector<8x128xi1>
    %294 = arith.select %293, %287, %291 : vector<8x128xi1>, vector<8x128xf32>
    %c0_155 = arith.constant 0 : index
    %c0_156 = arith.constant 0 : index
    %295 = vector.load %arg7[%c0_155, %c0_156] : memref<8x128xf32, #tpu.memory_space<vmem>>, vector<8x128xf32>
    tpu.vector_store %arg7[%c0_155, %c0_156], %294 {strides = array<i32>} : memref<8x128xf32, #tpu.memory_space<vmem>>, vector<8x128xf32>,
    %c3_i32 = arith.constant 3 : i32
    %c8_i32_157 = arith.constant 8 : i32
    %296 = arith.muli %arg0, %c8_i32_157 : i32
    %297 = arith.addi %296, %c3_i32 : i32
    %298 = arith.index_cast %c3_i32 : i32 to index
    %c0_158 = arith.constant 0 : index
    %c0_159 = arith.constant 0 : index
    %299 = vector.load %arg1[%298, %c0_158, %c0_159] : memref<8x8x16xf32, #tpu.memory_space<vmem>>, vector<1x8x16xf32>
    %300 = vector.shape_cast %299 : vector<1x8x16xf32> to vector<8x16xf32>
    %c0_160 = arith.constant 0 : index
    %c0_161 = arith.constant 0 : index
    %c0_162 = arith.constant 0 : index
    %301 = vector.load %arg8[%c0_160, %c0_161, %c0_162] : memref<2x8x64xf32, #tpu.memory_space<vmem>>, vector<1x8x64xf32>
    %302 = vector.shape_cast %301 : vector<1x8x64xf32> to vector<8x64xf32>
    %c0_163 = arith.constant 0 : index
    %c0_164 = arith.constant 0 : index
    %c0_165 = arith.constant 0 : index
    %303 = vector.load %arg3[%c0_163, %c0_164, %c0_165] : memref<2x64x192xbf16, #tpu.memory_space<vmem>>, vector<1x64x192xbf16>
    %304 = vector.shape_cast %303 : vector<1x64x192xbf16> to vector<64x192xbf16>
    %305 = vector.extract_strided_slice %304 {offsets = [0, 0], sizes = [16, 192], strides = [1, 1]} : vector<64x192xbf16> to vector<16x192xbf16>
    %c0_166 = arith.constant 0 : index
    %c0_167 = arith.constant 0 : index
    %c0_168 = arith.constant 0 : index
    %306 = vector.load %arg4[%c0_166, %c0_167, %c0_168] : memref<2x64x192xbf16, #tpu.memory_space<vmem>>, vector<1x64x192xbf16>
    %307 = vector.shape_cast %306 : vector<1x64x192xbf16> to vector<64x192xbf16>
    %c0_169 = arith.constant 0 : index
    %c0_170 = arith.constant 0 : index
    %c0_171 = arith.constant 0 : index
    %308 = vector.load %arg5[%c0_169, %c0_170, %c0_171] : memref<2x1x192xf32, #tpu.memory_space<vmem>>, vector<1x1x192xf32>
    %309 = vector.shape_cast %308 : vector<1x1x192xf32> to vector<1x192xf32>
    %c0_172 = arith.constant 0 : index
    %c0_173 = arith.constant 0 : index
    %c0_174 = arith.constant 0 : index
    %310 = vector.load %arg6[%c0_172, %c0_173, %c0_174] : memref<2x1x192xf32, #tpu.memory_space<vmem>>, vector<1x1x192xf32>
    %311 = vector.shape_cast %310 : vector<1x1x192xf32> to vector<1x192xf32>
    %312 = arith.truncf %300 : vector<8x16xf32> to vector<8x16xbf16>
    %cst_175 = arith.constant dense<0.000000e+00> : vector<8x192xf32>
    %313 = tpu.matmul %312, %305, %cst_175 {dimension_numbers = #tpu.dot_dimension_numbers<[1], [0], [0], [1], [0, 0, 1, 1], [], []>} : vector<8x16xbf16>, vector<16x192xbf16>, vector<8x192xf32> -> vector<8x192xf32>
    %314 = vector.broadcast %309 : vector<1x192xf32> to vector<8x192xf32>
    %315 = arith.addf %313, %314 : vector<8x192xf32>
    %316 = arith.truncf %302 : vector<8x64xf32> to vector<8x64xbf16>
    %cst_176 = arith.constant dense<0.000000e+00> : vector<8x192xf32>
    %317 = tpu.matmul %316, %307, %cst_176 {dimension_numbers = #tpu.dot_dimension_numbers<[1], [0], [0], [1], [0, 0, 1, 1], [], []>} : vector<8x64xbf16>, vector<64x192xbf16>, vector<8x192xf32> -> vector<8x192xf32>
    %318 = vector.broadcast %311 : vector<1x192xf32> to vector<8x192xf32>
    %319 = arith.addf %317, %318 : vector<8x192xf32>
    %320 = vector.extract_strided_slice %315 {offsets = [0, 0], sizes = [8, 128], strides = [1, 1]} : vector<8x192xf32> to vector<8x128xf32>
    %321 = vector.extract_strided_slice %319 {offsets = [0, 0], sizes = [8, 128], strides = [1, 1]} : vector<8x192xf32> to vector<8x128xf32>
    %322 = arith.addf %320, %321 : vector<8x128xf32>
    %323 = arith.negf %322 : vector<8x128xf32>
    %324 = math.exp %323 : vector<8x128xf32>
    %cst_177 = arith.constant 1.000000e+00 : f32
    %325 = vector.broadcast %cst_177 : f32 to vector<8x128xf32>
    %326 = arith.addf %325, %324 : vector<8x128xf32>
    %327 = arith.divf %325, %326 : vector<8x128xf32>
    %328 = vector.extract_strided_slice %327 {offsets = [0, 0], sizes = [8, 64], strides = [1, 1]} : vector<8x128xf32> to vector<8x64xf32>
    %329 = vector.extract_strided_slice %327 {offsets = [0, 64], sizes = [8, 64], strides = [1, 1]} : vector<8x128xf32> to vector<8x64xf32>
    %330 = vector.extract_strided_slice %315 {offsets = [0, 128], sizes = [8, 64], strides = [1, 1]} : vector<8x192xf32> to vector<8x64xf32>
    %331 = vector.extract_strided_slice %319 {offsets = [0, 128], sizes = [8, 64], strides = [1, 1]} : vector<8x192xf32> to vector<8x64xf32>
    %332 = arith.mulf %328, %331 : vector<8x64xf32>
    %333 = arith.addf %330, %332 : vector<8x64xf32>
    %334 = math.tanh %333 : vector<8x64xf32>
    %cst_178 = arith.constant 1.000000e+00 : f32
    %335 = vector.broadcast %cst_178 : f32 to vector<8x64xf32>
    %336 = arith.subf %335, %329 : vector<8x64xf32>
    %337 = arith.mulf %336, %334 : vector<8x64xf32>
    %338 = arith.mulf %329, %302 : vector<8x64xf32>
    %339 = arith.addf %337, %338 : vector<8x64xf32>
    %c0_179 = arith.constant 0 : index
    %c0_180 = arith.constant 0 : index
    %c0_181 = arith.constant 0 : index
    %340 = vector.load %arg8[%c0_179, %c0_180, %c0_181] : memref<2x8x64xf32, #tpu.memory_space<vmem>>, vector<1x8x64xf32>
    %341 = vector.shape_cast %340 : vector<1x8x64xf32> to vector<8x64xf32>
    %342 = vector.shape_cast %339 : vector<8x64xf32> to vector<1x8x64xf32>
    tpu.vector_store %arg8[%c0_179, %c0_180, %c0_181], %342 {strides = array<i32>} : memref<2x8x64xf32, #tpu.memory_space<vmem>>, vector<1x8x64xf32>,
    %c1_182 = arith.constant 1 : index
    %c0_183 = arith.constant 0 : index
    %c0_184 = arith.constant 0 : index
    %343 = vector.load %arg8[%c1_182, %c0_183, %c0_184] : memref<2x8x64xf32, #tpu.memory_space<vmem>>, vector<1x8x64xf32>
    %344 = vector.shape_cast %343 : vector<1x8x64xf32> to vector<8x64xf32>
    %c1_185 = arith.constant 1 : index
    %c0_186 = arith.constant 0 : index
    %c0_187 = arith.constant 0 : index
    %345 = vector.load %arg3[%c1_185, %c0_186, %c0_187] : memref<2x64x192xbf16, #tpu.memory_space<vmem>>, vector<1x64x192xbf16>
    %346 = vector.shape_cast %345 : vector<1x64x192xbf16> to vector<64x192xbf16>
    %c1_188 = arith.constant 1 : index
    %c0_189 = arith.constant 0 : index
    %c0_190 = arith.constant 0 : index
    %347 = vector.load %arg4[%c1_188, %c0_189, %c0_190] : memref<2x64x192xbf16, #tpu.memory_space<vmem>>, vector<1x64x192xbf16>
    %348 = vector.shape_cast %347 : vector<1x64x192xbf16> to vector<64x192xbf16>
    %c1_191 = arith.constant 1 : index
    %c0_192 = arith.constant 0 : index
    %c0_193 = arith.constant 0 : index
    %349 = vector.load %arg5[%c1_191, %c0_192, %c0_193] : memref<2x1x192xf32, #tpu.memory_space<vmem>>, vector<1x1x192xf32>
    %350 = vector.shape_cast %349 : vector<1x1x192xf32> to vector<1x192xf32>
    %c1_194 = arith.constant 1 : index
    %c0_195 = arith.constant 0 : index
    %c0_196 = arith.constant 0 : index
    %351 = vector.load %arg6[%c1_194, %c0_195, %c0_196] : memref<2x1x192xf32, #tpu.memory_space<vmem>>, vector<1x1x192xf32>
    %352 = vector.shape_cast %351 : vector<1x1x192xf32> to vector<1x192xf32>
    %353 = arith.truncf %339 : vector<8x64xf32> to vector<8x64xbf16>
    %cst_197 = arith.constant dense<0.000000e+00> : vector<8x192xf32>
    %354 = tpu.matmul %353, %346, %cst_197 {dimension_numbers = #tpu.dot_dimension_numbers<[1], [0], [0], [1], [0, 0, 1, 1], [], []>} : vector<8x64xbf16>, vector<64x192xbf16>, vector<8x192xf32> -> vector<8x192xf32>
    %355 = vector.broadcast %350 : vector<1x192xf32> to vector<8x192xf32>
    %356 = arith.addf %354, %355 : vector<8x192xf32>
    %357 = arith.truncf %344 : vector<8x64xf32> to vector<8x64xbf16>
    %cst_198 = arith.constant dense<0.000000e+00> : vector<8x192xf32>
    %358 = tpu.matmul %357, %348, %cst_198 {dimension_numbers = #tpu.dot_dimension_numbers<[1], [0], [0], [1], [0, 0, 1, 1], [], []>} : vector<8x64xbf16>, vector<64x192xbf16>, vector<8x192xf32> -> vector<8x192xf32>
    %359 = vector.broadcast %352 : vector<1x192xf32> to vector<8x192xf32>
    %360 = arith.addf %358, %359 : vector<8x192xf32>
    %361 = vector.extract_strided_slice %356 {offsets = [0, 0], sizes = [8, 128], strides = [1, 1]} : vector<8x192xf32> to vector<8x128xf32>
    %362 = vector.extract_strided_slice %360 {offsets = [0, 0], sizes = [8, 128], strides = [1, 1]} : vector<8x192xf32> to vector<8x128xf32>
    %363 = arith.addf %361, %362 : vector<8x128xf32>
    %364 = arith.negf %363 : vector<8x128xf32>
    %365 = math.exp %364 : vector<8x128xf32>
    %cst_199 = arith.constant 1.000000e+00 : f32
    %366 = vector.broadcast %cst_199 : f32 to vector<8x128xf32>
    %367 = arith.addf %366, %365 : vector<8x128xf32>
    %368 = arith.divf %366, %367 : vector<8x128xf32>
    %369 = vector.extract_strided_slice %368 {offsets = [0, 0], sizes = [8, 64], strides = [1, 1]} : vector<8x128xf32> to vector<8x64xf32>
    %370 = vector.extract_strided_slice %368 {offsets = [0, 64], sizes = [8, 64], strides = [1, 1]} : vector<8x128xf32> to vector<8x64xf32>
    %371 = vector.extract_strided_slice %356 {offsets = [0, 128], sizes = [8, 64], strides = [1, 1]} : vector<8x192xf32> to vector<8x64xf32>
    %372 = vector.extract_strided_slice %360 {offsets = [0, 128], sizes = [8, 64], strides = [1, 1]} : vector<8x192xf32> to vector<8x64xf32>
    %373 = arith.mulf %369, %372 : vector<8x64xf32>
    %374 = arith.addf %371, %373 : vector<8x64xf32>
    %375 = math.tanh %374 : vector<8x64xf32>
    %cst_200 = arith.constant 1.000000e+00 : f32
    %376 = vector.broadcast %cst_200 : f32 to vector<8x64xf32>
    %377 = arith.subf %376, %370 : vector<8x64xf32>
    %378 = arith.mulf %377, %375 : vector<8x64xf32>
    %379 = arith.mulf %370, %344 : vector<8x64xf32>
    %380 = arith.addf %378, %379 : vector<8x64xf32>
    %c1_201 = arith.constant 1 : index
    %c0_202 = arith.constant 0 : index
    %c0_203 = arith.constant 0 : index
    %381 = vector.load %arg8[%c1_201, %c0_202, %c0_203] : memref<2x8x64xf32, #tpu.memory_space<vmem>>, vector<1x8x64xf32>
    %382 = vector.shape_cast %381 : vector<1x8x64xf32> to vector<8x64xf32>
    %383 = vector.shape_cast %380 : vector<8x64xf32> to vector<1x8x64xf32>
    tpu.vector_store %arg8[%c1_201, %c0_202, %c0_203], %383 {strides = array<i32>} : memref<2x8x64xf32, #tpu.memory_space<vmem>>, vector<1x8x64xf32>,
    %384 = tpu.concatenate %380, %4 in 1 : vector<8x64xf32>, vector<8x64xf32> -> vector<8x128xf32>
    %c1_i32_204 = arith.constant 1 : i32
    %385 = arith.addi %297, %c1_i32_204 : i32
    %386 = vector.broadcast %385 : i32 to vector<8x1xi32>
    %387 = arith.cmpi eq, %3, %386 : vector<8x1xi32>
    %c0_205 = arith.constant 0 : index
    %c0_206 = arith.constant 0 : index
    %388 = vector.load %arg7[%c0_205, %c0_206] : memref<8x128xf32, #tpu.memory_space<vmem>>, vector<8x128xf32>
    %389 = vector.shape_cast %387 : vector<8x1xi1> to vector<8x1xi1>
    %390 = vector.broadcast %389 : vector<8x1xi1> to vector<8x128xi1>
    %391 = arith.select %390, %384, %388 : vector<8x128xi1>, vector<8x128xf32>
    %c0_207 = arith.constant 0 : index
    %c0_208 = arith.constant 0 : index
    %392 = vector.load %arg7[%c0_207, %c0_208] : memref<8x128xf32, #tpu.memory_space<vmem>>, vector<8x128xf32>
    tpu.vector_store %arg7[%c0_207, %c0_208], %391 {strides = array<i32>} : memref<8x128xf32, #tpu.memory_space<vmem>>, vector<8x128xf32>,
    %c4_i32 = arith.constant 4 : i32
    %c8_i32_209 = arith.constant 8 : i32
    %393 = arith.muli %arg0, %c8_i32_209 : i32
    %394 = arith.addi %393, %c4_i32 : i32
    %395 = arith.index_cast %c4_i32 : i32 to index
    %c0_210 = arith.constant 0 : index
    %c0_211 = arith.constant 0 : index
    %396 = vector.load %arg1[%395, %c0_210, %c0_211] : memref<8x8x16xf32, #tpu.memory_space<vmem>>, vector<1x8x16xf32>
    %397 = vector.shape_cast %396 : vector<1x8x16xf32> to vector<8x16xf32>
    %c0_212 = arith.constant 0 : index
    %c0_213 = arith.constant 0 : index
    %c0_214 = arith.constant 0 : index
    %398 = vector.load %arg8[%c0_212, %c0_213, %c0_214] : memref<2x8x64xf32, #tpu.memory_space<vmem>>, vector<1x8x64xf32>
    %399 = vector.shape_cast %398 : vector<1x8x64xf32> to vector<8x64xf32>
    %c0_215 = arith.constant 0 : index
    %c0_216 = arith.constant 0 : index
    %c0_217 = arith.constant 0 : index
    %400 = vector.load %arg3[%c0_215, %c0_216, %c0_217] : memref<2x64x192xbf16, #tpu.memory_space<vmem>>, vector<1x64x192xbf16>
    %401 = vector.shape_cast %400 : vector<1x64x192xbf16> to vector<64x192xbf16>
    %402 = vector.extract_strided_slice %401 {offsets = [0, 0], sizes = [16, 192], strides = [1, 1]} : vector<64x192xbf16> to vector<16x192xbf16>
    %c0_218 = arith.constant 0 : index
    %c0_219 = arith.constant 0 : index
    %c0_220 = arith.constant 0 : index
    %403 = vector.load %arg4[%c0_218, %c0_219, %c0_220] : memref<2x64x192xbf16, #tpu.memory_space<vmem>>, vector<1x64x192xbf16>
    %404 = vector.shape_cast %403 : vector<1x64x192xbf16> to vector<64x192xbf16>
    %c0_221 = arith.constant 0 : index
    %c0_222 = arith.constant 0 : index
    %c0_223 = arith.constant 0 : index
    %405 = vector.load %arg5[%c0_221, %c0_222, %c0_223] : memref<2x1x192xf32, #tpu.memory_space<vmem>>, vector<1x1x192xf32>
    %406 = vector.shape_cast %405 : vector<1x1x192xf32> to vector<1x192xf32>
    %c0_224 = arith.constant 0 : index
    %c0_225 = arith.constant 0 : index
    %c0_226 = arith.constant 0 : index
    %407 = vector.load %arg6[%c0_224, %c0_225, %c0_226] : memref<2x1x192xf32, #tpu.memory_space<vmem>>, vector<1x1x192xf32>
    %408 = vector.shape_cast %407 : vector<1x1x192xf32> to vector<1x192xf32>
    %409 = arith.truncf %397 : vector<8x16xf32> to vector<8x16xbf16>
    %cst_227 = arith.constant dense<0.000000e+00> : vector<8x192xf32>
    %410 = tpu.matmul %409, %402, %cst_227 {dimension_numbers = #tpu.dot_dimension_numbers<[1], [0], [0], [1], [0, 0, 1, 1], [], []>} : vector<8x16xbf16>, vector<16x192xbf16>, vector<8x192xf32> -> vector<8x192xf32>
    %411 = vector.broadcast %406 : vector<1x192xf32> to vector<8x192xf32>
    %412 = arith.addf %410, %411 : vector<8x192xf32>
    %413 = arith.truncf %399 : vector<8x64xf32> to vector<8x64xbf16>
    %cst_228 = arith.constant dense<0.000000e+00> : vector<8x192xf32>
    %414 = tpu.matmul %413, %404, %cst_228 {dimension_numbers = #tpu.dot_dimension_numbers<[1], [0], [0], [1], [0, 0, 1, 1], [], []>} : vector<8x64xbf16>, vector<64x192xbf16>, vector<8x192xf32> -> vector<8x192xf32>
    %415 = vector.broadcast %408 : vector<1x192xf32> to vector<8x192xf32>
    %416 = arith.addf %414, %415 : vector<8x192xf32>
    %417 = vector.extract_strided_slice %412 {offsets = [0, 0], sizes = [8, 128], strides = [1, 1]} : vector<8x192xf32> to vector<8x128xf32>
    %418 = vector.extract_strided_slice %416 {offsets = [0, 0], sizes = [8, 128], strides = [1, 1]} : vector<8x192xf32> to vector<8x128xf32>
    %419 = arith.addf %417, %418 : vector<8x128xf32>
    %420 = arith.negf %419 : vector<8x128xf32>
    %421 = math.exp %420 : vector<8x128xf32>
    %cst_229 = arith.constant 1.000000e+00 : f32
    %422 = vector.broadcast %cst_229 : f32 to vector<8x128xf32>
    %423 = arith.addf %422, %421 : vector<8x128xf32>
    %424 = arith.divf %422, %423 : vector<8x128xf32>
    %425 = vector.extract_strided_slice %424 {offsets = [0, 0], sizes = [8, 64], strides = [1, 1]} : vector<8x128xf32> to vector<8x64xf32>
    %426 = vector.extract_strided_slice %424 {offsets = [0, 64], sizes = [8, 64], strides = [1, 1]} : vector<8x128xf32> to vector<8x64xf32>
    %427 = vector.extract_strided_slice %412 {offsets = [0, 128], sizes = [8, 64], strides = [1, 1]} : vector<8x192xf32> to vector<8x64xf32>
    %428 = vector.extract_strided_slice %416 {offsets = [0, 128], sizes = [8, 64], strides = [1, 1]} : vector<8x192xf32> to vector<8x64xf32>
    %429 = arith.mulf %425, %428 : vector<8x64xf32>
    %430 = arith.addf %427, %429 : vector<8x64xf32>
    %431 = math.tanh %430 : vector<8x64xf32>
    %cst_230 = arith.constant 1.000000e+00 : f32
    %432 = vector.broadcast %cst_230 : f32 to vector<8x64xf32>
    %433 = arith.subf %432, %426 : vector<8x64xf32>
    %434 = arith.mulf %433, %431 : vector<8x64xf32>
    %435 = arith.mulf %426, %399 : vector<8x64xf32>
    %436 = arith.addf %434, %435 : vector<8x64xf32>
    %c0_231 = arith.constant 0 : index
    %c0_232 = arith.constant 0 : index
    %c0_233 = arith.constant 0 : index
    %437 = vector.load %arg8[%c0_231, %c0_232, %c0_233] : memref<2x8x64xf32, #tpu.memory_space<vmem>>, vector<1x8x64xf32>
    %438 = vector.shape_cast %437 : vector<1x8x64xf32> to vector<8x64xf32>
    %439 = vector.shape_cast %436 : vector<8x64xf32> to vector<1x8x64xf32>
    tpu.vector_store %arg8[%c0_231, %c0_232, %c0_233], %439 {strides = array<i32>} : memref<2x8x64xf32, #tpu.memory_space<vmem>>, vector<1x8x64xf32>,
    %c1_234 = arith.constant 1 : index
    %c0_235 = arith.constant 0 : index
    %c0_236 = arith.constant 0 : index
    %440 = vector.load %arg8[%c1_234, %c0_235, %c0_236] : memref<2x8x64xf32, #tpu.memory_space<vmem>>, vector<1x8x64xf32>
    %441 = vector.shape_cast %440 : vector<1x8x64xf32> to vector<8x64xf32>
    %c1_237 = arith.constant 1 : index
    %c0_238 = arith.constant 0 : index
    %c0_239 = arith.constant 0 : index
    %442 = vector.load %arg3[%c1_237, %c0_238, %c0_239] : memref<2x64x192xbf16, #tpu.memory_space<vmem>>, vector<1x64x192xbf16>
    %443 = vector.shape_cast %442 : vector<1x64x192xbf16> to vector<64x192xbf16>
    %c1_240 = arith.constant 1 : index
    %c0_241 = arith.constant 0 : index
    %c0_242 = arith.constant 0 : index
    %444 = vector.load %arg4[%c1_240, %c0_241, %c0_242] : memref<2x64x192xbf16, #tpu.memory_space<vmem>>, vector<1x64x192xbf16>
    %445 = vector.shape_cast %444 : vector<1x64x192xbf16> to vector<64x192xbf16>
    %c1_243 = arith.constant 1 : index
    %c0_244 = arith.constant 0 : index
    %c0_245 = arith.constant 0 : index
    %446 = vector.load %arg5[%c1_243, %c0_244, %c0_245] : memref<2x1x192xf32, #tpu.memory_space<vmem>>, vector<1x1x192xf32>
    %447 = vector.shape_cast %446 : vector<1x1x192xf32> to vector<1x192xf32>
    %c1_246 = arith.constant 1 : index
    %c0_247 = arith.constant 0 : index
    %c0_248 = arith.constant 0 : index
    %448 = vector.load %arg6[%c1_246, %c0_247, %c0_248] : memref<2x1x192xf32, #tpu.memory_space<vmem>>, vector<1x1x192xf32>
    %449 = vector.shape_cast %448 : vector<1x1x192xf32> to vector<1x192xf32>
    %450 = arith.truncf %436 : vector<8x64xf32> to vector<8x64xbf16>
    %cst_249 = arith.constant dense<0.000000e+00> : vector<8x192xf32>
    %451 = tpu.matmul %450, %443, %cst_249 {dimension_numbers = #tpu.dot_dimension_numbers<[1], [0], [0], [1], [0, 0, 1, 1], [], []>} : vector<8x64xbf16>, vector<64x192xbf16>, vector<8x192xf32> -> vector<8x192xf32>
    %452 = vector.broadcast %447 : vector<1x192xf32> to vector<8x192xf32>
    %453 = arith.addf %451, %452 : vector<8x192xf32>
    %454 = arith.truncf %441 : vector<8x64xf32> to vector<8x64xbf16>
    %cst_250 = arith.constant dense<0.000000e+00> : vector<8x192xf32>
    %455 = tpu.matmul %454, %445, %cst_250 {dimension_numbers = #tpu.dot_dimension_numbers<[1], [0], [0], [1], [0, 0, 1, 1], [], []>} : vector<8x64xbf16>, vector<64x192xbf16>, vector<8x192xf32> -> vector<8x192xf32>
    %456 = vector.broadcast %449 : vector<1x192xf32> to vector<8x192xf32>
    %457 = arith.addf %455, %456 : vector<8x192xf32>
    %458 = vector.extract_strided_slice %453 {offsets = [0, 0], sizes = [8, 128], strides = [1, 1]} : vector<8x192xf32> to vector<8x128xf32>
    %459 = vector.extract_strided_slice %457 {offsets = [0, 0], sizes = [8, 128], strides = [1, 1]} : vector<8x192xf32> to vector<8x128xf32>
    %460 = arith.addf %458, %459 : vector<8x128xf32>
    %461 = arith.negf %460 : vector<8x128xf32>
    %462 = math.exp %461 : vector<8x128xf32>
    %cst_251 = arith.constant 1.000000e+00 : f32
    %463 = vector.broadcast %cst_251 : f32 to vector<8x128xf32>
    %464 = arith.addf %463, %462 : vector<8x128xf32>
    %465 = arith.divf %463, %464 : vector<8x128xf32>
    %466 = vector.extract_strided_slice %465 {offsets = [0, 0], sizes = [8, 64], strides = [1, 1]} : vector<8x128xf32> to vector<8x64xf32>
    %467 = vector.extract_strided_slice %465 {offsets = [0, 64], sizes = [8, 64], strides = [1, 1]} : vector<8x128xf32> to vector<8x64xf32>
    %468 = vector.extract_strided_slice %453 {offsets = [0, 128], sizes = [8, 64], strides = [1, 1]} : vector<8x192xf32> to vector<8x64xf32>
    %469 = vector.extract_strided_slice %457 {offsets = [0, 128], sizes = [8, 64], strides = [1, 1]} : vector<8x192xf32> to vector<8x64xf32>
    %470 = arith.mulf %466, %469 : vector<8x64xf32>
    %471 = arith.addf %468, %470 : vector<8x64xf32>
    %472 = math.tanh %471 : vector<8x64xf32>
    %cst_252 = arith.constant 1.000000e+00 : f32
    %473 = vector.broadcast %cst_252 : f32 to vector<8x64xf32>
    %474 = arith.subf %473, %467 : vector<8x64xf32>
    %475 = arith.mulf %474, %472 : vector<8x64xf32>
    %476 = arith.mulf %467, %441 : vector<8x64xf32>
    %477 = arith.addf %475, %476 : vector<8x64xf32>
    %c1_253 = arith.constant 1 : index
    %c0_254 = arith.constant 0 : index
    %c0_255 = arith.constant 0 : index
    %478 = vector.load %arg8[%c1_253, %c0_254, %c0_255] : memref<2x8x64xf32, #tpu.memory_space<vmem>>, vector<1x8x64xf32>
    %479 = vector.shape_cast %478 : vector<1x8x64xf32> to vector<8x64xf32>
    %480 = vector.shape_cast %477 : vector<8x64xf32> to vector<1x8x64xf32>
    tpu.vector_store %arg8[%c1_253, %c0_254, %c0_255], %480 {strides = array<i32>} : memref<2x8x64xf32, #tpu.memory_space<vmem>>, vector<1x8x64xf32>,
    %481 = tpu.concatenate %477, %4 in 1 : vector<8x64xf32>, vector<8x64xf32> -> vector<8x128xf32>
    %c1_i32_256 = arith.constant 1 : i32
    %482 = arith.addi %394, %c1_i32_256 : i32
    %483 = vector.broadcast %482 : i32 to vector<8x1xi32>
    %484 = arith.cmpi eq, %3, %483 : vector<8x1xi32>
    %c0_257 = arith.constant 0 : index
    %c0_258 = arith.constant 0 : index
    %485 = vector.load %arg7[%c0_257, %c0_258] : memref<8x128xf32, #tpu.memory_space<vmem>>, vector<8x128xf32>
    %486 = vector.shape_cast %484 : vector<8x1xi1> to vector<8x1xi1>
    %487 = vector.broadcast %486 : vector<8x1xi1> to vector<8x128xi1>
    %488 = arith.select %487, %481, %485 : vector<8x128xi1>, vector<8x128xf32>
    %c0_259 = arith.constant 0 : index
    %c0_260 = arith.constant 0 : index
    %489 = vector.load %arg7[%c0_259, %c0_260] : memref<8x128xf32, #tpu.memory_space<vmem>>, vector<8x128xf32>
    tpu.vector_store %arg7[%c0_259, %c0_260], %488 {strides = array<i32>} : memref<8x128xf32, #tpu.memory_space<vmem>>, vector<8x128xf32>,
    %c5_i32 = arith.constant 5 : i32
    %c8_i32_261 = arith.constant 8 : i32
    %490 = arith.muli %arg0, %c8_i32_261 : i32
    %491 = arith.addi %490, %c5_i32 : i32
    %492 = arith.index_cast %c5_i32 : i32 to index
    %c0_262 = arith.constant 0 : index
    %c0_263 = arith.constant 0 : index
    %493 = vector.load %arg1[%492, %c0_262, %c0_263] : memref<8x8x16xf32, #tpu.memory_space<vmem>>, vector<1x8x16xf32>
    %494 = vector.shape_cast %493 : vector<1x8x16xf32> to vector<8x16xf32>
    %c0_264 = arith.constant 0 : index
    %c0_265 = arith.constant 0 : index
    %c0_266 = arith.constant 0 : index
    %495 = vector.load %arg8[%c0_264, %c0_265, %c0_266] : memref<2x8x64xf32, #tpu.memory_space<vmem>>, vector<1x8x64xf32>
    %496 = vector.shape_cast %495 : vector<1x8x64xf32> to vector<8x64xf32>
    %c0_267 = arith.constant 0 : index
    %c0_268 = arith.constant 0 : index
    %c0_269 = arith.constant 0 : index
    %497 = vector.load %arg3[%c0_267, %c0_268, %c0_269] : memref<2x64x192xbf16, #tpu.memory_space<vmem>>, vector<1x64x192xbf16>
    %498 = vector.shape_cast %497 : vector<1x64x192xbf16> to vector<64x192xbf16>
    %499 = vector.extract_strided_slice %498 {offsets = [0, 0], sizes = [16, 192], strides = [1, 1]} : vector<64x192xbf16> to vector<16x192xbf16>
    %c0_270 = arith.constant 0 : index
    %c0_271 = arith.constant 0 : index
    %c0_272 = arith.constant 0 : index
    %500 = vector.load %arg4[%c0_270, %c0_271, %c0_272] : memref<2x64x192xbf16, #tpu.memory_space<vmem>>, vector<1x64x192xbf16>
    %501 = vector.shape_cast %500 : vector<1x64x192xbf16> to vector<64x192xbf16>
    %c0_273 = arith.constant 0 : index
    %c0_274 = arith.constant 0 : index
    %c0_275 = arith.constant 0 : index
    %502 = vector.load %arg5[%c0_273, %c0_274, %c0_275] : memref<2x1x192xf32, #tpu.memory_space<vmem>>, vector<1x1x192xf32>
    %503 = vector.shape_cast %502 : vector<1x1x192xf32> to vector<1x192xf32>
    %c0_276 = arith.constant 0 : index
    %c0_277 = arith.constant 0 : index
    %c0_278 = arith.constant 0 : index
    %504 = vector.load %arg6[%c0_276, %c0_277, %c0_278] : memref<2x1x192xf32, #tpu.memory_space<vmem>>, vector<1x1x192xf32>
    %505 = vector.shape_cast %504 : vector<1x1x192xf32> to vector<1x192xf32>
    %506 = arith.truncf %494 : vector<8x16xf32> to vector<8x16xbf16>
    %cst_279 = arith.constant dense<0.000000e+00> : vector<8x192xf32>
    %507 = tpu.matmul %506, %499, %cst_279 {dimension_numbers = #tpu.dot_dimension_numbers<[1], [0], [0], [1], [0, 0, 1, 1], [], []>} : vector<8x16xbf16>, vector<16x192xbf16>, vector<8x192xf32> -> vector<8x192xf32>
    %508 = vector.broadcast %503 : vector<1x192xf32> to vector<8x192xf32>
    %509 = arith.addf %507, %508 : vector<8x192xf32>
    %510 = arith.truncf %496 : vector<8x64xf32> to vector<8x64xbf16>
    %cst_280 = arith.constant dense<0.000000e+00> : vector<8x192xf32>
    %511 = tpu.matmul %510, %501, %cst_280 {dimension_numbers = #tpu.dot_dimension_numbers<[1], [0], [0], [1], [0, 0, 1, 1], [], []>} : vector<8x64xbf16>, vector<64x192xbf16>, vector<8x192xf32> -> vector<8x192xf32>
    %512 = vector.broadcast %505 : vector<1x192xf32> to vector<8x192xf32>
    %513 = arith.addf %511, %512 : vector<8x192xf32>
    %514 = vector.extract_strided_slice %509 {offsets = [0, 0], sizes = [8, 128], strides = [1, 1]} : vector<8x192xf32> to vector<8x128xf32>
    %515 = vector.extract_strided_slice %513 {offsets = [0, 0], sizes = [8, 128], strides = [1, 1]} : vector<8x192xf32> to vector<8x128xf32>
    %516 = arith.addf %514, %515 : vector<8x128xf32>
    %517 = arith.negf %516 : vector<8x128xf32>
    %518 = math.exp %517 : vector<8x128xf32>
    %cst_281 = arith.constant 1.000000e+00 : f32
    %519 = vector.broadcast %cst_281 : f32 to vector<8x128xf32>
    %520 = arith.addf %519, %518 : vector<8x128xf32>
    %521 = arith.divf %519, %520 : vector<8x128xf32>
    %522 = vector.extract_strided_slice %521 {offsets = [0, 0], sizes = [8, 64], strides = [1, 1]} : vector<8x128xf32> to vector<8x64xf32>
    %523 = vector.extract_strided_slice %521 {offsets = [0, 64], sizes = [8, 64], strides = [1, 1]} : vector<8x128xf32> to vector<8x64xf32>
    %524 = vector.extract_strided_slice %509 {offsets = [0, 128], sizes = [8, 64], strides = [1, 1]} : vector<8x192xf32> to vector<8x64xf32>
    %525 = vector.extract_strided_slice %513 {offsets = [0, 128], sizes = [8, 64], strides = [1, 1]} : vector<8x192xf32> to vector<8x64xf32>
    %526 = arith.mulf %522, %525 : vector<8x64xf32>
    %527 = arith.addf %524, %526 : vector<8x64xf32>
    %528 = math.tanh %527 : vector<8x64xf32>
    %cst_282 = arith.constant 1.000000e+00 : f32
    %529 = vector.broadcast %cst_282 : f32 to vector<8x64xf32>
    %530 = arith.subf %529, %523 : vector<8x64xf32>
    %531 = arith.mulf %530, %528 : vector<8x64xf32>
    %532 = arith.mulf %523, %496 : vector<8x64xf32>
    %533 = arith.addf %531, %532 : vector<8x64xf32>
    %c0_283 = arith.constant 0 : index
    %c0_284 = arith.constant 0 : index
    %c0_285 = arith.constant 0 : index
    %534 = vector.load %arg8[%c0_283, %c0_284, %c0_285] : memref<2x8x64xf32, #tpu.memory_space<vmem>>, vector<1x8x64xf32>
    %535 = vector.shape_cast %534 : vector<1x8x64xf32> to vector<8x64xf32>
    %536 = vector.shape_cast %533 : vector<8x64xf32> to vector<1x8x64xf32>
    tpu.vector_store %arg8[%c0_283, %c0_284, %c0_285], %536 {strides = array<i32>} : memref<2x8x64xf32, #tpu.memory_space<vmem>>, vector<1x8x64xf32>,
    %c1_286 = arith.constant 1 : index
    %c0_287 = arith.constant 0 : index
    %c0_288 = arith.constant 0 : index
    %537 = vector.load %arg8[%c1_286, %c0_287, %c0_288] : memref<2x8x64xf32, #tpu.memory_space<vmem>>, vector<1x8x64xf32>
    %538 = vector.shape_cast %537 : vector<1x8x64xf32> to vector<8x64xf32>
    %c1_289 = arith.constant 1 : index
    %c0_290 = arith.constant 0 : index
    %c0_291 = arith.constant 0 : index
    %539 = vector.load %arg3[%c1_289, %c0_290, %c0_291] : memref<2x64x192xbf16, #tpu.memory_space<vmem>>, vector<1x64x192xbf16>
    %540 = vector.shape_cast %539 : vector<1x64x192xbf16> to vector<64x192xbf16>
    %c1_292 = arith.constant 1 : index
    %c0_293 = arith.constant 0 : index
    %c0_294 = arith.constant 0 : index
    %541 = vector.load %arg4[%c1_292, %c0_293, %c0_294] : memref<2x64x192xbf16, #tpu.memory_space<vmem>>, vector<1x64x192xbf16>
    %542 = vector.shape_cast %541 : vector<1x64x192xbf16> to vector<64x192xbf16>
    %c1_295 = arith.constant 1 : index
    %c0_296 = arith.constant 0 : index
    %c0_297 = arith.constant 0 : index
    %543 = vector.load %arg5[%c1_295, %c0_296, %c0_297] : memref<2x1x192xf32, #tpu.memory_space<vmem>>, vector<1x1x192xf32>
    %544 = vector.shape_cast %543 : vector<1x1x192xf32> to vector<1x192xf32>
    %c1_298 = arith.constant 1 : index
    %c0_299 = arith.constant 0 : index
    %c0_300 = arith.constant 0 : index
    %545 = vector.load %arg6[%c1_298, %c0_299, %c0_300] : memref<2x1x192xf32, #tpu.memory_space<vmem>>, vector<1x1x192xf32>
    %546 = vector.shape_cast %545 : vector<1x1x192xf32> to vector<1x192xf32>
    %547 = arith.truncf %533 : vector<8x64xf32> to vector<8x64xbf16>
    %cst_301 = arith.constant dense<0.000000e+00> : vector<8x192xf32>
    %548 = tpu.matmul %547, %540, %cst_301 {dimension_numbers = #tpu.dot_dimension_numbers<[1], [0], [0], [1], [0, 0, 1, 1], [], []>} : vector<8x64xbf16>, vector<64x192xbf16>, vector<8x192xf32> -> vector<8x192xf32>
    %549 = vector.broadcast %544 : vector<1x192xf32> to vector<8x192xf32>
    %550 = arith.addf %548, %549 : vector<8x192xf32>
    %551 = arith.truncf %538 : vector<8x64xf32> to vector<8x64xbf16>
    %cst_302 = arith.constant dense<0.000000e+00> : vector<8x192xf32>
    %552 = tpu.matmul %551, %542, %cst_302 {dimension_numbers = #tpu.dot_dimension_numbers<[1], [0], [0], [1], [0, 0, 1, 1], [], []>} : vector<8x64xbf16>, vector<64x192xbf16>, vector<8x192xf32> -> vector<8x192xf32>
    %553 = vector.broadcast %546 : vector<1x192xf32> to vector<8x192xf32>
    %554 = arith.addf %552, %553 : vector<8x192xf32>
    %555 = vector.extract_strided_slice %550 {offsets = [0, 0], sizes = [8, 128], strides = [1, 1]} : vector<8x192xf32> to vector<8x128xf32>
    %556 = vector.extract_strided_slice %554 {offsets = [0, 0], sizes = [8, 128], strides = [1, 1]} : vector<8x192xf32> to vector<8x128xf32>
    %557 = arith.addf %555, %556 : vector<8x128xf32>
    %558 = arith.negf %557 : vector<8x128xf32>
    %559 = math.exp %558 : vector<8x128xf32>
    %cst_303 = arith.constant 1.000000e+00 : f32
    %560 = vector.broadcast %cst_303 : f32 to vector<8x128xf32>
    %561 = arith.addf %560, %559 : vector<8x128xf32>
    %562 = arith.divf %560, %561 : vector<8x128xf32>
    %563 = vector.extract_strided_slice %562 {offsets = [0, 0], sizes = [8, 64], strides = [1, 1]} : vector<8x128xf32> to vector<8x64xf32>
    %564 = vector.extract_strided_slice %562 {offsets = [0, 64], sizes = [8, 64], strides = [1, 1]} : vector<8x128xf32> to vector<8x64xf32>
    %565 = vector.extract_strided_slice %550 {offsets = [0, 128], sizes = [8, 64], strides = [1, 1]} : vector<8x192xf32> to vector<8x64xf32>
    %566 = vector.extract_strided_slice %554 {offsets = [0, 128], sizes = [8, 64], strides = [1, 1]} : vector<8x192xf32> to vector<8x64xf32>
    %567 = arith.mulf %563, %566 : vector<8x64xf32>
    %568 = arith.addf %565, %567 : vector<8x64xf32>
    %569 = math.tanh %568 : vector<8x64xf32>
    %cst_304 = arith.constant 1.000000e+00 : f32
    %570 = vector.broadcast %cst_304 : f32 to vector<8x64xf32>
    %571 = arith.subf %570, %564 : vector<8x64xf32>
    %572 = arith.mulf %571, %569 : vector<8x64xf32>
    %573 = arith.mulf %564, %538 : vector<8x64xf32>
    %574 = arith.addf %572, %573 : vector<8x64xf32>
    %c1_305 = arith.constant 1 : index
    %c0_306 = arith.constant 0 : index
    %c0_307 = arith.constant 0 : index
    %575 = vector.load %arg8[%c1_305, %c0_306, %c0_307] : memref<2x8x64xf32, #tpu.memory_space<vmem>>, vector<1x8x64xf32>
    %576 = vector.shape_cast %575 : vector<1x8x64xf32> to vector<8x64xf32>
    %577 = vector.shape_cast %574 : vector<8x64xf32> to vector<1x8x64xf32>
    tpu.vector_store %arg8[%c1_305, %c0_306, %c0_307], %577 {strides = array<i32>} : memref<2x8x64xf32, #tpu.memory_space<vmem>>, vector<1x8x64xf32>,
    %578 = tpu.concatenate %574, %4 in 1 : vector<8x64xf32>, vector<8x64xf32> -> vector<8x128xf32>
    %c1_i32_308 = arith.constant 1 : i32
    %579 = arith.addi %491, %c1_i32_308 : i32
    %580 = vector.broadcast %579 : i32 to vector<8x1xi32>
    %581 = arith.cmpi eq, %3, %580 : vector<8x1xi32>
    %c0_309 = arith.constant 0 : index
    %c0_310 = arith.constant 0 : index
    %582 = vector.load %arg7[%c0_309, %c0_310] : memref<8x128xf32, #tpu.memory_space<vmem>>, vector<8x128xf32>
    %583 = vector.shape_cast %581 : vector<8x1xi1> to vector<8x1xi1>
    %584 = vector.broadcast %583 : vector<8x1xi1> to vector<8x128xi1>
    %585 = arith.select %584, %578, %582 : vector<8x128xi1>, vector<8x128xf32>
    %c0_311 = arith.constant 0 : index
    %c0_312 = arith.constant 0 : index
    %586 = vector.load %arg7[%c0_311, %c0_312] : memref<8x128xf32, #tpu.memory_space<vmem>>, vector<8x128xf32>
    tpu.vector_store %arg7[%c0_311, %c0_312], %585 {strides = array<i32>} : memref<8x128xf32, #tpu.memory_space<vmem>>, vector<8x128xf32>,
    %c6_i32 = arith.constant 6 : i32
    %c8_i32_313 = arith.constant 8 : i32
    %587 = arith.muli %arg0, %c8_i32_313 : i32
    %588 = arith.addi %587, %c6_i32 : i32
    %589 = arith.index_cast %c6_i32 : i32 to index
    %c0_314 = arith.constant 0 : index
    %c0_315 = arith.constant 0 : index
    %590 = vector.load %arg1[%589, %c0_314, %c0_315] : memref<8x8x16xf32, #tpu.memory_space<vmem>>, vector<1x8x16xf32>
    %591 = vector.shape_cast %590 : vector<1x8x16xf32> to vector<8x16xf32>
    %c0_316 = arith.constant 0 : index
    %c0_317 = arith.constant 0 : index
    %c0_318 = arith.constant 0 : index
    %592 = vector.load %arg8[%c0_316, %c0_317, %c0_318] : memref<2x8x64xf32, #tpu.memory_space<vmem>>, vector<1x8x64xf32>
    %593 = vector.shape_cast %592 : vector<1x8x64xf32> to vector<8x64xf32>
    %c0_319 = arith.constant 0 : index
    %c0_320 = arith.constant 0 : index
    %c0_321 = arith.constant 0 : index
    %594 = vector.load %arg3[%c0_319, %c0_320, %c0_321] : memref<2x64x192xbf16, #tpu.memory_space<vmem>>, vector<1x64x192xbf16>
    %595 = vector.shape_cast %594 : vector<1x64x192xbf16> to vector<64x192xbf16>
    %596 = vector.extract_strided_slice %595 {offsets = [0, 0], sizes = [16, 192], strides = [1, 1]} : vector<64x192xbf16> to vector<16x192xbf16>
    %c0_322 = arith.constant 0 : index
    %c0_323 = arith.constant 0 : index
    %c0_324 = arith.constant 0 : index
    %597 = vector.load %arg4[%c0_322, %c0_323, %c0_324] : memref<2x64x192xbf16, #tpu.memory_space<vmem>>, vector<1x64x192xbf16>
    %598 = vector.shape_cast %597 : vector<1x64x192xbf16> to vector<64x192xbf16>
    %c0_325 = arith.constant 0 : index
    %c0_326 = arith.constant 0 : index
    %c0_327 = arith.constant 0 : index
    %599 = vector.load %arg5[%c0_325, %c0_326, %c0_327] : memref<2x1x192xf32, #tpu.memory_space<vmem>>, vector<1x1x192xf32>
    %600 = vector.shape_cast %599 : vector<1x1x192xf32> to vector<1x192xf32>
    %c0_328 = arith.constant 0 : index
    %c0_329 = arith.constant 0 : index
    %c0_330 = arith.constant 0 : index
    %601 = vector.load %arg6[%c0_328, %c0_329, %c0_330] : memref<2x1x192xf32, #tpu.memory_space<vmem>>, vector<1x1x192xf32>
    %602 = vector.shape_cast %601 : vector<1x1x192xf32> to vector<1x192xf32>
    %603 = arith.truncf %591 : vector<8x16xf32> to vector<8x16xbf16>
    %cst_331 = arith.constant dense<0.000000e+00> : vector<8x192xf32>
    %604 = tpu.matmul %603, %596, %cst_331 {dimension_numbers = #tpu.dot_dimension_numbers<[1], [0], [0], [1], [0, 0, 1, 1], [], []>} : vector<8x16xbf16>, vector<16x192xbf16>, vector<8x192xf32> -> vector<8x192xf32>
    %605 = vector.broadcast %600 : vector<1x192xf32> to vector<8x192xf32>
    %606 = arith.addf %604, %605 : vector<8x192xf32>
    %607 = arith.truncf %593 : vector<8x64xf32> to vector<8x64xbf16>
    %cst_332 = arith.constant dense<0.000000e+00> : vector<8x192xf32>
    %608 = tpu.matmul %607, %598, %cst_332 {dimension_numbers = #tpu.dot_dimension_numbers<[1], [0], [0], [1], [0, 0, 1, 1], [], []>} : vector<8x64xbf16>, vector<64x192xbf16>, vector<8x192xf32> -> vector<8x192xf32>
    %609 = vector.broadcast %602 : vector<1x192xf32> to vector<8x192xf32>
    %610 = arith.addf %608, %609 : vector<8x192xf32>
    %611 = vector.extract_strided_slice %606 {offsets = [0, 0], sizes = [8, 128], strides = [1, 1]} : vector<8x192xf32> to vector<8x128xf32>
    %612 = vector.extract_strided_slice %610 {offsets = [0, 0], sizes = [8, 128], strides = [1, 1]} : vector<8x192xf32> to vector<8x128xf32>
    %613 = arith.addf %611, %612 : vector<8x128xf32>
    %614 = arith.negf %613 : vector<8x128xf32>
    %615 = math.exp %614 : vector<8x128xf32>
    %cst_333 = arith.constant 1.000000e+00 : f32
    %616 = vector.broadcast %cst_333 : f32 to vector<8x128xf32>
    %617 = arith.addf %616, %615 : vector<8x128xf32>
    %618 = arith.divf %616, %617 : vector<8x128xf32>
    %619 = vector.extract_strided_slice %618 {offsets = [0, 0], sizes = [8, 64], strides = [1, 1]} : vector<8x128xf32> to vector<8x64xf32>
    %620 = vector.extract_strided_slice %618 {offsets = [0, 64], sizes = [8, 64], strides = [1, 1]} : vector<8x128xf32> to vector<8x64xf32>
    %621 = vector.extract_strided_slice %606 {offsets = [0, 128], sizes = [8, 64], strides = [1, 1]} : vector<8x192xf32> to vector<8x64xf32>
    %622 = vector.extract_strided_slice %610 {offsets = [0, 128], sizes = [8, 64], strides = [1, 1]} : vector<8x192xf32> to vector<8x64xf32>
    %623 = arith.mulf %619, %622 : vector<8x64xf32>
    %624 = arith.addf %621, %623 : vector<8x64xf32>
    %625 = math.tanh %624 : vector<8x64xf32>
    %cst_334 = arith.constant 1.000000e+00 : f32
    %626 = vector.broadcast %cst_334 : f32 to vector<8x64xf32>
    %627 = arith.subf %626, %620 : vector<8x64xf32>
    %628 = arith.mulf %627, %625 : vector<8x64xf32>
    %629 = arith.mulf %620, %593 : vector<8x64xf32>
    %630 = arith.addf %628, %629 : vector<8x64xf32>
    %c0_335 = arith.constant 0 : index
    %c0_336 = arith.constant 0 : index
    %c0_337 = arith.constant 0 : index
    %631 = vector.load %arg8[%c0_335, %c0_336, %c0_337] : memref<2x8x64xf32, #tpu.memory_space<vmem>>, vector<1x8x64xf32>
    %632 = vector.shape_cast %631 : vector<1x8x64xf32> to vector<8x64xf32>
    %633 = vector.shape_cast %630 : vector<8x64xf32> to vector<1x8x64xf32>
    tpu.vector_store %arg8[%c0_335, %c0_336, %c0_337], %633 {strides = array<i32>} : memref<2x8x64xf32, #tpu.memory_space<vmem>>, vector<1x8x64xf32>,
    %c1_338 = arith.constant 1 : index
    %c0_339 = arith.constant 0 : index
    %c0_340 = arith.constant 0 : index
    %634 = vector.load %arg8[%c1_338, %c0_339, %c0_340] : memref<2x8x64xf32, #tpu.memory_space<vmem>>, vector<1x8x64xf32>
    %635 = vector.shape_cast %634 : vector<1x8x64xf32> to vector<8x64xf32>
    %c1_341 = arith.constant 1 : index
    %c0_342 = arith.constant 0 : index
    %c0_343 = arith.constant 0 : index
    %636 = vector.load %arg3[%c1_341, %c0_342, %c0_343] : memref<2x64x192xbf16, #tpu.memory_space<vmem>>, vector<1x64x192xbf16>
    %637 = vector.shape_cast %636 : vector<1x64x192xbf16> to vector<64x192xbf16>
    %c1_344 = arith.constant 1 : index
    %c0_345 = arith.constant 0 : index
    %c0_346 = arith.constant 0 : index
    %638 = vector.load %arg4[%c1_344, %c0_345, %c0_346] : memref<2x64x192xbf16, #tpu.memory_space<vmem>>, vector<1x64x192xbf16>
    %639 = vector.shape_cast %638 : vector<1x64x192xbf16> to vector<64x192xbf16>
    %c1_347 = arith.constant 1 : index
    %c0_348 = arith.constant 0 : index
    %c0_349 = arith.constant 0 : index
    %640 = vector.load %arg5[%c1_347, %c0_348, %c0_349] : memref<2x1x192xf32, #tpu.memory_space<vmem>>, vector<1x1x192xf32>
    %641 = vector.shape_cast %640 : vector<1x1x192xf32> to vector<1x192xf32>
    %c1_350 = arith.constant 1 : index
    %c0_351 = arith.constant 0 : index
    %c0_352 = arith.constant 0 : index
    %642 = vector.load %arg6[%c1_350, %c0_351, %c0_352] : memref<2x1x192xf32, #tpu.memory_space<vmem>>, vector<1x1x192xf32>
    %643 = vector.shape_cast %642 : vector<1x1x192xf32> to vector<1x192xf32>
    %644 = arith.truncf %630 : vector<8x64xf32> to vector<8x64xbf16>
    %cst_353 = arith.constant dense<0.000000e+00> : vector<8x192xf32>
    %645 = tpu.matmul %644, %637, %cst_353 {dimension_numbers = #tpu.dot_dimension_numbers<[1], [0], [0], [1], [0, 0, 1, 1], [], []>} : vector<8x64xbf16>, vector<64x192xbf16>, vector<8x192xf32> -> vector<8x192xf32>
    %646 = vector.broadcast %641 : vector<1x192xf32> to vector<8x192xf32>
    %647 = arith.addf %645, %646 : vector<8x192xf32>
    %648 = arith.truncf %635 : vector<8x64xf32> to vector<8x64xbf16>
    %cst_354 = arith.constant dense<0.000000e+00> : vector<8x192xf32>
    %649 = tpu.matmul %648, %639, %cst_354 {dimension_numbers = #tpu.dot_dimension_numbers<[1], [0], [0], [1], [0, 0, 1, 1], [], []>} : vector<8x64xbf16>, vector<64x192xbf16>, vector<8x192xf32> -> vector<8x192xf32>
    %650 = vector.broadcast %643 : vector<1x192xf32> to vector<8x192xf32>
    %651 = arith.addf %649, %650 : vector<8x192xf32>
    %652 = vector.extract_strided_slice %647 {offsets = [0, 0], sizes = [8, 128], strides = [1, 1]} : vector<8x192xf32> to vector<8x128xf32>
    %653 = vector.extract_strided_slice %651 {offsets = [0, 0], sizes = [8, 128], strides = [1, 1]} : vector<8x192xf32> to vector<8x128xf32>
    %654 = arith.addf %652, %653 : vector<8x128xf32>
    %655 = arith.negf %654 : vector<8x128xf32>
    %656 = math.exp %655 : vector<8x128xf32>
    %cst_355 = arith.constant 1.000000e+00 : f32
    %657 = vector.broadcast %cst_355 : f32 to vector<8x128xf32>
    %658 = arith.addf %657, %656 : vector<8x128xf32>
    %659 = arith.divf %657, %658 : vector<8x128xf32>
    %660 = vector.extract_strided_slice %659 {offsets = [0, 0], sizes = [8, 64], strides = [1, 1]} : vector<8x128xf32> to vector<8x64xf32>
    %661 = vector.extract_strided_slice %659 {offsets = [0, 64], sizes = [8, 64], strides = [1, 1]} : vector<8x128xf32> to vector<8x64xf32>
    %662 = vector.extract_strided_slice %647 {offsets = [0, 128], sizes = [8, 64], strides = [1, 1]} : vector<8x192xf32> to vector<8x64xf32>
    %663 = vector.extract_strided_slice %651 {offsets = [0, 128], sizes = [8, 64], strides = [1, 1]} : vector<8x192xf32> to vector<8x64xf32>
    %664 = arith.mulf %660, %663 : vector<8x64xf32>
    %665 = arith.addf %662, %664 : vector<8x64xf32>
    %666 = math.tanh %665 : vector<8x64xf32>
    %cst_356 = arith.constant 1.000000e+00 : f32
    %667 = vector.broadcast %cst_356 : f32 to vector<8x64xf32>
    %668 = arith.subf %667, %661 : vector<8x64xf32>
    %669 = arith.mulf %668, %666 : vector<8x64xf32>
    %670 = arith.mulf %661, %635 : vector<8x64xf32>
    %671 = arith.addf %669, %670 : vector<8x64xf32>
    %c1_357 = arith.constant 1 : index
    %c0_358 = arith.constant 0 : index
    %c0_359 = arith.constant 0 : index
    %672 = vector.load %arg8[%c1_357, %c0_358, %c0_359] : memref<2x8x64xf32, #tpu.memory_space<vmem>>, vector<1x8x64xf32>
    %673 = vector.shape_cast %672 : vector<1x8x64xf32> to vector<8x64xf32>
    %674 = vector.shape_cast %671 : vector<8x64xf32> to vector<1x8x64xf32>
    tpu.vector_store %arg8[%c1_357, %c0_358, %c0_359], %674 {strides = array<i32>} : memref<2x8x64xf32, #tpu.memory_space<vmem>>, vector<1x8x64xf32>,
    %675 = tpu.concatenate %671, %4 in 1 : vector<8x64xf32>, vector<8x64xf32> -> vector<8x128xf32>
    %c1_i32_360 = arith.constant 1 : i32
    %676 = arith.addi %588, %c1_i32_360 : i32
    %677 = vector.broadcast %676 : i32 to vector<8x1xi32>
    %678 = arith.cmpi eq, %3, %677 : vector<8x1xi32>
    %c0_361 = arith.constant 0 : index
    %c0_362 = arith.constant 0 : index
    %679 = vector.load %arg7[%c0_361, %c0_362] : memref<8x128xf32, #tpu.memory_space<vmem>>, vector<8x128xf32>
    %680 = vector.shape_cast %678 : vector<8x1xi1> to vector<8x1xi1>
    %681 = vector.broadcast %680 : vector<8x1xi1> to vector<8x128xi1>
    %682 = arith.select %681, %675, %679 : vector<8x128xi1>, vector<8x128xf32>
    %c0_363 = arith.constant 0 : index
    %c0_364 = arith.constant 0 : index
    %683 = vector.load %arg7[%c0_363, %c0_364] : memref<8x128xf32, #tpu.memory_space<vmem>>, vector<8x128xf32>
    tpu.vector_store %arg7[%c0_363, %c0_364], %682 {strides = array<i32>} : memref<8x128xf32, #tpu.memory_space<vmem>>, vector<8x128xf32>,
    %c7_i32 = arith.constant 7 : i32
    %c8_i32_365 = arith.constant 8 : i32
    %684 = arith.muli %arg0, %c8_i32_365 : i32
    %685 = arith.addi %684, %c7_i32 : i32
    %686 = arith.index_cast %c7_i32 : i32 to index
    %c0_366 = arith.constant 0 : index
    %c0_367 = arith.constant 0 : index
    %687 = vector.load %arg1[%686, %c0_366, %c0_367] : memref<8x8x16xf32, #tpu.memory_space<vmem>>, vector<1x8x16xf32>
    %688 = vector.shape_cast %687 : vector<1x8x16xf32> to vector<8x16xf32>
    %c0_368 = arith.constant 0 : index
    %c0_369 = arith.constant 0 : index
    %c0_370 = arith.constant 0 : index
    %689 = vector.load %arg8[%c0_368, %c0_369, %c0_370] : memref<2x8x64xf32, #tpu.memory_space<vmem>>, vector<1x8x64xf32>
    %690 = vector.shape_cast %689 : vector<1x8x64xf32> to vector<8x64xf32>
    %c0_371 = arith.constant 0 : index
    %c0_372 = arith.constant 0 : index
    %c0_373 = arith.constant 0 : index
    %691 = vector.load %arg3[%c0_371, %c0_372, %c0_373] : memref<2x64x192xbf16, #tpu.memory_space<vmem>>, vector<1x64x192xbf16>
    %692 = vector.shape_cast %691 : vector<1x64x192xbf16> to vector<64x192xbf16>
    %693 = vector.extract_strided_slice %692 {offsets = [0, 0], sizes = [16, 192], strides = [1, 1]} : vector<64x192xbf16> to vector<16x192xbf16>
    %c0_374 = arith.constant 0 : index
    %c0_375 = arith.constant 0 : index
    %c0_376 = arith.constant 0 : index
    %694 = vector.load %arg4[%c0_374, %c0_375, %c0_376] : memref<2x64x192xbf16, #tpu.memory_space<vmem>>, vector<1x64x192xbf16>
    %695 = vector.shape_cast %694 : vector<1x64x192xbf16> to vector<64x192xbf16>
    %c0_377 = arith.constant 0 : index
    %c0_378 = arith.constant 0 : index
    %c0_379 = arith.constant 0 : index
    %696 = vector.load %arg5[%c0_377, %c0_378, %c0_379] : memref<2x1x192xf32, #tpu.memory_space<vmem>>, vector<1x1x192xf32>
    %697 = vector.shape_cast %696 : vector<1x1x192xf32> to vector<1x192xf32>
    %c0_380 = arith.constant 0 : index
    %c0_381 = arith.constant 0 : index
    %c0_382 = arith.constant 0 : index
    %698 = vector.load %arg6[%c0_380, %c0_381, %c0_382] : memref<2x1x192xf32, #tpu.memory_space<vmem>>, vector<1x1x192xf32>
    %699 = vector.shape_cast %698 : vector<1x1x192xf32> to vector<1x192xf32>
    %700 = arith.truncf %688 : vector<8x16xf32> to vector<8x16xbf16>
    %cst_383 = arith.constant dense<0.000000e+00> : vector<8x192xf32>
    %701 = tpu.matmul %700, %693, %cst_383 {dimension_numbers = #tpu.dot_dimension_numbers<[1], [0], [0], [1], [0, 0, 1, 1], [], []>} : vector<8x16xbf16>, vector<16x192xbf16>, vector<8x192xf32> -> vector<8x192xf32>
    %702 = vector.broadcast %697 : vector<1x192xf32> to vector<8x192xf32>
    %703 = arith.addf %701, %702 : vector<8x192xf32>
    %704 = arith.truncf %690 : vector<8x64xf32> to vector<8x64xbf16>
    %cst_384 = arith.constant dense<0.000000e+00> : vector<8x192xf32>
    %705 = tpu.matmul %704, %695, %cst_384 {dimension_numbers = #tpu.dot_dimension_numbers<[1], [0], [0], [1], [0, 0, 1, 1], [], []>} : vector<8x64xbf16>, vector<64x192xbf16>, vector<8x192xf32> -> vector<8x192xf32>
    %706 = vector.broadcast %699 : vector<1x192xf32> to vector<8x192xf32>
    %707 = arith.addf %705, %706 : vector<8x192xf32>
    %708 = vector.extract_strided_slice %703 {offsets = [0, 0], sizes = [8, 128], strides = [1, 1]} : vector<8x192xf32> to vector<8x128xf32>
    %709 = vector.extract_strided_slice %707 {offsets = [0, 0], sizes = [8, 128], strides = [1, 1]} : vector<8x192xf32> to vector<8x128xf32>
    %710 = arith.addf %708, %709 : vector<8x128xf32>
    %711 = arith.negf %710 : vector<8x128xf32>
    %712 = math.exp %711 : vector<8x128xf32>
    %cst_385 = arith.constant 1.000000e+00 : f32
    %713 = vector.broadcast %cst_385 : f32 to vector<8x128xf32>
    %714 = arith.addf %713, %712 : vector<8x128xf32>
    %715 = arith.divf %713, %714 : vector<8x128xf32>
    %716 = vector.extract_strided_slice %715 {offsets = [0, 0], sizes = [8, 64], strides = [1, 1]} : vector<8x128xf32> to vector<8x64xf32>
    %717 = vector.extract_strided_slice %715 {offsets = [0, 64], sizes = [8, 64], strides = [1, 1]} : vector<8x128xf32> to vector<8x64xf32>
    %718 = vector.extract_strided_slice %703 {offsets = [0, 128], sizes = [8, 64], strides = [1, 1]} : vector<8x192xf32> to vector<8x64xf32>
    %719 = vector.extract_strided_slice %707 {offsets = [0, 128], sizes = [8, 64], strides = [1, 1]} : vector<8x192xf32> to vector<8x64xf32>
    %720 = arith.mulf %716, %719 : vector<8x64xf32>
    %721 = arith.addf %718, %720 : vector<8x64xf32>
    %722 = math.tanh %721 : vector<8x64xf32>
    %cst_386 = arith.constant 1.000000e+00 : f32
    %723 = vector.broadcast %cst_386 : f32 to vector<8x64xf32>
    %724 = arith.subf %723, %717 : vector<8x64xf32>
    %725 = arith.mulf %724, %722 : vector<8x64xf32>
    %726 = arith.mulf %717, %690 : vector<8x64xf32>
    %727 = arith.addf %725, %726 : vector<8x64xf32>
    %c0_387 = arith.constant 0 : index
    %c0_388 = arith.constant 0 : index
    %c0_389 = arith.constant 0 : index
    %728 = vector.load %arg8[%c0_387, %c0_388, %c0_389] : memref<2x8x64xf32, #tpu.memory_space<vmem>>, vector<1x8x64xf32>
    %729 = vector.shape_cast %728 : vector<1x8x64xf32> to vector<8x64xf32>
    %730 = vector.shape_cast %727 : vector<8x64xf32> to vector<1x8x64xf32>
    tpu.vector_store %arg8[%c0_387, %c0_388, %c0_389], %730 {strides = array<i32>} : memref<2x8x64xf32, #tpu.memory_space<vmem>>, vector<1x8x64xf32>,
    %c1_390 = arith.constant 1 : index
    %c0_391 = arith.constant 0 : index
    %c0_392 = arith.constant 0 : index
    %731 = vector.load %arg8[%c1_390, %c0_391, %c0_392] : memref<2x8x64xf32, #tpu.memory_space<vmem>>, vector<1x8x64xf32>
    %732 = vector.shape_cast %731 : vector<1x8x64xf32> to vector<8x64xf32>
    %c1_393 = arith.constant 1 : index
    %c0_394 = arith.constant 0 : index
    %c0_395 = arith.constant 0 : index
    %733 = vector.load %arg3[%c1_393, %c0_394, %c0_395] : memref<2x64x192xbf16, #tpu.memory_space<vmem>>, vector<1x64x192xbf16>
    %734 = vector.shape_cast %733 : vector<1x64x192xbf16> to vector<64x192xbf16>
    %c1_396 = arith.constant 1 : index
    %c0_397 = arith.constant 0 : index
    %c0_398 = arith.constant 0 : index
    %735 = vector.load %arg4[%c1_396, %c0_397, %c0_398] : memref<2x64x192xbf16, #tpu.memory_space<vmem>>, vector<1x64x192xbf16>
    %736 = vector.shape_cast %735 : vector<1x64x192xbf16> to vector<64x192xbf16>
    %c1_399 = arith.constant 1 : index
    %c0_400 = arith.constant 0 : index
    %c0_401 = arith.constant 0 : index
    %737 = vector.load %arg5[%c1_399, %c0_400, %c0_401] : memref<2x1x192xf32, #tpu.memory_space<vmem>>, vector<1x1x192xf32>
    %738 = vector.shape_cast %737 : vector<1x1x192xf32> to vector<1x192xf32>
    %c1_402 = arith.constant 1 : index
    %c0_403 = arith.constant 0 : index
    %c0_404 = arith.constant 0 : index
    %739 = vector.load %arg6[%c1_402, %c0_403, %c0_404] : memref<2x1x192xf32, #tpu.memory_space<vmem>>, vector<1x1x192xf32>
    %740 = vector.shape_cast %739 : vector<1x1x192xf32> to vector<1x192xf32>
    %741 = arith.truncf %727 : vector<8x64xf32> to vector<8x64xbf16>
    %cst_405 = arith.constant dense<0.000000e+00> : vector<8x192xf32>
    %742 = tpu.matmul %741, %734, %cst_405 {dimension_numbers = #tpu.dot_dimension_numbers<[1], [0], [0], [1], [0, 0, 1, 1], [], []>} : vector<8x64xbf16>, vector<64x192xbf16>, vector<8x192xf32> -> vector<8x192xf32>
    %743 = vector.broadcast %738 : vector<1x192xf32> to vector<8x192xf32>
    %744 = arith.addf %742, %743 : vector<8x192xf32>
    %745 = arith.truncf %732 : vector<8x64xf32> to vector<8x64xbf16>
    %cst_406 = arith.constant dense<0.000000e+00> : vector<8x192xf32>
    %746 = tpu.matmul %745, %736, %cst_406 {dimension_numbers = #tpu.dot_dimension_numbers<[1], [0], [0], [1], [0, 0, 1, 1], [], []>} : vector<8x64xbf16>, vector<64x192xbf16>, vector<8x192xf32> -> vector<8x192xf32>
    %747 = vector.broadcast %740 : vector<1x192xf32> to vector<8x192xf32>
    %748 = arith.addf %746, %747 : vector<8x192xf32>
    %749 = vector.extract_strided_slice %744 {offsets = [0, 0], sizes = [8, 128], strides = [1, 1]} : vector<8x192xf32> to vector<8x128xf32>
    %750 = vector.extract_strided_slice %748 {offsets = [0, 0], sizes = [8, 128], strides = [1, 1]} : vector<8x192xf32> to vector<8x128xf32>
    %751 = arith.addf %749, %750 : vector<8x128xf32>
    %752 = arith.negf %751 : vector<8x128xf32>
    %753 = math.exp %752 : vector<8x128xf32>
    %cst_407 = arith.constant 1.000000e+00 : f32
    %754 = vector.broadcast %cst_407 : f32 to vector<8x128xf32>
    %755 = arith.addf %754, %753 : vector<8x128xf32>
    %756 = arith.divf %754, %755 : vector<8x128xf32>
    %757 = vector.extract_strided_slice %756 {offsets = [0, 0], sizes = [8, 64], strides = [1, 1]} : vector<8x128xf32> to vector<8x64xf32>
    %758 = vector.extract_strided_slice %756 {offsets = [0, 64], sizes = [8, 64], strides = [1, 1]} : vector<8x128xf32> to vector<8x64xf32>
    %759 = vector.extract_strided_slice %744 {offsets = [0, 128], sizes = [8, 64], strides = [1, 1]} : vector<8x192xf32> to vector<8x64xf32>
    %760 = vector.extract_strided_slice %748 {offsets = [0, 128], sizes = [8, 64], strides = [1, 1]} : vector<8x192xf32> to vector<8x64xf32>
    %761 = arith.mulf %757, %760 : vector<8x64xf32>
    %762 = arith.addf %759, %761 : vector<8x64xf32>
    %763 = math.tanh %762 : vector<8x64xf32>
    %cst_408 = arith.constant 1.000000e+00 : f32
    %764 = vector.broadcast %cst_408 : f32 to vector<8x64xf32>
    %765 = arith.subf %764, %758 : vector<8x64xf32>
    %766 = arith.mulf %765, %763 : vector<8x64xf32>
    %767 = arith.mulf %758, %732 : vector<8x64xf32>
    %768 = arith.addf %766, %767 : vector<8x64xf32>
    %c1_409 = arith.constant 1 : index
    %c0_410 = arith.constant 0 : index
    %c0_411 = arith.constant 0 : index
    %769 = vector.load %arg8[%c1_409, %c0_410, %c0_411] : memref<2x8x64xf32, #tpu.memory_space<vmem>>, vector<1x8x64xf32>
    %770 = vector.shape_cast %769 : vector<1x8x64xf32> to vector<8x64xf32>
    %771 = vector.shape_cast %768 : vector<8x64xf32> to vector<1x8x64xf32>
    tpu.vector_store %arg8[%c1_409, %c0_410, %c0_411], %771 {strides = array<i32>} : memref<2x8x64xf32, #tpu.memory_space<vmem>>, vector<1x8x64xf32>,
    %772 = tpu.concatenate %768, %4 in 1 : vector<8x64xf32>, vector<8x64xf32> -> vector<8x128xf32>
    %c1_i32_412 = arith.constant 1 : i32
    %773 = arith.addi %685, %c1_i32_412 : i32
    %774 = vector.broadcast %773 : i32 to vector<8x1xi32>
    %775 = arith.cmpi eq, %3, %774 : vector<8x1xi32>
    %c0_413 = arith.constant 0 : index
    %c0_414 = arith.constant 0 : index
    %776 = vector.load %arg7[%c0_413, %c0_414] : memref<8x128xf32, #tpu.memory_space<vmem>>, vector<8x128xf32>
    %777 = vector.shape_cast %775 : vector<8x1xi1> to vector<8x1xi1>
    %778 = vector.broadcast %777 : vector<8x1xi1> to vector<8x128xi1>
    %779 = arith.select %778, %772, %776 : vector<8x128xi1>, vector<8x128xf32>
    %c0_415 = arith.constant 0 : index
    %c0_416 = arith.constant 0 : index
    %780 = vector.load %arg7[%c0_415, %c0_416] : memref<8x128xf32, #tpu.memory_space<vmem>>, vector<8x128xf32>
    tpu.vector_store %arg7[%c0_415, %c0_416], %779 {strides = array<i32>} : memref<8x128xf32, #tpu.memory_space<vmem>>, vector<8x128xf32>,
    %c8_i32_417 = arith.constant 8 : i32
    return
  }
  func.func @transform_0(%arg0: i32) -> (i32, i32, i32) {
    %c0_i32 = arith.constant 0 : i32
    %c0_i32_0 = arith.constant 0 : i32
    %c0_i32_1 = arith.constant 0 : i32
    return %arg0, %c0_i32, %c0_i32_0 : i32, i32, i32
  }
  func.func @transform_1(%arg0: i32) -> (i32, i32) {
    %c0_i32 = arith.constant 0 : i32
    %c0_i32_0 = arith.constant 0 : i32
    %c0_i32_1 = arith.constant 0 : i32
    return %c0_i32, %c0_i32_0 : i32, i32
  }
  func.func @transform_2(%arg0: i32) -> (i32, i32, i32) {
    %c0_i32 = arith.constant 0 : i32
    %c0_i32_0 = arith.constant 0 : i32
    %c0_i32_1 = arith.constant 0 : i32
    %c0_i32_2 = arith.constant 0 : i32
    return %c0_i32, %c0_i32_0, %c0_i32_1 : i32, i32, i32
  }
  func.func @transform_3(%arg0: i32) -> (i32, i32, i32) {
    %c0_i32 = arith.constant 0 : i32
    %c0_i32_0 = arith.constant 0 : i32
    %c0_i32_1 = arith.constant 0 : i32
    %c0_i32_2 = arith.constant 0 : i32
    return %c0_i32, %c0_i32_0, %c0_i32_1 : i32, i32, i32
  }
  func.func @transform_4(%arg0: i32) -> (i32, i32, i32) {
    %c0_i32 = arith.constant 0 : i32
    %c0_i32_0 = arith.constant 0 : i32
    %c0_i32_1 = arith.constant 0 : i32
    %c0_i32_2 = arith.constant 0 : i32
    return %c0_i32, %c0_i32_0, %c0_i32_1 : i32, i32, i32
  }
  func.func @transform_5(%arg0: i32) -> (i32, i32, i32) {
    %c0_i32 = arith.constant 0 : i32
    %c0_i32_0 = arith.constant 0 : i32
    %c0_i32_1 = arith.constant 0 : i32
    %c0_i32_2 = arith.constant 0 : i32
    return %c0_i32, %c0_i32_0, %c0_i32_1 : i32, i32, i32
  }
  func.func @transform_6(%arg0: i32) -> (i32, i32) {
    %c0_i32 = arith.constant 0 : i32
    %c0_i32_0 = arith.constant 0 : i32
    %c0_i32_1 = arith.constant 0 : i32
    return %c0_i32, %c0_i32_0 : i32, i32
  }
}

</mosaic_0001>

<bundles_post_ra>
// kernel: tpu_custom_call.1
= control target key start
LH: loop header
LB: loop body
LE: loop exit
PB: predicated region body
PF: predicated region fallthrough
CT: control target
= control target key end

     0   :  { %11 = vsyncpa [#allocation4], 0  ;;  %s5051_s0 = inlined_call_operand.hbm [shape: f32[8,8,16], index: 0, kind: input, shape index: {}]   ;;  %s5052_s1 = inlined_call_operand.vmem [shape: s32[8,1], index: 1, kind: input, shape index: {}]   ;;  %s5053_s2 = inlined_call_operand.hbm [shape: bf16[2,64,192], index: 2, kind: input, shape index: {}]   ;;  %s5054_s3 = inlined_call_operand.hbm [shape: bf16[2,64,192], index: 3, kind: input, shape index: {}]   ;;  %s5055_s4 = inlined_call_operand.vmem [shape: f32[2,1,192], index: 4, kind: input, shape index: {}]   ;;  %s5056_s5 = inlined_call_operand.vmem [shape: f32[2,1,192], index: 5, kind: input, shape index: {}]   ;;  %s5057_s6 = inlined_call_operand.hbm [shape: f32[8,128], index: 6, kind: output, shape index: {}]  }
   0x1   :  { %12 = vsyncpa [#allocation7], 0 }
   0x2   :  { %13 = vsyncpa [#allocation5], 0  ;;  %s33_s23 = sshll.u32 %s5053_s2, 4  ;;  %s4644_s24 = smov [#allocation6]   ;;  %s34_s23 = int_to_ptr.hbm [resolvable:$true] %s33_s23 }
   0x3   :  { %s35_s25 = sshll.u32 %s4644_s24, 4  ;;  %s18_s28 = sshll.u32 %s5051_s0, 4  ;;  %s36_s25 = int_to_ptr.vmem [resolvable:$true] %s35_s25  ;;  %s19_s28 = int_to_ptr.hbm [resolvable:$true] %s18_s28 }
   0x4   :  { %s4645_s29 = smov 128   ;;  %s4646_s30 = smov 8  }
   0x5   :  { %41 = dma.hbm_to_vmem [thread:$0]  %s34_s23, 2048, %s36_s25, [#allocation7], %s4645_s29, %s4645_s29, %s4646_s30  }
   0x6   :  { %s4647_s7 = smov [#allocation3]   ;;  %s46_s11 = sshll.u32 %s5054_s3, 4  ;;  %s47_s11 = int_to_ptr.hbm [resolvable:$true] %s46_s11 }
   0x7   :  { %s20_s8 = sshll.u32 %s4647_s7, 4  ;;  %s4648_s2 = smov [#allocation8]   ;;  %s21_s8 = int_to_ptr.vmem [resolvable:$true] %s20_s8 }
   0x8   :  { %26 = dma.hbm_to_vmem [thread:$0]  %s19_s28, 1024, %s21_s8, [#allocation4], %s4645_s29, %s4645_s29, %s4646_s30  }
   0x9   :  { %s48_s12 = sshll.u32 %s4648_s2, 4  ;;  %s49_s12 = int_to_ptr.vmem [resolvable:$true] %s48_s12 }
   0xa   :  { %54 = dma.hbm_to_vmem [thread:$0]  %s47_s11, 2048, %s49_s12, [#allocation7], %s4645_s29, %s4645_s29, %s4646_s30  }
   0xb   :  { %4638 = dma.done.wait [#allocation4], 1024  }
   0xc   :  { %4639 = vsyncadd [#allocation4], 4294966272 }
   0xd   :  { %4640 = dma.done.wait [#allocation7], 4096  }
   0xe   :  { %4641 = vsyncadd [#allocation7], 4294963200  ;;  %vm76_vm0 = vcmask 523264   ;;  %v4649_v0 = vmov 0.0   ;;  %v3334_v1 = vld [vmem:[#allocation8 + $0x30] sm:$0xf] }
   0xf   :  { %77 = vst.msk [vmem:[#allocation2] sm:$0xff] %vm76_vm0, %v4649_v0  ;;  %v4235_v2 = vld [vmem:[#allocation8 + $0x34] sm:$0xf0]  ;;  %v3326_v3 = vld [vmem:[#allocation8 + $0x20] sm:$0xf]  ;;  %vm112_vm1 = vcmask 130048  }
  0x10   :  { %78 = vst.msk [vmem:[#allocation2 + $0x8] sm:$0xff] %vm76_vm0, %v4649_v0  ;;  %v3335_v4 = vor.u32 %v4235_v2, %v3334_v1  ;;  %v4233_v5 = vld [vmem:[#allocation8 + $0x24] sm:$0xf0]  ;;  %v3300_v6 = vld [vmem:[#allocation6] sm:$0xf]  ;;  %s4650_s15 = smov 64  }
  0x11   :  { %v4227_v7 = vld [vmem:[#allocation6 + $0x4] sm:$0xf0]  ;;  %v3327_v8 = vor.u32 %v4233_v5, %v3326_v3  ;;  %v3318_v9 = vld [vmem:[#allocation8 + $0x10] sm:$0xf]  ;;  %v4231_v10 = vld [vmem:[#allocation8 + $0x14] sm:$0xf0] }
  0x12   :  { %196 = vmatpush.bf16.msra.mxu2 %v3335_v4  ;;  %v3301_v11 = vor.u32 %v4227_v7, %v3300_v6  ;;  %v82_v12 = vld [vmem:[#allocation3] sm:$0xff]  ;;  %v4234_v14 = vld [vmem:[#allocation8 + $0x34] sm:$0xf]  ;;  %v3336_v15 = vld [vmem:[#allocation8 + $0x38] sm:$0xf0]  ;;  %v3319_v20 = vor.u32 %v4231_v10, %v3318_v9  ;;  %s3287_s26 = sshll.u32 %s5057_s6, 4  ;;  %s3288_s26 = int_to_ptr.hbm [resolvable:$true] %s3287_s26 }
  0x13   :  { %v96_v13 = vpack.c.bf16 %v82_v12, %v82_v12  ;;  %v4232_v16 = vld [vmem:[#allocation8 + $0x24] sm:$0xf]  ;;  %v3339_v17 = vor.u32 %v4234_v14, %v3336_v15  ;;  %v3328_v18 = vld [vmem:[#allocation8 + $0x28] sm:$0xf0]  ;;  %v3310_v21 = vld [vmem:[#allocation8] sm:$0xf] }
  0x14   :  { %123 = vmatpush.bf16.msra.mxu0 %v3301_v11  ;;  %v4226_v19 = vld [vmem:[#allocation6 + $0x4] sm:$0xf]  ;;  %v3331_v22 = vor.u32 %v4232_v16, %v3328_v18  ;;  %v3302_v23 = vld [vmem:[#allocation6 + $0x8] sm:$0xf0]  ;;  %v4229_v24 = vld [vmem:[#allocation8 + $0x4] sm:$0xf0] }
  0x15   :  { %209 = vmatpush.bf16.msra.mxu3 %v3339_v17  ;;  %v4230_v25 = vld [vmem:[#allocation8 + $0x14] sm:$0xf]  ;;  %v3320_v26 = vld [vmem:[#allocation8 + $0x18] sm:$0xf0]  ;;  %v3305_v27 = vor.u32 %v4226_v19, %v3302_v23  ;;  %v3311_v28 = vor.u32 %v4229_v24, %v3310_v21  ;;  %v4228_v31 = vld [vmem:[#allocation8 + $0x4] sm:$0xf] }
  0x16   :  { %197 = vmatpush.bf16.msra.mxu2 %v3327_v8  ;;  %v83_v29 = vld [vmem:[#allocation2] sm:$0xff]  ;;  %v3323_v30 = vor.u32 %v4230_v25, %v3320_v26  ;;  %v3312_v32 = vld [vmem:[#allocation8 + $0x8] sm:$0xf0]  ;;  %v4251_v7 = vld [vmem:[#allocation8 + $0x74] sm:$0xf0] }
  0x17   :  { %3306 = vmatmul.msk.bf16.vlgmr.msra.gmra.mxu0 %vm112_vm1, %v96_v13  ;;  %136 = vmatpush.bf16.msra.mxu1 %v3305_v27  ;;  %v142_v33 = vpack.c.bf16 %v83_v29, %v83_v29  ;;  %v3315_v34 = vor.u32 %v4228_v31, %v3312_v32  ;;  %v94_v36 = vld [vmem:[%s5055_s4] sm:$0x3]  ;;  %v4250_v8 = vld [vmem:[#allocation8 + $0x74] sm:$0xf]  ;;  %v3407_v10 = vld [vmem:[#allocation8 + $0x78] sm:$0xf0] }
  0x18   :  { %v95_v39 = vld [vmem:[%s5056_s5] sm:$0x3]  ;;  %v98_v40 = vperm.slane %v94_v36, 0  ;;  %v99_v60 = vperm.slane %v94_v36, 1  ;;  %v3397_v11 = vld [vmem:[#allocation8 + $0x60] sm:$0xf] }
  0x19   :  { %210 = vmatpush.bf16.msra.mxu3 %v3331_v22  ;;  %v144_v41 = vperm.slane %v95_v39, 0  ;;  %v145_v55 = vperm.slane %v95_v39, 1  ;;  %v3405_v6 = vld [vmem:[#allocation8 + $0x70] sm:$0xf]  ;;  %v4249_v12 = vld [vmem:[#allocation8 + $0x64] sm:$0xf0] }
  0x1a   :  { %198 = vmatpush.bf16.msra.mxu2 %v3319_v20  ;;  %3307 = vmatmul.msk.bf16.vlgmr.msra.gmra.mxu1 %vm112_vm1, %v96_v13  ;;  %v3406_v9 = vor.u32 %v4251_v7, %v3405_v6  ;;  %v3410_v13 = vor.u32 %v4250_v8, %v3407_v10  ;;  %v4248_v14 = vld [vmem:[#allocation8 + $0x64] sm:$0xf]  ;;  %v3399_v15 = vld [vmem:[#allocation8 + $0x68] sm:$0xf0]  ;;  %v3398_v16 = vor.u32 %v4249_v12, %v3397_v11  ;;  %v3389_v18 = vld [vmem:[#allocation8 + $0x50] sm:$0xf] }
  0x1b   :  { %v3402_v17 = vor.u32 %v4248_v14, %v3399_v15  ;;  %v4247_v19 = vld [vmem:[#allocation8 + $0x54] sm:$0xf0]  ;;  %v4246_v20 = vld [vmem:[#allocation8 + $0x54] sm:$0xf]  ;;  %v3391_v21 = vld [vmem:[#allocation8 + $0x58] sm:$0xf0] }
  0x1c   :  { %v3371_v22 = vld [vmem:[#allocation6 + $0x70] sm:$0xf]  ;;  %v4243_v23 = vld [vmem:[#allocation6 + $0x74] sm:$0xf0]  ;;  %v3381_v24 = vld [vmem:[#allocation8 + $0x40] sm:$0xf] }
  0x1d   :  { %211 = vmatpush.bf16.msra.mxu3 %v3323_v30  ;;  %v3372_v25 = vor.u32 %v4243_v23, %v3371_v22  ;;  %v4242_v26 = vld [vmem:[#allocation6 + $0x74] sm:$0xf]  ;;  %v3373_v27 = vld [vmem:[#allocation6 + $0x78] sm:$0xf0]  ;;  %v4244_v30 = vld [vmem:[#allocation8 + $0x44] sm:$0xf] }
  0x1e   :  { %199 = vmatpush.bf16.msra.mxu2 %v3311_v28  ;;  %v3390_v28 = vor.u32 %v4247_v19, %v3389_v18  ;;  %v3383_v31 = vld [vmem:[#allocation8 + $0x48] sm:$0xf0]  ;;  %v3376_v32 = vor.u32 %v4242_v26, %v3373_v27  ;;  %v4241_v36 = vld [vmem:[#allocation6 + $0x64] sm:$0xf0]  ;;  %v4240_v39 = vld [vmem:[#allocation6 + $0x64] sm:$0xf] }
  0x1f   :  { %338 = vmatpush.bf16.msrb.mxu0 %v3372_v25  ;;  %v3434_v6 = vld [vmem:[#allocation8 + $0x10] sm:$0xf]  ;;  %v4257_v7 = vld [vmem:[#allocation8 + $0x14] sm:$0xf0]  ;;  %v4256_v8 = vld [vmem:[#allocation8 + $0x14] sm:$0xf] }
  0x20   :  { %351 = vmatpush.bf16.msrb.mxu1 %v3376_v32  ;;  %v3347_v10 = vld [vmem:[#allocation6 + $0x40] sm:$0xf]  ;;  %v4237_v11 = vld [vmem:[#allocation6 + $0x44] sm:$0xf0]  ;;  %v4236_v14 = vld [vmem:[#allocation6 + $0x44] sm:$0xf] }
  0x21   :  { %3340 = vmatmul.msk.bf16.vlgmr.msra.gmra.mxu2 %vm76_vm0, %v142_v33  ;;  %212 = vmatpush.bf16.msra.mxu3 %v3315_v34  ;;  %v3450_v34 = vld [vmem:[#allocation8 + $0x30] sm:$0xf]  ;;  %v3349_v15 = vld [vmem:[#allocation6 + $0x48] sm:$0xf0]  ;;  %v4255_v18 = vld [vmem:[#allocation8 + $0x4] sm:$0xf0] }
  0x22   :  { %413 = vmatpush.bf16.msrb.mxu2 %v3406_v9  ;;  %v3435_v9 = vor.u32 %v4257_v7, %v3434_v6  ;;  %v4254_v19 = vld [vmem:[#allocation8 + $0x4] sm:$0xf]  ;;  %v3416_v23 = vld [vmem:[#allocation6] sm:$0xf]  ;;  %v3418_v27 = vld [vmem:[#allocation6 + $0x8] sm:$0xf0] }
  0x23   :  { %v4252_v26 = vld [vmem:[#allocation6 + $0x4] sm:$0xf] }
  0x24   :  { %3341 = vmatmul.msk.bf16.vlgmr.msra.gmra.mxu3 %vm76_vm0, %v142_v33  ;;  %v3394_v33 = vor.u32 %v4246_v20, %v3391_v21  ;;  %v3428_v20 = vld [vmem:[#allocation8 + $0x8] sm:$0xf0] }
  0x25   :  { %426 = vmatpush.bf16.msrb.mxu3 %v3410_v13  ;;  %v3348_v13 = vor.u32 %v4237_v11, %v3347_v10  ;;  %v3431_v22 = vor.u32 %v4254_v19, %v3428_v20 }
  0x26   :  { %414 = vmatpush.bf16.msrb.mxu2 %v3398_v16  ;;  %v3426_v16 = vld [vmem:[#allocation8] sm:$0xf] }
  0x27   :  { %v3427_v21 = vor.u32 %v4255_v18, %v3426_v16 }
  0x29   :  { %427 = vmatpush.bf16.msrb.mxu3 %v3402_v17  ;;  %v3352_v17 = vor.u32 %v4236_v14, %v3349_v15 }
  0x2a   :  { %415 = vmatpush.bf16.msrb.mxu2 %v3390_v28  ;;  %v3421_v28 = vor.u32 %v4252_v26, %v3418_v27 }
  0x2d   :  { %428 = vmatpush.bf16.msrb.mxu3 %v3394_v33  ;;  %v488_v33 = vld [vmem:[#allocation3 + $0x8] sm:$0xff] }
  0x94   :  { %v125_v35 = vpop.f32.mrf.mxu0 }
  0x95   :  { %v126_v42 = vadd.f32 %v125_v35, %v98_v40  ;;  %v3363_v35 = vld [vmem:[#allocation6 + $0x60] sm:$0xf]  ;;  %v3365_v40 = vld [vmem:[#allocation6 + $0x68] sm:$0xf0] }
  0x97   :  { %v138_v38 = vpop.f32.mrf.mxu1 }
  0x98   :  { %v139_v1 = vadd.f32 %v138_v38, %v99_v60  ;;  %v3364_v38 = vor.u32 %v4241_v36, %v3363_v35 }
  0x9a   :  { %339 = vmatpush.bf16.msrb.mxu0 %v3364_v38 }
  0x9c   :  { %v127_v37 = vpop.f32.mrf.mxu0 }
  0x9d   :  { %v4261_v37 = vld [vmem:[#allocation8 + $0x34] sm:$0xf0] }
  0x9f   :  { %v140_v44 = vpop.f32.mrf.mxu1 }
  0xa4   :  { %v201_v43 = vpop.f32.mrf.mxu2 }
  0xa5   :  { %v202_v45 = vadd.f32 %v201_v43, %v144_v41  ;;  %v4260_v41 = vld [vmem:[#allocation8 + $0x34] sm:$0xf]  ;;  %v3368_v43 = vor.u32 %v4240_v39, %v3365_v40  ;;  %v3344_v39 = vld [vmem:[%s5056_s5 + $0x2] sm:$0x3] }
  0xa6   :  { %v3343_v40 = vld [vmem:[%s5055_s4 + $0x2] sm:$0x3] }
  0xa7   :  { %v218_v46 = vadd.f32 %v202_v45, %v126_v42  ;;  %v214_v47 = vpop.f32.mrf.mxu3  ;;  %v3452_v42 = vld [vmem:[#allocation8 + $0x38] sm:$0xf0]  ;;  %352 = vmatpush.bf16.msrb.mxu1 %v3368_v43  ;;  %v285_v15 = vperm.slane %v3343_v40, 1 }
  0xa8   :  { %v215_v61 = vadd.f32 %v214_v47, %v145_v55  ;;  %v3386_v47 = vor.u32 %v4244_v30, %v3383_v31 }
  0xa9   :  { %v3342_v48 = vmul.f32 -1.442695, %v218_v46  ;;  %v4714_v46 = vld [vmem:[#allocation2 + $0x8] sm:$0xff] }
  0xaa   :  { %429 = vmatpush.bf16.msrb.mxu3 %v3386_v47 }
  0xab   :  { %4446 = vpow2.f32 %v3342_v48  ;;  %v3451_v48 = vor.u32 %v4261_v37, %v3450_v34  ;;  %v502_v34 = vpack.c.bf16 %v488_v33, %v488_v33 }
  0xac   :  { %v203_v49 = vpop.f32.mrf.mxu2 }
  0xad   :  { %v3455_v49 = vor.u32 %v4260_v41, %v3452_v42  ;;  %v362_v41 = vperm.slane %v3344_v39, 0  ;;  %v284_v42 = vperm.slane %v3343_v40, 0 }
  0xaf   :  { %v216_v50 = vpop.f32.mrf.mxu3  ;;  %613 = vmatpush.bf16.msra.mxu3 %v3455_v49 }
  0xb0   :  { %v3442_v50 = vld [vmem:[#allocation8 + $0x20] sm:$0xf] }
  0xb1   :  { %v4447_v51 = vpop.eup %4446 }
  0xb2   :  { %v222_v52 = vadd.f32 1.0, %v4447_v51  ;;  %v4259_v51 = vld [vmem:[#allocation8 + $0x24] sm:$0xf0] }
  0xb3   :  { %v3443_v55 = vor.u32 %v4259_v51, %v3442_v50 }
  0xb4   :  { %4448 = vrcp.f32 %v222_v52  ;;  %v234_v57 = vand.u32 2147483648, %v222_v52  ;;  %v232_v59 = vand.u32 2147483647, %v222_v52  ;;  %vm228_vm3 = vweird.f32 %v222_v52 }
  0xb6   :  { %v235_v63 = vor.u32 1.1754944e-38, %v234_v57  ;;  %vm233_vm5 = vcmp.eq.f32.partialorder %v232_v59, 8.507059e+37 }
  0xba   :  { %v4449_v53 = vpop.eup %4448 }
  0xbb   :  { %v224_v54 = vmul.f32 %v4449_v53, %v222_v52  ;;  %vm229_vm2 = vweird.f32 %v4449_v53  ;;  %v360_v52 = vpack.c.bf16 %v4714_v46, %v4714_v46 }
  0xbc   :  { %vm230_vm4 = vmor %vm228_vm3, %vm229_vm2 }
  0xbd   :  { %v225_v56 = vsub.f32 1.0, %v224_v54  ;;  %v3444_v54 = vld [vmem:[#allocation8 + $0x28] sm:$0xf0]  ;;  %3412 = vmatmul.msk.bf16.vlgmr.msrb.gmra.mxu3 %vm76_vm0, %v360_v52 }
  0xbf   :  { %v226_v58 = vmul.f32 %v4449_v53, %v225_v56 }
  0xc1   :  { %v227_v62 = vadd.f32 %v4449_v53, %v226_v58 }
  0xc3   :  { %v231_v0 = vsel %vm230_vm4, %v4449_v53, %v227_v62  ;;  %v4258_v53 = vld [vmem:[#allocation8 + $0x24] sm:$0xf] }
  0xc4   :  { %v4709_v2 = vsel %vm233_vm5, %v235_v63, %v231_v0  ;;  %v3447_v56 = vor.u32 %v4258_v53, %v3444_v54  ;;  %v3355_v63 = vld [vmem:[#allocation6 + $0x50] sm:$0xf]  ;;  %v4239_v0 = vld [vmem:[#allocation6 + $0x54] sm:$0xf0] }
  0xc5   :  { %v238_v3 = vmul.f32 %v4709_v2, %v215_v61  ;;  %v241_v57 = vsub.f32 1.0, %v4709_v2  ;;  %v501_v54 = vld [vmem:[%s5056_s5] sm:$0x3] }
  0xc6   :  { %614 = vmatpush.bf16.msra.mxu3 %v3447_v56  ;;  %v550_v27 = vperm.slane %v501_v54, 1 }
  0xc7   :  { %v239_v4 = vadd.f32 %v238_v3, %v139_v1  ;;  %v4238_v1 = vld [vmem:[#allocation6 + $0x54] sm:$0xf]  ;;  %v3356_v3 = vor.u32 %v4239_v0, %v3355_v63 }
  0xc9   :  { %4450 = vtanh.f32 %v239_v4  ;;  %v3357_v4 = vld [vmem:[#allocation6 + $0x58] sm:$0xf0]  ;;  %340 = vmatpush.bf16.msrb.mxu0 %v3356_v3 }
  0xcd   :  { %341 = vmatpush.bf16.msrb.mxu0 %v3348_v13 }
  0xcf   :  { %v4451_v5 = vpop.eup %4450 }
  0xd0   :  { %243 = vrot.lane.b32.xlu0 %v4451_v5, %s4650_s15  ;;  %v3360_v5 = vor.u32 %v4238_v1, %v3357_v4 }
  0xd2   :  { %353 = vmatpush.bf16.msrb.mxu1 %v3360_v5 }
  0xd6   :  { %354 = vmatpush.bf16.msrb.mxu1 %v3352_v17 }
  0xd8   :  { %248 = vrot.lane.b32.xlu0 %v83_v29, %s4650_s15  ;;  %v4245_v29 = vld [vmem:[#allocation8 + $0x44] sm:$0xf0] }
  0xd9   :  { %v3382_v45 = vor.u32 %v4245_v29, %v3381_v24  ;;  %v4253_v24 = vld [vmem:[#allocation6 + $0x4] sm:$0xf0] }
  0xda   :  { %v3417_v25 = vor.u32 %v4253_v24, %v3416_v23  ;;  %541 = vmatpush.bf16.msra.mxu1 %v3421_v28 }
  0xdb   :  { %416 = vmatpush.bf16.msrb.mxu2 %v3382_v45 }
  0xdc   :  { %528 = vmatpush.bf16.msra.mxu0 %v3417_v25 }
  0xde   :  { %3411 = vmatmul.msk.bf16.vlgmr.msrb.gmra.mxu2 %vm76_vm0, %v360_v52 }
  0xdf   :  { %600 = vmatpush.bf16.msra.mxu2 %v3451_v48 }
  0xe3   :  { %601 = vmatpush.bf16.msra.mxu2 %v3443_v55  ;;  %v500_v55 = vld [vmem:[%s5055_s4] sm:$0x3] }
  0xe7   :  { %602 = vmatpush.bf16.msra.mxu2 %v3435_v9 }
  0xeb   :  { %603 = vmatpush.bf16.msra.mxu2 %v3427_v21 }
 0x140   :  { %v431_v36 = vpop.f32.mrf.mxu3 }
 0x142   :  { %v244_v44 = vpop.permute.xlu0 %243 }
 0x143   :  { %v246_v59 = vmul.f32 %v244_v44, %v241_v57  ;;  %v549_v57 = vperm.slane %v501_v54, 0  ;;  %v3513_v54 = vld [vmem:[#allocation8 + $0x60] sm:$0xf] }
 0x148   :  { %v433_v38 = vpop.f32.mrf.mxu3 }
 0x14a   :  { %v249_v58 = vpop.permute.xlu0 %248 }
 0x14b   :  { %v251_v60 = vmul.f32 %v249_v58, %v4709_v2  ;;  %v3436_v2 = vld [vmem:[#allocation8 + $0x18] sm:$0xf0]  ;;  %v504_v58 = vperm.slane %v500_v55, 0 }
 0x14c   :  { %v3439_v12 = vor.u32 %v4256_v8, %v3436_v2  ;;  %v363_v8 = vperm.slane %v3344_v39, 1 }
 0x14d   :  { %v252_v61 = vadd.f32 %v251_v60, %v246_v59 }
 0x14e   :  { %615 = vmatpush.bf16.msra.mxu3 %v3439_v12  ;;  %v432_v14 = vadd.f32 %v431_v36, %v363_v8  ;;  %v3507_v8 = vld [vmem:[#allocation8 + $0x58] sm:$0xf0] }
 0x14f   :  { %254 = vrot.lane.b32.xlu1 %v252_v61, %s4650_s15  ;;  %v282_v62 = vpack.c.bf16 %v252_v61, %v252_v61 }
 0x152   :  { %616 = vmatpush.bf16.msra.mxu3 %v3431_v22 }
 0x157   :  { %289 = vrot.lane.b32.xlu1 %v282_v62, %s4650_s15 }
 0x161   :  { %v418_v35 = vpop.f32.mrf.mxu2 }
 0x162   :  { %v419_v43 = vadd.f32 %v418_v35, %v362_v41 }
 0x169   :  { %v420_v37 = vpop.f32.mrf.mxu2 }
 0x1c1   :  { %v255_v29 = vpop.permute.xlu1 %254 }
 0x1c2   :  { %257 = vst.msk [vmem:[#allocation2] sm:$0xff] %vm76_vm0, %v255_v29 }
 0x1c9   :  { %v290_v30 = vpop.permute.xlu1 %289  ;;  %v489_v31 = vld [vmem:[#allocation2] sm:$0xff] }
 0x1ca   :  { %v547_v32 = vpack.c.bf16 %v489_v31, %v489_v31  ;;  %652 = vrot.lane.b32.xlu1 %v489_v31, %s4650_s15  ;;  %3377 = vmatmul.msk.bf16.vlgmr.msrb.gmra.mxu0 %vm76_vm0, %v290_v30 }
 0x1cb   :  { %3378 = vmatmul.msk.bf16.vlgmr.msrb.gmra.mxu1 %vm76_vm0, %v290_v30  ;;  %v505_v30 = vperm.slane %v500_v55, 1  ;;  %v4275_v55 = vld [vmem:[#allocation8 + $0x64] sm:$0xf0] }
 0x1cc   :  { %3456 = vmatmul.msk.bf16.vlgmr.msra.gmra.mxu2 %vm76_vm0, %v547_v32  ;;  %3457 = vmatmul.msk.bf16.vlgmr.msra.gmra.mxu3 %vm76_vm0, %v547_v32 }
 0x1da   :  { %3422 = vmatmul.msk.bf16.vlgmr.msra.gmra.mxu0 %vm112_vm1, %v502_v34 }
 0x1db   :  { %3423 = vmatmul.msk.bf16.vlgmr.msra.gmra.mxu1 %vm112_vm1, %v502_v34 }
 0x247   :  { %v343_v44 = vpop.f32.mrf.mxu0 }
 0x248   :  { %v344_v45 = vadd.f32 %v343_v44, %v284_v42  ;;  %v356_v47 = vpop.f32.mrf.mxu1 }
 0x249   :  { %v357_v21 = vadd.f32 %v356_v47, %v285_v15  ;;  %v3487_v15 = vld [vmem:[#allocation6 + $0x70] sm:$0xf] }
 0x24a   :  { %v435_v48 = vadd.f32 %v419_v43, %v344_v45 }
 0x24c   :  { %v3413_v49 = vmul.f32 -1.442695, %v435_v48 }
 0x24e   :  { %4452 = vpow2.f32 %v3413_v49  ;;  %v3521_v49 = vld [vmem:[#allocation8 + $0x70] sm:$0xf] }
 0x24f   :  { %v345_v50 = vpop.f32.mrf.mxu0  ;;  %v605_v51 = vpop.f32.mrf.mxu2 }
 0x250   :  { %v358_v52 = vpop.f32.mrf.mxu1  ;;  %v618_v53 = vpop.f32.mrf.mxu3  ;;  %v606_v62 = vadd.f32 %v605_v51, %v549_v57  ;;  %v4277_v50 = vld [vmem:[#allocation8 + $0x74] sm:$0xf0]  ;;  %v4276_v51 = vld [vmem:[#allocation8 + $0x74] sm:$0xf]  ;;  %v3515_v57 = vld [vmem:[#allocation8 + $0x68] sm:$0xf0] }
 0x251   :  { %v619_v35 = vadd.f32 %v618_v53, %v550_v27  ;;  %v3522_v52 = vor.u32 %v4277_v50, %v3521_v49  ;;  %v3523_v53 = vld [vmem:[#allocation8 + $0x78] sm:$0xf0]  ;;  %v4265_v27 = vld [vmem:[#allocation6 + $0x54] sm:$0xf0]  ;;  %v3465_v49 = vld [vmem:[#allocation6 + $0x48] sm:$0xf0] }
 0x253   :  { %812 = vmatpush.bf16.msrb.mxu2 %v3522_v52 }
 0x254   :  { %v4453_v56 = vpop.eup %4452 }
 0x255   :  { %v439_v59 = vadd.f32 1.0, %v4453_v56  ;;  %v4274_v56 = vld [vmem:[#allocation8 + $0x64] sm:$0xf] }
 0x257   :  { %4454 = vrcp.f32 %v439_v59  ;;  %v530_v60 = vpop.f32.mrf.mxu0  ;;  %v607_v61 = vpop.f32.mrf.mxu2  ;;  %v451_v10 = vand.u32 2147483648, %v439_v59  ;;  %v449_v12 = vand.u32 2147483647, %v439_v59  ;;  %vm445_vm7 = vweird.f32 %v439_v59 }
 0x258   :  { %v531_v63 = vadd.f32 %v530_v60, %v504_v58  ;;  %v620_v0 = vpop.f32.mrf.mxu3  ;;  %v543_v1 = vpop.f32.mrf.mxu1  ;;  %v3514_v58 = vor.u32 %v4275_v55, %v3513_v54  ;;  %v3550_v55 = vld [vmem:[#allocation8 + $0x10] sm:$0xf] }
 0x259   :  { %v452_v17 = vor.u32 1.1754944e-38, %v451_v10  ;;  %vm450_vm9 = vcmp.eq.f32.partialorder %v449_v12, 8.507059e+37  ;;  %v544_v36 = vadd.f32 %v543_v1, %v505_v30  ;;  %v653_v61 = vpop.permute.xlu1 %652  ;;  %v3499_v12 = vld [vmem:[#allocation8 + $0x48] sm:$0xf0]  ;;  %v4287_v30 = vld [vmem:[#allocation8 + $0x34] sm:$0xf0] }
 0x25a   :  { %v622_v3 = vadd.f32 %v606_v62, %v531_v63  ;;  %813 = vmatpush.bf16.msrb.mxu2 %v3514_v58  ;;  %v4279_v58 = vld [vmem:[#allocation6 + $0x4] sm:$0xf0] }
 0x25c   :  { %v3458_v4 = vmul.f32 -1.442695, %v622_v3 }
 0x25d   :  { %v4455_v5 = vpop.eup %4454 }
 0x25e   :  { %v441_v6 = vmul.f32 %v4455_v5, %v439_v59  ;;  %4456 = vpow2.f32 %v3458_v4  ;;  %vm446_vm6 = vweird.f32 %v4455_v5  ;;  %v3518_v59 = vor.u32 %v4274_v56, %v3515_v57  ;;  %v3505_v4 = vld [vmem:[#allocation8 + $0x50] sm:$0xf]  ;;  %v4282_v56 = vld [vmem:[#allocation8 + $0x14] sm:$0xf]  ;;  %v3532_v57 = vld [vmem:[#allocation6] sm:$0xf] }
 0x25f   :  { %v532_v7 = vpop.f32.mrf.mxu0  ;;  %vm447_vm8 = vmor %vm445_vm7, %vm446_vm6 }
 0x260   :  { %v442_v9 = vsub.f32 1.0, %v441_v6  ;;  %v545_v2 = vpop.f32.mrf.mxu1  ;;  %v4272_v6 = vld [vmem:[#allocation8 + $0x54] sm:$0xf] }
 0x261   :  { %v4271_v2 = vld [vmem:[#allocation8 + $0x44] sm:$0xf0]  ;;  %v3510_v10 = vor.u32 %v4272_v6, %v3507_v8  ;;  %v4278_v6 = vld [vmem:[#allocation6 + $0x4] sm:$0xf] }
 0x262   :  { %v443_v11 = vmul.f32 %v4455_v5, %v442_v9  ;;  %v3497_v9 = vld [vmem:[#allocation8 + $0x40] sm:$0xf] }
 0x264   :  { %v4457_v13 = vpop.eup %4456  ;;  %v444_v16 = vadd.f32 %v4455_v5, %v443_v11  ;;  %v4270_v11 = vld [vmem:[#allocation8 + $0x44] sm:$0xf] }
 0x265   :  { %v626_v18 = vadd.f32 1.0, %v4457_v13  ;;  %v3498_v13 = vor.u32 %v4271_v2, %v3497_v9 }
 0x266   :  { %v448_v19 = vsel %vm447_vm8, %v4455_v5, %v444_v16  ;;  %v4273_v5 = vld [vmem:[#allocation8 + $0x54] sm:$0xf0] }
 0x267   :  { %v453_v20 = vsel %vm450_vm9, %v452_v17, %v448_v19  ;;  %4458 = vrcp.f32 %v626_v18  ;;  %v638_v28 = vand.u32 2147483648, %v626_v18  ;;  %v636_v32 = vand.u32 2147483647, %v626_v18  ;;  %v4269_v16 = vld [vmem:[#allocation6 + $0x74] sm:$0xf0] }
 0x268   :  { %v455_v22 = vmul.f32 %v453_v20, %v432_v14  ;;  %vm632_vm11 = vweird.f32 %v626_v18  ;;  %v458_v43 = vsub.f32 1.0, %v453_v20  ;;  %v3506_v7 = vor.u32 %v4273_v5, %v3505_v4  ;;  %v4268_v17 = vld [vmem:[#allocation6 + $0x74] sm:$0xf]  ;;  %v3489_v19 = vld [vmem:[#allocation6 + $0x78] sm:$0xf0] }
 0x269   :  { %v639_v34 = vor.u32 1.1754944e-38, %v638_v28  ;;  %vm637_vm13 = vcmp.eq.f32.partialorder %v636_v32, 8.507059e+37  ;;  %v3502_v14 = vor.u32 %v4270_v11, %v3499_v12  ;;  %v4264_v32 = vld [vmem:[#allocation6 + $0x54] sm:$0xf]  ;;  %v3544_v4 = vld [vmem:[#allocation8 + $0x8] sm:$0xf0] }
 0x26a   :  { %v456_v23 = vadd.f32 %v455_v22, %v357_v21  ;;  %814 = vmatpush.bf16.msrb.mxu2 %v3506_v7  ;;  %v4267_v21 = vld [vmem:[#allocation6 + $0x64] sm:$0xf0]  ;;  %v3492_v22 = vor.u32 %v4268_v17, %v3489_v19  ;;  %v3534_v7 = vld [vmem:[#allocation6 + $0x8] sm:$0xf0]  ;;  %v887_v12 = vld [vmem:[#allocation3 + $0x10] sm:$0xff] }
 0x26b   :  { %v3537_v8 = vor.u32 %v4278_v6, %v3534_v7  ;;  %v3459_v19 = vld [vmem:[%s5055_s4 + $0x2] sm:$0x3] }
 0x26c   :  { %4460 = vtanh.f32 %v456_v23  ;;  %v4266_v23 = vld [vmem:[#allocation6 + $0x64] sm:$0xf]  ;;  %750 = vmatpush.bf16.msrb.mxu1 %v3492_v22 }
 0x26d   :  { %v4459_v24 = vpop.eup %4458 }
 0x26e   :  { %v628_v25 = vmul.f32 %v4459_v24, %v626_v18  ;;  %vm633_vm10 = vweird.f32 %v4459_v24  ;;  %815 = vmatpush.bf16.msrb.mxu2 %v3498_v13  ;;  %v3488_v18 = vor.u32 %v4269_v16, %v3487_v15  ;;  %v901_v13 = vpack.c.bf16 %v887_v12, %v887_v12 }
 0x26f   :  { %vm634_vm12 = vmor %vm632_vm11, %vm633_vm10 }
 0x270   :  { %v629_v26 = vsub.f32 1.0, %v628_v25  ;;  %737 = vmatpush.bf16.msrb.mxu0 %v3488_v18  ;;  %v3460_v18 = vld [vmem:[%s5056_s5 + $0x2] sm:$0x3] }
 0x272   :  { %v4461_v29 = vpop.eup %4460  ;;  %v630_v31 = vmul.f32 %v4459_v24, %v629_v26  ;;  %v3471_v26 = vld [vmem:[#allocation6 + $0x50] sm:$0xf] }
 0x273   :  { %460 = vrot.lane.b32.xlu2 %v4461_v29, %s4650_s15  ;;  %v3566_v29 = vld [vmem:[#allocation8 + $0x30] sm:$0xf] }
 0x274   :  { %v631_v33 = vadd.f32 %v4459_v24, %v630_v31  ;;  %v4286_v31 = vld [vmem:[#allocation8 + $0x34] sm:$0xf] }
 0x276   :  { %v635_v37 = vsel %vm634_vm12, %v4459_v24, %v631_v33  ;;  %v3481_v24 = vld [vmem:[#allocation6 + $0x68] sm:$0xf0]  ;;  %v3473_v33 = vld [vmem:[#allocation6 + $0x58] sm:$0xf0] }
 0x277   :  { %v640_v38 = vsel %vm637_vm13, %v639_v34, %v635_v37  ;;  %v3484_v28 = vor.u32 %v4266_v23, %v3481_v24  ;;  %v3567_v34 = vor.u32 %v4287_v30, %v3566_v29  ;;  %v3558_v37 = vld [vmem:[#allocation8 + $0x20] sm:$0xf]  ;;  %v900_v30 = vld [vmem:[%s5056_s5] sm:$0x3] }
 0x278   :  { %v642_v39 = vmul.f32 %v640_v38, %v619_v35  ;;  %v645_v60 = vsub.f32 1.0, %v640_v38  ;;  %v655_v0 = vmul.f32 %v653_v61, %v640_v38  ;;  %v3568_v35 = vld [vmem:[#allocation8 + $0x38] sm:$0xf0]  ;;  %v3472_v38 = vor.u32 %v4265_v27, %v3471_v26 }
 0x279   :  { %999 = vmatpush.bf16.msra.mxu2 %v3567_v34  ;;  %751 = vmatpush.bf16.msrb.mxu1 %v3484_v28  ;;  %v3533_v61 = vor.u32 %v4279_v58, %v3532_v57  ;;  %v684_v57 = vperm.slane %v3459_v19, 1  ;;  %v949_v7 = vperm.slane %v900_v30, 1 }
 0x27a   :  { %v643_v40 = vadd.f32 %v642_v39, %v544_v36  ;;  %v3571_v36 = vor.u32 %v4286_v31, %v3568_v35  ;;  %v4285_v39 = vld [vmem:[#allocation8 + $0x24] sm:$0xf0]  ;;  %v899_v31 = vld [vmem:[%s5055_s4] sm:$0x3] }
 0x27b   :  { %465 = vrot.lane.b32.xlu2 %v4714_v46, %s4650_s15  ;;  %v3526_v46 = vor.u32 %v4276_v51, %v3523_v53  ;;  %v903_v34 = vperm.slane %v899_v31, 0 }
 0x27c   :  { %4462 = vtanh.f32 %v643_v40  ;;  %v4284_v40 = vld [vmem:[#allocation8 + $0x24] sm:$0xf] }
 0x27d   :  { %825 = vmatpush.bf16.msrb.mxu3 %v3526_v46  ;;  %v4283_v46 = vld [vmem:[#allocation8 + $0x14] sm:$0xf0] }
 0x281   :  { %826 = vmatpush.bf16.msrb.mxu3 %v3518_v59  ;;  %v3551_v59 = vor.u32 %v4283_v46, %v3550_v55 }
 0x282   :  { %v4463_v41 = vpop.eup %4462 }
 0x283   :  { %647 = vrot.lane.b32.xlu0 %v4463_v41, %s4650_s15  ;;  %v3560_v41 = vld [vmem:[#allocation8 + $0x28] sm:$0xf0] }
 0x285   :  { %827 = vmatpush.bf16.msrb.mxu3 %v3510_v10 }
 0x289   :  { %828 = vmatpush.bf16.msrb.mxu3 %v3502_v14 }
 0x28d   :  { %1012 = vmatpush.bf16.msra.mxu3 %v3571_v36 }
 0x2cd   :  { %v461_v42 = vpop.permute.xlu2 %460 }
 0x2ce   :  { %v463_v45 = vmul.f32 %v461_v42, %v458_v43  ;;  %v3476_v42 = vor.u32 %v4264_v32, %v3473_v33  ;;  %v3463_v43 = vld [vmem:[#allocation6 + $0x40] sm:$0xf]  ;;  %v948_v33 = vperm.slane %v900_v30, 0  ;;  %v4302_v30 = vld [vmem:[#allocation8 + $0x74] sm:$0xf] }
 0x2d0   :  { %752 = vmatpush.bf16.msrb.mxu1 %v3476_v42 }
 0x2d5   :  { %v466_v44 = vpop.permute.xlu2 %465 }
 0x2d6   :  { %v468_v47 = vmul.f32 %v466_v44, %v453_v20  ;;  %v3479_v20 = vld [vmem:[#allocation6 + $0x60] sm:$0xf]  ;;  %v4263_v44 = vld [vmem:[#allocation6 + $0x44] sm:$0xf0] }
 0x2d7   :  { %v3480_v25 = vor.u32 %v4267_v21, %v3479_v20  ;;  %v3464_v50 = vor.u32 %v4263_v44, %v3463_v43  ;;  %v761_v20 = vperm.slane %v3460_v18, 0  ;;  %v683_v21 = vperm.slane %v3459_v19, 0 }
 0x2d8   :  { %v469_v48 = vadd.f32 %v468_v47, %v463_v45  ;;  %v3559_v45 = vor.u32 %v4285_v39, %v3558_v37  ;;  %v3563_v47 = vor.u32 %v4284_v40, %v3560_v41 }
 0x2d9   :  { %738 = vmatpush.bf16.msrb.mxu0 %v3480_v25 }
 0x2da   :  { %471 = vrot.lane.b32.xlu2 %v469_v48, %s4650_s15  ;;  %v4262_v48 = vld [vmem:[#allocation6 + $0x44] sm:$0xf]  ;;  %1000 = vmatpush.bf16.msra.mxu2 %v3559_v45 }
 0x2db   :  { %v3468_v51 = vor.u32 %v4262_v48, %v3465_v49  ;;  %1013 = vmatpush.bf16.msra.mxu3 %v3563_v47 }
 0x2dd   :  { %739 = vmatpush.bf16.msrb.mxu0 %v3472_v38  ;;  %753 = vmatpush.bf16.msrb.mxu1 %v3468_v51 }
 0x2de   :  { %1001 = vmatpush.bf16.msra.mxu2 %v3551_v59 }
 0x2e1   :  { %740 = vmatpush.bf16.msrb.mxu0 %v3464_v50  ;;  %940 = vmatpush.bf16.msra.mxu1 %v3537_v8 }
 0x2e5   :  { %927 = vmatpush.bf16.msra.mxu0 %v3533_v61 }
 0x2f5   :  { %v648_v62 = vpop.permute.xlu0 %647 }
 0x2f6   :  { %v650_v63 = vmul.f32 %v648_v62, %v645_v60  ;;  %v3552_v60 = vld [vmem:[#allocation8 + $0x18] sm:$0xf0] }
 0x2f7   :  { %v3555_v62 = vor.u32 %v4282_v56, %v3552_v60 }
 0x2f8   :  { %v656_v1 = vadd.f32 %v655_v0, %v650_v63  ;;  %v3542_v63 = vld [vmem:[#allocation8] sm:$0xf]  ;;  %v4281_v0 = vld [vmem:[#allocation8 + $0x4] sm:$0xf0] }
 0x2f9   :  { %1014 = vmatpush.bf16.msra.mxu3 %v3555_v62 }
 0x2fa   :  { %658 = vrot.lane.b32.xlu0 %v656_v1, %s4650_s15  ;;  %v681_v3 = vpack.c.bf16 %v656_v1, %v656_v1  ;;  %v4280_v1 = vld [vmem:[#allocation8 + $0x4] sm:$0xf] }
 0x2fb   :  { %v3547_v5 = vor.u32 %v4280_v1, %v3544_v4 }
 0x2fc   :  { %688 = vrot.lane.b32.xlu1 %v681_v3, %s4650_s15  ;;  %v3543_v3 = vor.u32 %v4281_v0, %v3542_v63 }
 0x2fd   :  { %1015 = vmatpush.bf16.msra.mxu3 %v3547_v5 }
 0x2fe   :  { %1002 = vmatpush.bf16.msra.mxu2 %v3543_v3 }
 0x334   :  { %v4751_v52 = vpop.permute.xlu2 %471 }
 0x335   :  { %474 = vst.msk [vmem:[#allocation2 + $0x8] sm:$0xff] %vm76_vm0, %v4751_v52 }
 0x33c   :  { %v662_v53 = vld [vmem:[#allocation2 + $0x8] sm:$0xff] }
 0x33d   :  { %v759_v54 = vpack.c.bf16 %v662_v53, %v662_v53  ;;  %864 = vrot.lane.b32.xlu0 %v662_v53, %s4650_s15 }
 0x33f   :  { %3527 = vmatmul.msk.bf16.vlgmr.msrb.gmra.mxu2 %vm76_vm0, %v759_v54  ;;  %3528 = vmatmul.msk.bf16.vlgmr.msrb.gmra.mxu3 %vm76_vm0, %v759_v54  ;;  %v762_v54 = vperm.slane %v3460_v18, 1 }
 0x36c   :  { %v659_v9 = vpop.permute.xlu0 %658 }
 0x36d   :  { %661 = vst.msk [vmem:[#allocation2] sm:$0xff] %vm76_vm0, %v659_v9 }
 0x36e   :  { %v689_v2 = vpop.permute.xlu1 %688 }
 0x36f   :  { %3493 = vmatmul.msk.bf16.vlgmr.msrb.gmra.mxu0 %vm76_vm0, %v689_v2  ;;  %3494 = vmatmul.msk.bf16.vlgmr.msrb.gmra.mxu1 %vm76_vm0, %v689_v2  ;;  %v904_v2 = vperm.slane %v899_v31, 1 }
 0x374   :  { %v4761_v10 = vld [vmem:[#allocation2] sm:$0xff] }
 0x375   :  { %v946_v11 = vpack.c.bf16 %v4761_v10, %v4761_v10 }
 0x377   :  { %3572 = vmatmul.msk.bf16.vlgmr.msra.gmra.mxu2 %vm76_vm0, %v946_v11  ;;  %3573 = vmatmul.msk.bf16.vlgmr.msra.gmra.mxu3 %vm76_vm0, %v946_v11 }
 0x37f   :  { %3538 = vmatmul.msk.bf16.vlgmr.msra.gmra.mxu0 %vm112_vm1, %v901_v13  ;;  %3539 = vmatmul.msk.bf16.vlgmr.msra.gmra.mxu1 %vm112_vm1, %v901_v13 }
 0x3c2   :  { %v817_v14 = vpop.f32.mrf.mxu2  ;;  %v830_v15 = vpop.f32.mrf.mxu3 }
 0x3c3   :  { %v818_v24 = vadd.f32 %v817_v14, %v761_v20  ;;  %v831_v61 = vadd.f32 %v830_v15, %v762_v54  ;;  %v4299_v54 = vld [vmem:[#allocation8 + $0x54] sm:$0xf0] }
 0x3ca   :  { %v819_v16 = vpop.f32.mrf.mxu2  ;;  %v832_v17 = vpop.f32.mrf.mxu3 }
 0x3ec   :  { %v742_v22 = vpop.f32.mrf.mxu0  ;;  %v755_v23 = vpop.f32.mrf.mxu1 }
 0x3ed   :  { %v743_v25 = vadd.f32 %v742_v22, %v683_v21  ;;  %v756_v0 = vadd.f32 %v755_v23, %v684_v57  ;;  %v865_v23 = vpop.permute.xlu0 %864  ;;  %v3623_v57 = vld [vmem:[#allocation8 + $0x58] sm:$0xf0] }
 0x3ef   :  { %v834_v26 = vadd.f32 %v818_v24, %v743_v25 }
 0x3f1   :  { %v3529_v27 = vmul.f32 -1.442695, %v834_v26 }
 0x3f3   :  { %4464 = vpow2.f32 %v3529_v27 }
 0x3f4   :  { %v744_v28 = vpop.f32.mrf.mxu0  ;;  %v757_v29 = vpop.f32.mrf.mxu1 }
 0x3f5   :  { %v3637_v28 = vld [vmem:[#allocation8 + $0x70] sm:$0xf]  ;;  %v4303_v29 = vld [vmem:[#allocation8 + $0x74] sm:$0xf0] }
 0x3f6   :  { %v3638_v31 = vor.u32 %v4303_v29, %v3637_v28  ;;  %v4310_v28 = vld [vmem:[#allocation8 + $0x24] sm:$0xf]  ;;  %v3676_v29 = vld [vmem:[#allocation8 + $0x28] sm:$0xf0] }
 0x3f8   :  { %1211 = vmatpush.bf16.msrb.mxu2 %v3638_v31  ;;  %v3679_v31 = vor.u32 %v4310_v28, %v3676_v29 }
 0x3f9   :  { %v4465_v32 = vpop.eup %4464 }
 0x3fa   :  { %v838_v35 = vadd.f32 1.0, %v4465_v32  ;;  %v1004_v36 = vpop.f32.mrf.mxu2  ;;  %v1017_v37 = vpop.f32.mrf.mxu3  ;;  %v3639_v32 = vld [vmem:[#allocation8 + $0x78] sm:$0xf0] }
 0x3fb   :  { %v1005_v40 = vadd.f32 %v1004_v36, %v948_v33  ;;  %v1018_v15 = vadd.f32 %v1017_v37, %v949_v7  ;;  %v3629_v33 = vld [vmem:[#allocation8 + $0x60] sm:$0xf]  ;;  %v3631_v36 = vld [vmem:[#allocation8 + $0x68] sm:$0xf0] }
 0x3fc   :  { %4466 = vrcp.f32 %v838_v35  ;;  %v929_v38 = vpop.f32.mrf.mxu0  ;;  %v942_v39 = vpop.f32.mrf.mxu1  ;;  %v850_v53 = vand.u32 2147483648, %v838_v35  ;;  %v848_v46 = vand.u32 2147483647, %v838_v35  ;;  %vm844_vm15 = vweird.f32 %v838_v35 }
 0x3fd   :  { %v930_v41 = vadd.f32 %v929_v38, %v903_v34  ;;  %v943_v16 = vadd.f32 %v942_v39, %v904_v2  ;;  %v4301_v34 = vld [vmem:[#allocation8 + $0x64] sm:$0xf0] }
 0x3fe   :  { %v851_v59 = vor.u32 1.1754944e-38, %v850_v53  ;;  %vm849_vm3 = vcmp.eq.f32.partialorder %v848_v46, 8.507059e+37  ;;  %v3630_v37 = vor.u32 %v4301_v34, %v3629_v33  ;;  %v3621_v53 = vld [vmem:[#allocation8 + $0x50] sm:$0xf] }
 0x3ff   :  { %v1021_v42 = vadd.f32 %v1005_v40, %v930_v41  ;;  %v3622_v46 = vor.u32 %v4299_v54, %v3621_v53  ;;  %v3650_v53 = vld [vmem:[#allocation6 + $0x8] sm:$0xf0] }
 0x400   :  { %1212 = vmatpush.bf16.msrb.mxu2 %v3630_v37 }
 0x401   :  { %v3574_v43 = vmul.f32 -1.442695, %v1021_v42 }
 0x402   :  { %v4467_v44 = vpop.eup %4466  ;;  %v1006_v45 = vpop.f32.mrf.mxu2 }
 0x403   :  { %v1019_v47 = vpop.f32.mrf.mxu3  ;;  %v840_v48 = vmul.f32 %v4467_v44, %v838_v35  ;;  %4468 = vpow2.f32 %v3574_v43  ;;  %vm845_vm14 = vweird.f32 %v4467_v44  ;;  %v4300_v35 = vld [vmem:[#allocation8 + $0x64] sm:$0xf] }
 0x404   :  { %v931_v49 = vpop.f32.mrf.mxu0  ;;  %v944_v50 = vpop.f32.mrf.mxu1  ;;  %vm846_vm2 = vmor %vm844_vm15, %vm845_vm14  ;;  %v3634_v38 = vor.u32 %v4300_v35, %v3631_v36  ;;  %v3603_v47 = vld [vmem:[#allocation6 + $0x70] sm:$0xf]  ;;  %1213 = vmatpush.bf16.msrb.mxu2 %v3622_v46  ;;  %v4305_v35 = vld [vmem:[#allocation6 + $0x4] sm:$0xf0] }
 0x405   :  { %v841_v51 = vsub.f32 1.0, %v840_v48  ;;  %v4295_v48 = vld [vmem:[#allocation6 + $0x74] sm:$0xf0]  ;;  %v4294_v49 = vld [vmem:[#allocation6 + $0x74] sm:$0xf] }
 0x406   :  { %v3604_v50 = vor.u32 %v4295_v48, %v3603_v47  ;;  %v3666_v36 = vld [vmem:[#allocation8 + $0x10] sm:$0xf]  ;;  %v3660_v47 = vld [vmem:[#allocation8 + $0x8] sm:$0xf0] }
 0x407   :  { %v842_v55 = vmul.f32 %v4467_v44, %v841_v51  ;;  %v3605_v51 = vld [vmem:[#allocation6 + $0x78] sm:$0xf0] }
 0x408   :  { %1136 = vmatpush.bf16.msrb.mxu0 %v3604_v50 }
 0x409   :  { %v4469_v56 = vpop.eup %4468  ;;  %v843_v58 = vadd.f32 %v4467_v44, %v842_v55  ;;  %v3608_v55 = vor.u32 %v4294_v49, %v3605_v51  ;;  %v4304_v51 = vld [vmem:[#allocation6 + $0x4] sm:$0xf] }
 0x40a   :  { %v1025_v60 = vadd.f32 1.0, %v4469_v56  ;;  %v4298_v56 = vld [vmem:[#allocation8 + $0x54] sm:$0xf]  ;;  %v3653_v54 = vor.u32 %v4304_v51, %v3650_v53 }
 0x40b   :  { %v847_v62 = vsel %vm846_vm2, %v4467_v44, %v843_v58  ;;  %v3595_v58 = vld [vmem:[#allocation6 + $0x60] sm:$0xf]  ;;  %1149 = vmatpush.bf16.msrb.mxu1 %v3608_v55  ;;  %v1286_v55 = vld [vmem:[#allocation3 + $0x18] sm:$0xff] }
 0x40c   :  { %v852_v63 = vsel %vm849_vm3, %v851_v59, %v847_v62  ;;  %4470 = vrcp.f32 %v1025_v60  ;;  %v1037_v8 = vand.u32 2147483648, %v1025_v60  ;;  %v1035_v12 = vand.u32 2147483647, %v1025_v60  ;;  %v3597_v62 = vld [vmem:[#allocation6 + $0x68] sm:$0xf0] }
 0x40d   :  { %v854_v1 = vmul.f32 %v852_v63, %v831_v61  ;;  %vm1031_vm5 = vweird.f32 %v1025_v60  ;;  %v857_v22 = vsub.f32 1.0, %v852_v63  ;;  %v867_v25 = vmul.f32 %v865_v23, %v852_v63  ;;  %v4292_v61 = vld [vmem:[#allocation6 + $0x64] sm:$0xf] }
 0x40e   :  { %v1038_v14 = vor.u32 1.1754944e-38, %v1037_v8  ;;  %vm1036_vm7 = vcmp.eq.f32.partialorder %v1035_v12, 8.507059e+37  ;;  %v3626_v59 = vor.u32 %v4298_v56, %v3623_v57  ;;  %v3587_v8 = vld [vmem:[#allocation6 + $0x50] sm:$0xf]  ;;  %v3589_v12 = vld [vmem:[#allocation6 + $0x58] sm:$0xf0]  ;;  %v1300_v46 = vpack.c.bf16 %v1286_v55, %v1286_v55 }
 0x40f   :  { %v855_v3 = vadd.f32 %v854_v1, %v756_v0  ;;  %v3600_v0 = vor.u32 %v4292_v61, %v3597_v62  ;;  %v3613_v1 = vld [vmem:[#allocation8 + $0x40] sm:$0xf] }
 0x411   :  { %4472 = vtanh.f32 %v855_v3  ;;  %v4297_v3 = vld [vmem:[#allocation8 + $0x44] sm:$0xf0]  ;;  %1150 = vmatpush.bf16.msrb.mxu1 %v3600_v0 }
 0x412   :  { %v4471_v4 = vpop.eup %4470 }
 0x413   :  { %v1027_v5 = vmul.f32 %v4471_v4, %v1025_v60  ;;  %vm1032_vm4 = vweird.f32 %v4471_v4  ;;  %v4293_v60 = vld [vmem:[#allocation6 + $0x64] sm:$0xf0] }
 0x414   :  { %vm1033_vm6 = vmor %vm1031_vm5, %vm1032_vm4  ;;  %v3596_v63 = vor.u32 %v4293_v60, %v3595_v58  ;;  %v3575_v60 = vld [vmem:[%s5055_s4 + $0x2] sm:$0x3] }
 0x415   :  { %v1028_v6 = vsub.f32 1.0, %v1027_v5  ;;  %v3614_v5 = vor.u32 %v4297_v3, %v3613_v1  ;;  %v1082_v62 = vperm.slane %v3575_v60, 0 }
 0x416   :  { %1137 = vmatpush.bf16.msrb.mxu0 %v3596_v63 }
 0x417   :  { %v4473_v9 = vpop.eup %4472  ;;  %v1029_v11 = vmul.f32 %v4471_v4, %v1028_v6  ;;  %v3615_v6 = vld [vmem:[#allocation8 + $0x48] sm:$0xf0]  ;;  %1214 = vmatpush.bf16.msrb.mxu2 %v3614_v5 }
 0x418   :  { %859 = vrot.lane.b32.xlu2 %v4473_v9, %s4650_s15  ;;  %v4291_v9 = vld [vmem:[#allocation6 + $0x54] sm:$0xf0] }
 0x419   :  { %v1030_v13 = vadd.f32 %v4471_v4, %v1029_v11  ;;  %v3588_v2 = vor.u32 %v4291_v9, %v3587_v8  ;;  %v4290_v11 = vld [vmem:[#allocation6 + $0x54] sm:$0xf] }
 0x41b   :  { %v1034_v17 = vsel %vm1033_vm6, %v4471_v4, %v1030_v13  ;;  %v4296_v4 = vld [vmem:[#allocation8 + $0x44] sm:$0xf]  ;;  %v3592_v13 = vor.u32 %v4290_v11, %v3589_v12  ;;  %1138 = vmatpush.bf16.msrb.mxu0 %v3588_v2 }
 0x41c   :  { %v1039_v18 = vsel %vm1036_vm7, %v1038_v14, %v1034_v17  ;;  %v3618_v7 = vor.u32 %v4296_v4, %v3615_v6  ;;  %v3579_v14 = vld [vmem:[#allocation6 + $0x40] sm:$0xf] }
 0x41d   :  { %v1041_v19 = vmul.f32 %v1039_v18, %v1018_v15  ;;  %v1044_v40 = vsub.f32 1.0, %v1039_v18  ;;  %v4289_v15 = vld [vmem:[#allocation6 + $0x44] sm:$0xf0]  ;;  %1151 = vmatpush.bf16.msrb.mxu1 %v3592_v13 }
 0x41e   :  { %v3580_v17 = vor.u32 %v4289_v15, %v3579_v14 }
 0x41f   :  { %v1042_v20 = vadd.f32 %v1041_v19, %v943_v16  ;;  %v4288_v16 = vld [vmem:[#allocation6 + $0x44] sm:$0xf] }
 0x420   :  { %1051 = vrot.lane.b32.xlu2 %v4761_v10, %s4650_s15  ;;  %v3642_v10 = vor.u32 %v4302_v30, %v3639_v32  ;;  %1139 = vmatpush.bf16.msrb.mxu0 %v3580_v17 }
 0x421   :  { %4474 = vtanh.f32 %v1042_v20  ;;  %v3682_v20 = vld [vmem:[#allocation8 + $0x30] sm:$0xf] }
 0x422   :  { %1224 = vmatpush.bf16.msrb.mxu3 %v3642_v10  ;;  %v3648_v10 = vld [vmem:[#allocation6] sm:$0xf] }
 0x423   :  { %v3649_v37 = vor.u32 %v4305_v35, %v3648_v10 }
 0x425   :  { %1326 = vmatpush.bf16.msra.mxu0 %v3649_v37 }
 0x426   :  { %1225 = vmatpush.bf16.msrb.mxu3 %v3634_v38  ;;  %v4309_v38 = vld [vmem:[#allocation8 + $0x14] sm:$0xf0] }
 0x427   :  { %v4475_v21 = vpop.eup %4474 }
 0x428   :  { %1046 = vrot.lane.b32.xlu1 %v4475_v21, %s4650_s15  ;;  %v4313_v21 = vld [vmem:[#allocation8 + $0x34] sm:$0xf0] }
 0x429   :  { %v3683_v23 = vor.u32 %v4313_v21, %v3682_v20 }
 0x42a   :  { %1226 = vmatpush.bf16.msrb.mxu3 %v3626_v59  ;;  %v3576_v59 = vld [vmem:[%s5056_s5 + $0x2] sm:$0x3] }
 0x42b   :  { %1398 = vmatpush.bf16.msra.mxu2 %v3683_v23  ;;  %v1160_v61 = vperm.slane %v3576_v59, 0  ;;  %v1161_v20 = vperm.slane %v3576_v59, 1  ;;  %v1083_v23 = vperm.slane %v3575_v60, 1 }
 0x42e   :  { %1227 = vmatpush.bf16.msrb.mxu3 %v3618_v7 }
 0x472   :  { %v860_v24 = vpop.permute.xlu2 %859 }
 0x473   :  { %v862_v26 = vmul.f32 %v860_v24, %v857_v22  ;;  %v4312_v22 = vld [vmem:[#allocation8 + $0x34] sm:$0xf]  ;;  %v3684_v24 = vld [vmem:[#allocation8 + $0x38] sm:$0xf0] }
 0x475   :  { %v868_v27 = vadd.f32 %v867_v25, %v862_v26  ;;  %v3674_v25 = vld [vmem:[#allocation8 + $0x20] sm:$0xf]  ;;  %v4311_v26 = vld [vmem:[#allocation8 + $0x24] sm:$0xf0] }
 0x476   :  { %v3675_v30 = vor.u32 %v4311_v26, %v3674_v25  ;;  %v1298_v26 = vld [vmem:[%s5055_s4] sm:$0x3] }
 0x477   :  { %870 = vrot.lane.b32.xlu0 %v868_v27, %s4650_s15  ;;  %v3687_v27 = vor.u32 %v4312_v22, %v3684_v24  ;;  %v1302_v10 = vperm.slane %v1298_v26, 0 }
 0x478   :  { %1399 = vmatpush.bf16.msra.mxu2 %v3675_v30 }
 0x479   :  { %1411 = vmatpush.bf16.msra.mxu3 %v3687_v27 }
 0x47a   :  { %v1052_v39 = vpop.permute.xlu2 %1051 }
 0x47b   :  { %v1054_v42 = vmul.f32 %v1052_v39, %v1039_v18  ;;  %v3581_v18 = vld [vmem:[#allocation6 + $0x48] sm:$0xf0]  ;;  %v4308_v39 = vld [vmem:[#allocation8 + $0x14] sm:$0xf] }
 0x47c   :  { %v3584_v19 = vor.u32 %v4288_v16, %v3581_v18 }
 0x47d   :  { %1412 = vmatpush.bf16.msra.mxu3 %v3679_v31  ;;  %v1299_v31 = vld [vmem:[%s5056_s5] sm:$0x3] }
 0x47e   :  { %1152 = vmatpush.bf16.msrb.mxu1 %v3584_v19 }
 0x482   :  { %1339 = vmatpush.bf16.msra.mxu1 %v3653_v54  ;;  %v1348_v54 = vperm.slane %v1299_v31, 1 }
 0x49a   :  { %v1047_v41 = vpop.permute.xlu1 %1046 }
 0x49b   :  { %v1049_v43 = vmul.f32 %v1047_v41, %v1044_v40  ;;  %v3668_v40 = vld [vmem:[#allocation8 + $0x18] sm:$0xf0]  ;;  %v3667_v41 = vor.u32 %v4309_v38, %v3666_v36  ;;  %v1347_v36 = vperm.slane %v1299_v31, 0  ;;  %v4320_v31 = vld [vmem:[#allocation6 + $0x74] sm:$0xf] }
 0x49d   :  { %v1055_v44 = vadd.f32 %v1054_v42, %v1049_v43  ;;  %v3671_v42 = vor.u32 %v4308_v39, %v3668_v40  ;;  %v3658_v43 = vld [vmem:[#allocation8] sm:$0xf]  ;;  %1400 = vmatpush.bf16.msra.mxu2 %v3667_v41 }
 0x49f   :  { %1057 = vrot.lane.b32.xlu1 %v1055_v44, %s4650_s15  ;;  %v1080_v45 = vpack.c.bf16 %v1055_v44, %v1055_v44  ;;  %v4307_v44 = vld [vmem:[#allocation8 + $0x4] sm:$0xf0]  ;;  %1413 = vmatpush.bf16.msra.mxu3 %v3671_v42 }
 0x4a0   :  { %v3659_v48 = vor.u32 %v4307_v44, %v3658_v43 }
 0x4a1   :  { %1087 = vrot.lane.b32.xlu2 %v1080_v45, %s4650_s15  ;;  %v4306_v45 = vld [vmem:[#allocation8 + $0x4] sm:$0xf] }
 0x4a2   :  { %v3663_v49 = vor.u32 %v4306_v45, %v3660_v47  ;;  %1401 = vmatpush.bf16.msra.mxu2 %v3659_v48 }
 0x4a4   :  { %1414 = vmatpush.bf16.msra.mxu3 %v3663_v49 }
 0x4e9   :  { %v4788_v32 = vpop.permute.xlu0 %870 }
 0x4ea   :  { %873 = vst.msk [vmem:[#allocation2 + $0x8] sm:$0xff] %vm76_vm0, %v4788_v32 }
 0x4f1   :  { %v1061_v33 = vld [vmem:[#allocation2 + $0x8] sm:$0xff] }
 0x4f2   :  { %v1158_v34 = vpack.c.bf16 %v1061_v33, %v1061_v33  ;;  %1263 = vrot.lane.b32.xlu1 %v1061_v33, %s4650_s15 }
 0x4f4   :  { %3643 = vmatmul.msk.bf16.vlgmr.msrb.gmra.mxu2 %vm76_vm0, %v1158_v34  ;;  %3644 = vmatmul.msk.bf16.vlgmr.msrb.gmra.mxu3 %vm76_vm0, %v1158_v34 }
 0x4fb   :  { %v1088_v50 = vpop.permute.xlu2 %1087 }
 0x4fc   :  { %3609 = vmatmul.msk.bf16.vlgmr.msrb.gmra.mxu0 %vm76_vm0, %v1088_v50  ;;  %3610 = vmatmul.msk.bf16.vlgmr.msrb.gmra.mxu1 %vm76_vm0, %v1088_v50 }
 0x50c   :  { %3654 = vmatmul.msk.bf16.vlgmr.msra.gmra.mxu0 %vm112_vm1, %v1300_v46  ;;  %3655 = vmatmul.msk.bf16.vlgmr.msra.gmra.mxu1 %vm112_vm1, %v1300_v46 }
 0x511   :  { %v1058_v56 = vpop.permute.xlu1 %1057 }
 0x512   :  { %1060 = vst.msk [vmem:[#allocation2] sm:$0xff] %vm76_vm0, %v1058_v56 }
 0x519   :  { %v4800_v57 = vld [vmem:[#allocation2] sm:$0xff] }
 0x51a   :  { %v1345_v58 = vpack.c.bf16 %v4800_v57, %v4800_v57 }
 0x51c   :  { %3688 = vmatmul.msk.bf16.vlgmr.msra.gmra.mxu2 %vm76_vm0, %v1345_v58  ;;  %3689 = vmatmul.msk.bf16.vlgmr.msra.gmra.mxu3 %vm76_vm0, %v1345_v58  ;;  %v1303_v58 = vperm.slane %v1298_v26, 1  ;;  %v3747_v26 = vld [vmem:[#allocation8 + $0x68] sm:$0xf0] }
 0x577   :  { %v1216_v63 = vpop.f32.mrf.mxu2  ;;  %v1229_v0 = vpop.f32.mrf.mxu3 }
 0x578   :  { %v1217_v4 = vadd.f32 %v1216_v63, %v1160_v61  ;;  %v1230_v27 = vadd.f32 %v1229_v0, %v1161_v20 }
 0x579   :  { %v1141_v1 = vpop.f32.mrf.mxu0  ;;  %v1154_v3 = vpop.f32.mrf.mxu1 }
 0x57a   :  { %v1142_v5 = vadd.f32 %v1141_v1, %v1082_v62  ;;  %v1155_v33 = vadd.f32 %v1154_v3, %v1083_v23  ;;  %v4327_v23 = vld [vmem:[#allocation8 + $0x64] sm:$0xf0] }
 0x57c   :  { %v1233_v6 = vadd.f32 %v1217_v4, %v1142_v5  ;;  %v1264_v5 = vpop.permute.xlu1 %1263 }
 0x57e   :  { %v3645_v7 = vmul.f32 -1.442695, %v1233_v6 }
 0x57f   :  { %v1218_v8 = vpop.f32.mrf.mxu2  ;;  %v1231_v9 = vpop.f32.mrf.mxu3 }
 0x580   :  { %4476 = vpow2.f32 %v3645_v7 }
 0x581   :  { %v1143_v2 = vpop.f32.mrf.mxu0  ;;  %v1156_v11 = vpop.f32.mrf.mxu1 }
 0x586   :  { %v4477_v12 = vpop.eup %4476 }
 0x587   :  { %v1237_v13 = vadd.f32 1.0, %v4477_v12 }
 0x589   :  { %4478 = vrcp.f32 %v1237_v13  ;;  %v1328_v14 = vpop.f32.mrf.mxu0  ;;  %v1249_v19 = vand.u32 2147483648, %v1237_v13  ;;  %v1247_v22 = vand.u32 2147483647, %v1237_v13  ;;  %vm1243_vm9 = vweird.f32 %v1237_v13  ;;  %v1341_v29 = vpop.f32.mrf.mxu1 }
 0x58a   :  { %v1329_v37 = vadd.f32 %v1328_v14, %v1302_v10  ;;  %v1342_v63 = vadd.f32 %v1341_v29, %v1303_v58  ;;  %v3719_v29 = vld [vmem:[#allocation6 + $0x70] sm:$0xf]  ;;  %v4316_v58 = vld [vmem:[#allocation6 + $0x54] sm:$0xf] }
 0x58b   :  { %v1250_v25 = vor.u32 1.1754944e-38, %v1249_v19  ;;  %vm1248_vm11 = vcmp.eq.f32.partialorder %v1247_v22, 8.507059e+37  ;;  %v4328_v19 = vld [vmem:[#allocation8 + $0x74] sm:$0xf]  ;;  %v3745_v22 = vld [vmem:[#allocation8 + $0x60] sm:$0xf] }
 0x58c   :  { %v3737_v10 = vld [vmem:[#allocation8 + $0x50] sm:$0xf] }
 0x58f   :  { %v4479_v15 = vpop.eup %4478 }
 0x590   :  { %v1239_v16 = vmul.f32 %v4479_v15, %v1237_v13  ;;  %vm1244_vm8 = vweird.f32 %v4479_v15 }
 0x591   :  { %v1330_v17 = vpop.f32.mrf.mxu0  ;;  %vm1245_vm10 = vmor %vm1243_vm9, %vm1244_vm8  ;;  %v1343_v41 = vpop.f32.mrf.mxu1 }
 0x592   :  { %v1240_v18 = vsub.f32 1.0, %v1239_v16  ;;  %v3753_v17 = vld [vmem:[#allocation8 + $0x70] sm:$0xf] }
 0x594   :  { %v1241_v21 = vmul.f32 %v4479_v15, %v1240_v18  ;;  %v4329_v18 = vld [vmem:[#allocation8 + $0x74] sm:$0xf0] }
 0x595   :  { %v3754_v20 = vor.u32 %v4329_v18, %v3753_v17  ;;  %v3782_v17 = vld [vmem:[#allocation8 + $0x10] sm:$0xf] }
 0x596   :  { %v1242_v24 = vadd.f32 %v4479_v15, %v1241_v21  ;;  %v3755_v21 = vld [vmem:[#allocation8 + $0x78] sm:$0xf0] }
 0x597   :  { %1610 = vmatpush.bf16.msrb.mxu2 %v3754_v20  ;;  %v4334_v20 = vld [vmem:[#allocation8 + $0x14] sm:$0xf] }
 0x598   :  { %v1246_v28 = vsel %vm1245_vm10, %v4479_v15, %v1242_v24  ;;  %v3758_v24 = vor.u32 %v4328_v19, %v3755_v21  ;;  %v4335_v19 = vld [vmem:[#allocation8 + $0x14] sm:$0xf0]  ;;  %v3784_v21 = vld [vmem:[#allocation8 + $0x18] sm:$0xf0] }
 0x599   :  { %v1251_v30 = vsel %vm1248_vm11, %v1250_v25, %v1246_v28  ;;  %v4326_v25 = vld [vmem:[#allocation8 + $0x64] sm:$0xf] }
 0x59a   :  { %v1253_v34 = vmul.f32 %v1251_v30, %v1230_v27  ;;  %v1256_v4 = vsub.f32 1.0, %v1251_v30  ;;  %v1266_v7 = vmul.f32 %v1264_v5, %v1251_v30  ;;  %v3746_v27 = vor.u32 %v4327_v23, %v3745_v22  ;;  %1623 = vmatpush.bf16.msrb.mxu3 %v3758_v24  ;;  %v4321_v30 = vld [vmem:[#allocation6 + $0x74] sm:$0xf0]  ;;  %v3774_v24 = vld [vmem:[#allocation8] sm:$0xf] }
 0x59b   :  { %v3750_v28 = vor.u32 %v4326_v25, %v3747_v26  ;;  %v3783_v22 = vor.u32 %v4335_v19, %v3782_v17  ;;  %v3787_v23 = vor.u32 %v4334_v20, %v3784_v21  ;;  %v4333_v25 = vld [vmem:[#allocation8 + $0x4] sm:$0xf0]  ;;  %v4332_v26 = vld [vmem:[#allocation8 + $0x4] sm:$0xf] }
 0x59c   :  { %v1254_v35 = vadd.f32 %v1253_v34, %v1155_v33  ;;  %1611 = vmatpush.bf16.msrb.mxu2 %v3746_v27  ;;  %v3720_v33 = vor.u32 %v4321_v30, %v3719_v29  ;;  %v3721_v34 = vld [vmem:[#allocation6 + $0x78] sm:$0xf0]  ;;  %v3776_v27 = vld [vmem:[#allocation8 + $0x8] sm:$0xf0] }
 0x59d   :  { %v3779_v30 = vor.u32 %v4332_v26, %v3776_v27 }
 0x59e   :  { %4480 = vtanh.f32 %v1254_v35  ;;  %1624 = vmatpush.bf16.msrb.mxu3 %v3750_v28  ;;  %v4325_v35 = vld [vmem:[#allocation8 + $0x54] sm:$0xf0]  ;;  %1535 = vmatpush.bf16.msrb.mxu0 %v3720_v33  ;;  %v3775_v28 = vor.u32 %v4333_v25, %v3774_v24  ;;  %v4330_v33 = vld [vmem:[#allocation6 + $0x4] sm:$0xf] }
 0x59f   :  { %v1403_v38 = vpop.f32.mrf.mxu2  ;;  %v1416_v39 = vpop.f32.mrf.mxu3 }
 0x5a0   :  { %v1404_v40 = vadd.f32 %v1403_v38, %v1347_v36  ;;  %v1417_v61 = vadd.f32 %v1416_v39, %v1348_v54  ;;  %v3724_v36 = vor.u32 %v4320_v31, %v3721_v34  ;;  %v4324_v38 = vld [vmem:[#allocation8 + $0x54] sm:$0xf]  ;;  %v3739_v39 = vld [vmem:[#allocation8 + $0x58] sm:$0xf0]  ;;  %v3703_v54 = vld [vmem:[#allocation6 + $0x50] sm:$0xf] }
 0x5a1   :  { %v3742_v41 = vor.u32 %v4324_v38, %v3739_v39  ;;  %v3766_v34 = vld [vmem:[#allocation6 + $0x8] sm:$0xf0] }
 0x5a2   :  { %v1420_v42 = vadd.f32 %v1404_v40, %v1329_v37  ;;  %v3738_v37 = vor.u32 %v4325_v35, %v3737_v10  ;;  %v3711_v40 = vld [vmem:[#allocation6 + $0x60] sm:$0xf]  ;;  %1548 = vmatpush.bf16.msrb.mxu1 %v3724_v36  ;;  %v3769_v10 = vor.u32 %v4330_v33, %v3766_v34 }
 0x5a3   :  { %1625 = vmatpush.bf16.msrb.mxu3 %v3742_v41 }
 0x5a4   :  { %v4481_v43 = vpop.eup %4480  ;;  %v3690_v44 = vmul.f32 -1.442695, %v1420_v42  ;;  %v4319_v42 = vld [vmem:[#allocation6 + $0x64] sm:$0xf0]  ;;  %1612 = vmatpush.bf16.msrb.mxu2 %v3738_v37 }
 0x5a5   :  { %1258 = vrot.lane.b32.xlu0 %v4481_v43, %s4650_s15  ;;  %v4318_v43 = vld [vmem:[#allocation6 + $0x64] sm:$0xf] }
 0x5a6   :  { %4482 = vpow2.f32 %v3690_v44  ;;  %v3713_v44 = vld [vmem:[#allocation6 + $0x68] sm:$0xf0] }
 0x5a7   :  { %v1405_v45 = vpop.f32.mrf.mxu2  ;;  %v1418_v47 = vpop.f32.mrf.mxu3 }
 0x5a8   :  { %v3712_v45 = vor.u32 %v4319_v42, %v3711_v40  ;;  %v3716_v47 = vor.u32 %v4318_v43, %v3713_v44  ;;  %v1685_v40 = vld [vmem:[#allocation3 + $0x20] sm:$0xff]  ;;  %v3691_v42 = vld [vmem:[%s5055_s4 + $0x2] sm:$0x3] }
 0x5a9   :  { %v1699_v41 = vpack.c.bf16 %v1685_v40, %v1685_v40  ;;  %v3692_v43 = vld [vmem:[%s5056_s5 + $0x2] sm:$0x3]  ;;  %v1481_v44 = vperm.slane %v3691_v42, 0 }
 0x5aa   :  { %1536 = vmatpush.bf16.msrb.mxu0 %v3712_v45  ;;  %1549 = vmatpush.bf16.msrb.mxu1 %v3716_v47  ;;  %v1559_v45 = vperm.slane %v3692_v43, 0 }
 0x5ac   :  { %v4483_v48 = vpop.eup %4482 }
 0x5ad   :  { %v1424_v49 = vadd.f32 1.0, %v4483_v48  ;;  %1450 = vrot.lane.b32.xlu0 %v4800_v57, %s4650_s15  ;;  %v3729_v48 = vld [vmem:[#allocation8 + $0x40] sm:$0xf] }
 0x5af   :  { %4484 = vrcp.f32 %v1424_v49  ;;  %v1436_v55 = vand.u32 2147483648, %v1424_v49  ;;  %v1434_v56 = vand.u32 2147483647, %v1424_v49  ;;  %vm1430_vm13 = vweird.f32 %v1424_v49 }
 0x5b1   :  { %v1437_v60 = vor.u32 1.1754944e-38, %v1436_v55  ;;  %vm1435_vm15 = vcmp.eq.f32.partialorder %v1434_v56, 8.507059e+37  ;;  %v4317_v55 = vld [vmem:[#allocation6 + $0x54] sm:$0xf0] }
 0x5b2   :  { %v3704_v56 = vor.u32 %v4317_v55, %v3703_v54 }
 0x5b4   :  { %1537 = vmatpush.bf16.msrb.mxu0 %v3704_v56 }
 0x5b5   :  { %v4485_v50 = vpop.eup %4484 }
 0x5b6   :  { %v1426_v51 = vmul.f32 %v4485_v50, %v1424_v49  ;;  %vm1431_vm12 = vweird.f32 %v4485_v50  ;;  %v4323_v49 = vld [vmem:[#allocation8 + $0x44] sm:$0xf0] }
 0x5b7   :  { %vm1432_vm14 = vmor %vm1430_vm13, %vm1431_vm12 }
 0x5b8   :  { %v1427_v53 = vsub.f32 1.0, %v1426_v51  ;;  %v3730_v51 = vor.u32 %v4323_v49, %v3729_v48 }
 0x5ba   :  { %v1428_v46 = vmul.f32 %v4485_v50, %v1427_v53  ;;  %v3731_v53 = vld [vmem:[#allocation8 + $0x48] sm:$0xf0]  ;;  %1613 = vmatpush.bf16.msrb.mxu2 %v3730_v51 }
 0x5bc   :  { %v1429_v59 = vadd.f32 %v4485_v50, %v1428_v46 }
 0x5be   :  { %v1433_v62 = vsel %vm1432_vm14, %v4485_v50, %v1429_v59  ;;  %v4322_v50 = vld [vmem:[#allocation8 + $0x44] sm:$0xf]  ;;  %v3705_v59 = vld [vmem:[#allocation6 + $0x58] sm:$0xf0] }
 0x5bf   :  { %v1438_v0 = vsel %vm1435_vm15, %v1437_v60, %v1433_v62  ;;  %v3734_v46 = vor.u32 %v4322_v50, %v3731_v53  ;;  %v3708_v60 = vor.u32 %v4316_v58, %v3705_v59  ;;  %v4339_v62 = vld [vmem:[#allocation8 + $0x34] sm:$0xf0] }
 0x5c0   :  { %v1440_v57 = vmul.f32 %v1438_v0, %v1417_v61  ;;  %v1443_v11 = vsub.f32 1.0, %v1438_v0  ;;  %v3798_v61 = vld [vmem:[#allocation8 + $0x30] sm:$0xf] }
 0x5c1   :  { %1626 = vmatpush.bf16.msrb.mxu3 %v3734_v46  ;;  %1550 = vmatpush.bf16.msrb.mxu1 %v3708_v60  ;;  %v4852_v60 = vld [vmem:[%s5055_s4] sm:$0x3] }
 0x5c2   :  { %v1441_v1 = vadd.f32 %v1440_v57, %v1342_v63  ;;  %v4338_v63 = vld [vmem:[#allocation8 + $0x34] sm:$0xf]  ;;  %v3800_v57 = vld [vmem:[#allocation8 + $0x38] sm:$0xf0] }
 0x5c4   :  { %4486 = vtanh.f32 %v1441_v1  ;;  %v3695_v1 = vld [vmem:[#allocation6 + $0x40] sm:$0xf] }
 0x5ca   :  { %v4487_v3 = vpop.eup %4486 }
 0x5cb   :  { %1445 = vrot.lane.b32.xlu2 %v4487_v3, %s4650_s15  ;;  %v4315_v3 = vld [vmem:[#allocation6 + $0x44] sm:$0xf0] }
 0x5cc   :  { %v3696_v5 = vor.u32 %v4315_v3, %v3695_v1 }
 0x5ce   :  { %1538 = vmatpush.bf16.msrb.mxu0 %v3696_v5 }
 0x617   :  { %v1259_v6 = vpop.permute.xlu0 %1258 }
 0x618   :  { %v1261_v8 = vmul.f32 %v1259_v6, %v1256_v4  ;;  %v3803_v4 = vor.u32 %v4338_v63, %v3800_v57  ;;  %v4314_v6 = vld [vmem:[#allocation6 + $0x44] sm:$0xf]  ;;  %v1701_v63 = vperm.slane %v4852_v60, 0 }
 0x61a   :  { %v1267_v9 = vadd.f32 %v1266_v7, %v1261_v8  ;;  %v3697_v7 = vld [vmem:[#allocation6 + $0x48] sm:$0xf0]  ;;  %v3790_v8 = vld [vmem:[#allocation8 + $0x20] sm:$0xf]  ;;  %1810 = vmatpush.bf16.msra.mxu3 %v3803_v4 }
 0x61c   :  { %1269 = vrot.lane.b32.xlu1 %v1267_v9, %s4650_s15  ;;  %v3700_v9 = vor.u32 %v4314_v6, %v3697_v7 }
 0x61e   :  { %1551 = vmatpush.bf16.msrb.mxu1 %v3700_v9 }
 0x61f   :  { %v1451_v2 = vpop.permute.xlu0 %1450 }
 0x620   :  { %v1453_v13 = vmul.f32 %v1451_v2, %v1438_v0  ;;  %v3799_v0 = vor.u32 %v4339_v62, %v3798_v61  ;;  %v4337_v2 = vld [vmem:[#allocation8 + $0x24] sm:$0xf0]  ;;  %v1698_v61 = vld [vmem:[%s5056_s5] sm:$0x3] }
 0x622   :  { %1797 = vmatpush.bf16.msra.mxu2 %v3799_v0  ;;  %1738 = vmatpush.bf16.msra.mxu1 %v3769_v10  ;;  %v1746_v0 = vperm.slane %v1698_v61, 0 }
 0x625   :  { %v1446_v12 = vpop.permute.xlu2 %1445 }
 0x626   :  { %v1448_v14 = vmul.f32 %v1446_v12, %v1443_v11  ;;  %v4336_v11 = vld [vmem:[#allocation8 + $0x24] sm:$0xf]  ;;  %v3792_v12 = vld [vmem:[#allocation8 + $0x28] sm:$0xf0] }
 0x628   :  { %v1454_v15 = vadd.f32 %v1453_v13, %v1448_v14  ;;  %v3791_v13 = vor.u32 %v4337_v2, %v3790_v8  ;;  %v3795_v14 = vor.u32 %v4336_v11, %v3792_v12 }
 0x62a   :  { %1456 = vrot.lane.b32.xlu2 %v1454_v15, %s4650_s15  ;;  %v1479_v16 = vpack.c.bf16 %v1454_v15, %v1454_v15  ;;  %1798 = vmatpush.bf16.msra.mxu2 %v3791_v13  ;;  %v3764_v15 = vld [vmem:[#allocation6] sm:$0xf] }
 0x62b   :  { %1811 = vmatpush.bf16.msra.mxu3 %v3795_v14 }
 0x62c   :  { %1486 = vrot.lane.b32.xlu0 %v1479_v16, %s4650_s15  ;;  %v4331_v16 = vld [vmem:[#allocation6 + $0x4] sm:$0xf0] }
 0x62d   :  { %v3765_v18 = vor.u32 %v4331_v16, %v3764_v15 }
 0x62e   :  { %1799 = vmatpush.bf16.msra.mxu2 %v3783_v22  ;;  %v1482_v22 = vperm.slane %v3691_v42, 1  ;;  %v1702_v42 = vperm.slane %v4852_v60, 1  ;;  %v4353_v60 = vld [vmem:[#allocation8 + $0x64] sm:$0xf0] }
 0x62f   :  { %1725 = vmatpush.bf16.msra.mxu0 %v3765_v18  ;;  %1812 = vmatpush.bf16.msra.mxu3 %v3787_v23  ;;  %v1560_v18 = vperm.slane %v3692_v43, 1 }
 0x632   :  { %1800 = vmatpush.bf16.msra.mxu2 %v3775_v28 }
 0x633   :  { %1813 = vmatpush.bf16.msra.mxu3 %v3779_v30 }
 0x684   :  { %v1457_v29 = vpop.permute.xlu2 %1456 }
 0x685   :  { %1459 = vst.msk [vmem:[#allocation2] sm:$0xff] %vm76_vm0, %v1457_v29 }
 0x68c   :  { %v4835_v38 = vld [vmem:[#allocation2] sm:$0xff] }
 0x68d   :  { %v1744_v39 = vpack.c.bf16 %v4835_v38, %v4835_v38 }
 0x68e   :  { %v4826_v31 = vpop.permute.xlu1 %1269 }
 0x68f   :  { %1272 = vst.msk [vmem:[#allocation2 + $0x8] sm:$0xff] %vm76_vm0, %v4826_v31 }
 0x696   :  { %v1460_v35 = vld [vmem:[#allocation2 + $0x8] sm:$0xff] }
 0x697   :  { %v1557_v36 = vpack.c.bf16 %v1460_v35, %v1460_v35  ;;  %1662 = vrot.lane.b32.xlu2 %v1460_v35, %s4650_s15 }
 0x699   :  { %3759 = vmatmul.msk.bf16.vlgmr.msrb.gmra.mxu2 %vm76_vm0, %v1557_v36  ;;  %3760 = vmatmul.msk.bf16.vlgmr.msrb.gmra.mxu3 %vm76_vm0, %v1557_v36  ;;  %v1747_v36 = vperm.slane %v1698_v61, 1 }
 0x69e   :  { %v1487_v37 = vpop.permute.xlu0 %1486 }
 0x69f   :  { %3725 = vmatmul.msk.bf16.vlgmr.msrb.gmra.mxu0 %vm76_vm0, %v1487_v37  ;;  %3726 = vmatmul.msk.bf16.vlgmr.msrb.gmra.mxu1 %vm76_vm0, %v1487_v37 }
 0x6a9   :  { %3804 = vmatmul.msk.bf16.vlgmr.msra.gmra.mxu2 %vm76_vm0, %v1744_v39  ;;  %3805 = vmatmul.msk.bf16.vlgmr.msra.gmra.mxu3 %vm76_vm0, %v1744_v39 }
 0x6af   :  { %3770 = vmatmul.msk.bf16.vlgmr.msra.gmra.mxu0 %vm112_vm1, %v1699_v41  ;;  %3771 = vmatmul.msk.bf16.vlgmr.msra.gmra.mxu1 %vm112_vm1, %v1699_v41 }
 0x71c   :  { %v1540_v47 = vpop.f32.mrf.mxu0  ;;  %v1553_v48 = vpop.f32.mrf.mxu1 }
 0x71d   :  { %v1541_v49 = vadd.f32 %v1540_v47, %v1481_v44  ;;  %v1615_v50 = vpop.f32.mrf.mxu2  ;;  %v1628_v51 = vpop.f32.mrf.mxu3  ;;  %v1554_v29 = vadd.f32 %v1553_v48, %v1482_v22  ;;  %v4348_v22 = vld [vmem:[#allocation8 + $0x44] sm:$0xf] }
 0x71e   :  { %v1616_v53 = vadd.f32 %v1615_v50, %v1559_v45  ;;  %v1629_v26 = vadd.f32 %v1628_v51, %v1560_v18  ;;  %v3855_v18 = vld [vmem:[#allocation8 + $0x58] sm:$0xf0] }
 0x720   :  { %v1632_v54 = vadd.f32 %v1616_v53, %v1541_v49 }
 0x722   :  { %v3761_v55 = vmul.f32 -1.442695, %v1632_v54  ;;  %v3869_v54 = vld [vmem:[#allocation8 + $0x70] sm:$0xf] }
 0x724   :  { %4488 = vpow2.f32 %v3761_v55  ;;  %v1542_v46 = vpop.f32.mrf.mxu0  ;;  %v1555_v56 = vpop.f32.mrf.mxu1  ;;  %v4355_v55 = vld [vmem:[#allocation8 + $0x74] sm:$0xf0] }
 0x725   :  { %v1617_v58 = vpop.f32.mrf.mxu2  ;;  %v1630_v59 = vpop.f32.mrf.mxu3  ;;  %v4354_v46 = vld [vmem:[#allocation8 + $0x74] sm:$0xf]  ;;  %v3870_v56 = vor.u32 %v4355_v55, %v3869_v54  ;;  %v4363_v54 = vld [vmem:[#allocation8 + $0x24] sm:$0xf0]  ;;  %v4362_v55 = vld [vmem:[#allocation8 + $0x24] sm:$0xf] }
 0x726   :  { %v3871_v58 = vld [vmem:[#allocation8 + $0x78] sm:$0xf0]  ;;  %v3861_v59 = vld [vmem:[#allocation8 + $0x60] sm:$0xf] }
 0x727   :  { %v3874_v61 = vor.u32 %v4354_v46, %v3871_v58  ;;  %2009 = vmatpush.bf16.msrb.mxu2 %v3870_v56  ;;  %v3908_v46 = vld [vmem:[#allocation8 + $0x28] sm:$0xf0]  ;;  %v3811_v58 = vld [vmem:[#allocation6 + $0x40] sm:$0xf] }
 0x729   :  { %2022 = vmatpush.bf16.msrb.mxu3 %v3874_v61  ;;  %v3911_v61 = vor.u32 %v4362_v55, %v3908_v46 }
 0x72a   :  { %v4489_v62 = vpop.eup %4488 }
 0x72b   :  { %v1636_v57 = vadd.f32 1.0, %v4489_v62  ;;  %v4352_v62 = vld [vmem:[#allocation8 + $0x64] sm:$0xf] }
 0x72c   :  { %v1727_v1 = vpop.f32.mrf.mxu0  ;;  %v1740_v3 = vpop.f32.mrf.mxu1 }
 0x72d   :  { %4490 = vrcp.f32 %v1636_v57  ;;  %v1802_v4 = vpop.f32.mrf.mxu2  ;;  %v1815_v5 = vpop.f32.mrf.mxu3  ;;  %v1728_v6 = vadd.f32 %v1727_v1, %v1701_v63  ;;  %v1648_v17 = vand.u32 2147483648, %v1636_v57  ;;  %v1646_v20 = vand.u32 2147483647, %v1636_v57  ;;  %v3863_v63 = vld [vmem:[#allocation8 + $0x68] sm:$0xf0] }
 0x72e   :  { %v1803_v7 = vadd.f32 %v1802_v4, %v1746_v0  ;;  %vm1642_vm3 = vweird.f32 %v1636_v57  ;;  %v1816_v45 = vadd.f32 %v1815_v5, %v1747_v36  ;;  %v1741_v48 = vadd.f32 %v1740_v3, %v1702_v42  ;;  %v1663_v1 = vpop.permute.xlu2 %1662  ;;  %v3829_v36 = vld [vmem:[#allocation6 + $0x68] sm:$0xf0]  ;;  %v3914_v42 = vld [vmem:[#allocation8 + $0x30] sm:$0xf] }
 0x72f   :  { %v1649_v24 = vor.u32 1.1754944e-38, %v1648_v17  ;;  %vm1647_vm5 = vcmp.eq.f32.partialorder %v1646_v20, 8.507059e+37  ;;  %v3862_v0 = vor.u32 %v4353_v60, %v3861_v59  ;;  %v4349_v20 = vld [vmem:[#allocation8 + $0x44] sm:$0xf0] }
 0x730   :  { %v1819_v8 = vadd.f32 %v1803_v7, %v1728_v6  ;;  %v4341_v59 = vld [vmem:[#allocation6 + $0x44] sm:$0xf0] }
 0x731   :  { %2010 = vmatpush.bf16.msrb.mxu2 %v3862_v0  ;;  %v3812_v0 = vor.u32 %v4341_v59, %v3811_v58 }
 0x732   :  { %v3806_v9 = vmul.f32 -1.442695, %v1819_v8 }
 0x733   :  { %v4491_v2 = vpop.eup %4490 }
 0x734   :  { %v1638_v11 = vmul.f32 %v4491_v2, %v1636_v57  ;;  %4492 = vpow2.f32 %v3806_v9  ;;  %v1729_v12 = vpop.f32.mrf.mxu0  ;;  %v1742_v13 = vpop.f32.mrf.mxu1  ;;  %vm1643_vm2 = vweird.f32 %v4491_v2  ;;  %v3866_v57 = vor.u32 %v4352_v62, %v3863_v63  ;;  %v4340_v62 = vld [vmem:[#allocation6 + $0x44] sm:$0xf]  ;;  %v3813_v63 = vld [vmem:[#allocation6 + $0x48] sm:$0xf0] }
 0x735   :  { %v1804_v14 = vpop.f32.mrf.mxu2  ;;  %v1817_v15 = vpop.f32.mrf.mxu3  ;;  %vm1644_vm4 = vmor %vm1642_vm3, %vm1643_vm2 }
 0x736   :  { %v1639_v16 = vsub.f32 1.0, %v1638_v11  ;;  %2023 = vmatpush.bf16.msrb.mxu3 %v3866_v57  ;;  %v3853_v14 = vld [vmem:[#allocation8 + $0x50] sm:$0xf]  ;;  %v4351_v15 = vld [vmem:[#allocation8 + $0x54] sm:$0xf0]  ;;  %v3816_v57 = vor.u32 %v4340_v62, %v3813_v63 }
 0x737   :  { %v3854_v17 = vor.u32 %v4351_v15, %v3853_v14  ;;  %v4359_v14 = vld [vmem:[#allocation8 + $0x4] sm:$0xf0]  ;;  %v4358_v15 = vld [vmem:[#allocation8 + $0x4] sm:$0xf] }
 0x738   :  { %v1640_v19 = vmul.f32 %v4491_v2, %v1639_v16  ;;  %v4350_v16 = vld [vmem:[#allocation8 + $0x54] sm:$0xf] }
 0x739   :  { %2011 = vmatpush.bf16.msrb.mxu2 %v3854_v17  ;;  %v3892_v17 = vld [vmem:[#allocation8 + $0x8] sm:$0xf0] }
 0x73a   :  { %v4493_v21 = vpop.eup %4492  ;;  %v1641_v23 = vadd.f32 %v4491_v2, %v1640_v19  ;;  %v3845_v19 = vld [vmem:[#allocation8 + $0x40] sm:$0xf] }
 0x73b   :  { %v1823_v25 = vadd.f32 1.0, %v4493_v21  ;;  %v3858_v21 = vor.u32 %v4350_v16, %v3855_v18  ;;  %v3895_v18 = vor.u32 %v4358_v15, %v3892_v17 }
 0x73c   :  { %v1645_v27 = vsel %vm1644_vm4, %v4491_v2, %v1641_v23  ;;  %v3847_v23 = vld [vmem:[#allocation8 + $0x48] sm:$0xf0] }
 0x73d   :  { %v1650_v28 = vsel %vm1647_vm5, %v1649_v24, %v1645_v27  ;;  %4494 = vrcp.f32 %v1823_v25  ;;  %v1835_v37 = vand.u32 2147483648, %v1823_v25  ;;  %v1833_v41 = vand.u32 2147483647, %v1823_v25  ;;  %2024 = vmatpush.bf16.msrb.mxu3 %v3858_v21  ;;  %v4347_v27 = vld [vmem:[#allocation6 + $0x74] sm:$0xf0] }
 0x73e   :  { %v1652_v30 = vmul.f32 %v1650_v28, %v1629_v26  ;;  %vm1829_vm7 = vweird.f32 %v1823_v25  ;;  %v1665_v4 = vmul.f32 %v1663_v1, %v1650_v28  ;;  %v3846_v24 = vor.u32 %v4349_v20, %v3845_v19  ;;  %v3835_v26 = vld [vmem:[#allocation6 + $0x70] sm:$0xf]  ;;  %v4356_v19 = vld [vmem:[#allocation6 + $0x4] sm:$0xf]  ;;  %v3882_v20 = vld [vmem:[#allocation6 + $0x8] sm:$0xf0] }
 0x73f   :  { %v1836_v44 = vor.u32 1.1754944e-38, %v1835_v37  ;;  %vm1834_vm9 = vcmp.eq.f32.partialorder %v1833_v41, 8.507059e+37  ;;  %v3885_v21 = vor.u32 %v4356_v19, %v3882_v20 }
 0x740   :  { %v1653_v33 = vadd.f32 %v1652_v30, %v1554_v29  ;;  %2012 = vmatpush.bf16.msrb.mxu2 %v3846_v24  ;;  %v3836_v29 = vor.u32 %v4347_v27, %v3835_v26  ;;  %v3837_v30 = vld [vmem:[#allocation6 + $0x78] sm:$0xf0]  ;;  %v2084_v26 = vld [vmem:[#allocation3 + $0x28] sm:$0xff] }
 0x741   :  { %v2098_v27 = vpack.c.bf16 %v2084_v26, %v2084_v26 }
 0x742   :  { %4496 = vtanh.f32 %v1653_v33  ;;  %v3827_v33 = vld [vmem:[#allocation6 + $0x60] sm:$0xf]  ;;  %1934 = vmatpush.bf16.msrb.mxu0 %v3836_v29 }
 0x743   :  { %v4495_v34 = vpop.eup %4494 }
 0x744   :  { %v1825_v10 = vmul.f32 %v4495_v34, %v1823_v25  ;;  %vm1830_vm6 = vweird.f32 %v4495_v34  ;;  %v3850_v25 = vor.u32 %v4348_v22, %v3847_v23 }
 0x745   :  { %vm1831_vm8 = vmor %vm1829_vm7, %vm1830_vm6 }
 0x746   :  { %v1826_v35 = vsub.f32 1.0, %v1825_v10  ;;  %2025 = vmatpush.bf16.msrb.mxu3 %v3850_v25 }
 0x748   :  { %v4497_v39 = vpop.eup %4496  ;;  %v1827_v40 = vmul.f32 %v4495_v34, %v1826_v35  ;;  %v4344_v35 = vld [vmem:[#allocation6 + $0x64] sm:$0xf] }
 0x749   :  { %1657 = vrot.lane.b32.xlu1 %v4497_v39, %s4650_s15  ;;  %v3819_v39 = vld [vmem:[#allocation6 + $0x50] sm:$0xf]  ;;  %v3832_v41 = vor.u32 %v4344_v35, %v3829_v36 }
 0x74a   :  { %v1828_v43 = vadd.f32 %v4495_v34, %v1827_v40  ;;  %v4343_v40 = vld [vmem:[#allocation6 + $0x54] sm:$0xf0] }
 0x74c   :  { %v1832_v47 = vsel %vm1831_vm8, %v4495_v34, %v1828_v43  ;;  %v4345_v34 = vld [vmem:[#allocation6 + $0x64] sm:$0xf0]  ;;  %v4365_v43 = vld [vmem:[#allocation8 + $0x34] sm:$0xf0] }
 0x74d   :  { %v1837_v49 = vsel %vm1834_vm9, %v1836_v44, %v1832_v47  ;;  %v3828_v37 = vor.u32 %v4345_v34, %v3827_v33  ;;  %v4364_v44 = vld [vmem:[#allocation8 + $0x34] sm:$0xf]  ;;  %v3821_v47 = vld [vmem:[#allocation6 + $0x58] sm:$0xf0]  ;;  %v3808_v34 = vld [vmem:[%s5056_s5 + $0x2] sm:$0x3] }
 0x74e   :  { %v1839_v50 = vmul.f32 %v1837_v49, %v1816_v45  ;;  %v1842_v8 = vsub.f32 1.0, %v1837_v49  ;;  %v4342_v45 = vld [vmem:[#allocation6 + $0x54] sm:$0xf]  ;;  %v1958_v35 = vperm.slane %v3808_v34, 0 }
 0x74f   :  { %1935 = vmatpush.bf16.msrb.mxu0 %v3828_v37  ;;  %v3824_v56 = vor.u32 %v4342_v45, %v3821_v47  ;;  %v2097_v47 = vld [vmem:[%s5056_s5] sm:$0x3] }
 0x750   :  { %v1840_v51 = vadd.f32 %v1839_v50, %v1741_v48  ;;  %v3915_v48 = vor.u32 %v4365_v43, %v3914_v42 }
 0x751   :  { %1849 = vrot.lane.b32.xlu1 %v4835_v38, %s4650_s15  ;;  %v1655_v38 = vsub.f32 1.0, %v1650_v28  ;;  %v4346_v28 = vld [vmem:[#allocation6 + $0x74] sm:$0xf] }
 0x752   :  { %4498 = vtanh.f32 %v1840_v51  ;;  %v3840_v10 = vor.u32 %v4346_v28, %v3837_v30  ;;  %v3906_v51 = vld [vmem:[#allocation8 + $0x20] sm:$0xf]  ;;  %2196 = vmatpush.bf16.msra.mxu2 %v3915_v48  ;;  %v2096_v48 = vld [vmem:[%s5055_s4] sm:$0x3] }
 0x753   :  { %v3907_v60 = vor.u32 %v4363_v54, %v3906_v51  ;;  %v2100_v51 = vperm.slane %v2096_v48, 0 }
 0x754   :  { %1947 = vmatpush.bf16.msrb.mxu1 %v3840_v10  ;;  %v3807_v10 = vld [vmem:[%s5055_s4 + $0x2] sm:$0x3] }
 0x755   :  { %v1880_v36 = vperm.slane %v3807_v10, 0 }
 0x756   :  { %2197 = vmatpush.bf16.msra.mxu2 %v3907_v60 }
 0x758   :  { %v4499_v53 = vpop.eup %4498  ;;  %1948 = vmatpush.bf16.msrb.mxu1 %v3832_v41 }
 0x759   :  { %1844 = vrot.lane.b32.xlu0 %v4499_v53, %s4650_s15  ;;  %v3820_v53 = vor.u32 %v4343_v40, %v3819_v39 }
 0x75b   :  { %1936 = vmatpush.bf16.msrb.mxu0 %v3820_v53 }
 0x75c   :  { %1949 = vmatpush.bf16.msrb.mxu1 %v3824_v56 }
 0x75f   :  { %1937 = vmatpush.bf16.msrb.mxu0 %v3812_v0 }
 0x760   :  { %1950 = vmatpush.bf16.msrb.mxu1 %v3816_v57 }
 0x764   :  { %2137 = vmatpush.bf16.msra.mxu1 %v3885_v21 }
 0x7bb   :  { %v1658_v3 = vpop.permute.xlu1 %1657 }
 0x7bc   :  { %v1660_v5 = vmul.f32 %v1658_v3, %v1655_v38 }
 0x7be   :  { %v1666_v6 = vadd.f32 %v1665_v4, %v1660_v5  ;;  %v3898_v4 = vld [vmem:[#allocation8 + $0x10] sm:$0xf]  ;;  %v4361_v5 = vld [vmem:[#allocation8 + $0x14] sm:$0xf0] }
 0x7c0   :  { %1668 = vrot.lane.b32.xlu2 %v1666_v6, %s4650_s15  ;;  %v4360_v6 = vld [vmem:[#allocation8 + $0x14] sm:$0xf] }
 0x7c3   :  { %v1850_v7 = vpop.permute.xlu1 %1849 }
 0x7c4   :  { %v1852_v2 = vmul.f32 %v1850_v7, %v1837_v49  ;;  %v3916_v49 = vld [vmem:[#allocation8 + $0x38] sm:$0xf0]  ;;  %v3880_v7 = vld [vmem:[#allocation6] sm:$0xf] }
 0x7c5   :  { %v3919_v50 = vor.u32 %v4364_v44, %v3916_v49 }
 0x7c7   :  { %2209 = vmatpush.bf16.msra.mxu3 %v3919_v50  ;;  %v2145_v50 = vperm.slane %v2097_v47, 0 }
 0x7cb   :  { %v1845_v9 = vpop.permute.xlu0 %1844  ;;  %2210 = vmatpush.bf16.msra.mxu3 %v3911_v61 }
 0x7cc   :  { %v1847_v11 = vmul.f32 %v1845_v9, %v1842_v8  ;;  %v4357_v8 = vld [vmem:[#allocation6 + $0x4] sm:$0xf0]  ;;  %v3899_v9 = vor.u32 %v4361_v5, %v3898_v4 }
 0x7ce   :  { %v1853_v12 = vadd.f32 %v1852_v2, %v1847_v11  ;;  %v3900_v2 = vld [vmem:[#allocation8 + $0x18] sm:$0xf0]  ;;  %v3881_v11 = vor.u32 %v4357_v8, %v3880_v7  ;;  %2198 = vmatpush.bf16.msra.mxu2 %v3899_v9 }
 0x7d0   :  { %1855 = vrot.lane.b32.xlu0 %v1853_v12, %s4650_s15  ;;  %v1878_v13 = vpack.c.bf16 %v1853_v12, %v1853_v12  ;;  %v3903_v12 = vor.u32 %v4360_v6, %v3900_v2  ;;  %2124 = vmatpush.bf16.msra.mxu0 %v3881_v11  ;;  %v1959_v6 = vperm.slane %v3808_v34, 1  ;;  %v1881_v2 = vperm.slane %v3807_v10, 1 }
 0x7d2   :  { %1885 = vrot.lane.b32.xlu1 %v1878_v13, %s4650_s15  ;;  %v3890_v13 = vld [vmem:[#allocation8] sm:$0xf]  ;;  %2211 = vmatpush.bf16.msra.mxu3 %v3903_v12 }
 0x7d3   :  { %v3891_v16 = vor.u32 %v4359_v14, %v3890_v13 }
 0x7d5   :  { %2199 = vmatpush.bf16.msra.mxu2 %v3891_v16 }
 0x7d6   :  { %2212 = vmatpush.bf16.msra.mxu3 %v3895_v18 }
 0x81a   :  { %v4866_v38 = vpop.permute.xlu2 %1668 }
 0x81b   :  { %1671 = vst.msk [vmem:[#allocation2 + $0x8] sm:$0xff] %vm76_vm0, %v4866_v38 }
 0x822   :  { %v1859_v1 = vld [vmem:[#allocation2 + $0x8] sm:$0xff] }
 0x823   :  { %v1956_v3 = vpack.c.bf16 %v1859_v1, %v1859_v1  ;;  %2061 = vrot.lane.b32.xlu0 %v1859_v1, %s4650_s15 }
 0x825   :  { %3875 = vmatmul.msk.bf16.vlgmr.msrb.gmra.mxu2 %vm76_vm0, %v1956_v3  ;;  %3876 = vmatmul.msk.bf16.vlgmr.msrb.gmra.mxu3 %vm76_vm0, %v1956_v3 }
 0x842   :  { %v1856_v22 = vpop.permute.xlu0 %1855 }
 0x843   :  { %1858 = vst.msk [vmem:[#allocation2] sm:$0xff] %vm76_vm0, %v1856_v22 }
 0x844   :  { %v1886_v23 = vpop.permute.xlu1 %1885 }
 0x845   :  { %3841 = vmatmul.msk.bf16.vlgmr.msrb.gmra.mxu0 %vm76_vm0, %v1886_v23  ;;  %3842 = vmatmul.msk.bf16.vlgmr.msrb.gmra.mxu1 %vm76_vm0, %v1886_v23  ;;  %v2146_v23 = vperm.slane %v2097_v47, 1 }
 0x84a   :  { %v4876_v24 = vld [vmem:[#allocation2] sm:$0xff] }
 0x84b   :  { %v2143_v25 = vpack.c.bf16 %v4876_v24, %v4876_v24 }
 0x84d   :  { %3920 = vmatmul.msk.bf16.vlgmr.msra.gmra.mxu2 %vm76_vm0, %v2143_v25  ;;  %3921 = vmatmul.msk.bf16.vlgmr.msra.gmra.mxu3 %vm76_vm0, %v2143_v25 }
 0x855   :  { %3886 = vmatmul.msk.bf16.vlgmr.msra.gmra.mxu0 %vm112_vm1, %v2098_v27  ;;  %3887 = vmatmul.msk.bf16.vlgmr.msra.gmra.mxu1 %vm112_vm1, %v2098_v27  ;;  %v2101_v27 = vperm.slane %v2096_v48, 1  ;;  %v3985_v48 = vld [vmem:[#allocation8 + $0x70] sm:$0xf] }
 0x8a8   :  { %v2014_v28 = vpop.f32.mrf.mxu2  ;;  %v2027_v29 = vpop.f32.mrf.mxu3 }
 0x8a9   :  { %v2015_v40 = vadd.f32 %v2014_v28, %v1958_v35  ;;  %v2028_v14 = vadd.f32 %v2027_v29, %v1959_v6 }
 0x8b0   :  { %v2016_v30 = vpop.f32.mrf.mxu2  ;;  %v2029_v33 = vpop.f32.mrf.mxu3 }
 0x8c2   :  { %v1939_v37 = vpop.f32.mrf.mxu0  ;;  %v1952_v39 = vpop.f32.mrf.mxu1 }
 0x8c3   :  { %v1940_v41 = vadd.f32 %v1939_v37, %v1880_v36  ;;  %v1953_v17 = vadd.f32 %v1952_v39, %v1881_v2 }
 0x8c5   :  { %v2031_v42 = vadd.f32 %v2015_v40, %v1940_v41 }
 0x8c7   :  { %v3877_v43 = vmul.f32 -1.442695, %v2031_v42  ;;  %v2062_v42 = vpop.permute.xlu0 %2061 }
 0x8c9   :  { %4500 = vpow2.f32 %v3877_v43 }
 0x8ca   :  { %v1941_v44 = vpop.f32.mrf.mxu0  ;;  %v1954_v45 = vpop.f32.mrf.mxu1 }
 0x8cf   :  { %v4501_v49 = vpop.eup %4500 }
 0x8d0   :  { %v2035_v53 = vadd.f32 1.0, %v4501_v49  ;;  %v2201_v54 = vpop.f32.mrf.mxu2  ;;  %v2214_v55 = vpop.f32.mrf.mxu3  ;;  %v4381_v49 = vld [vmem:[#allocation8 + $0x74] sm:$0xf0] }
 0x8d1   :  { %v2202_v58 = vadd.f32 %v2201_v54, %v2145_v50  ;;  %v2215_v34 = vadd.f32 %v2214_v55, %v2146_v23  ;;  %v4380_v50 = vld [vmem:[#allocation8 + $0x74] sm:$0xf]  ;;  %v3977_v54 = vld [vmem:[#allocation8 + $0x60] sm:$0xf]  ;;  %v4379_v55 = vld [vmem:[#allocation8 + $0x64] sm:$0xf0] }
 0x8d2   :  { %4502 = vrcp.f32 %v2035_v53  ;;  %v2126_v46 = vpop.f32.mrf.mxu0  ;;  %v2139_v56 = vpop.f32.mrf.mxu1  ;;  %v2047_v5 = vand.u32 2147483648, %v2035_v53  ;;  %v2045_v8 = vand.u32 2147483647, %v2035_v53  ;;  %vm2041_vm11 = vweird.f32 %v2035_v53  ;;  %v4374_v23 = vld [vmem:[#allocation8 + $0x44] sm:$0xf] }
 0x8d3   :  { %v2127_v59 = vadd.f32 %v2126_v46, %v2100_v51  ;;  %v2140_v10 = vadd.f32 %v2139_v56, %v2101_v27  ;;  %v3986_v51 = vor.u32 %v4381_v49, %v3985_v48  ;;  %v4378_v46 = vld [vmem:[#allocation8 + $0x64] sm:$0xf]  ;;  %v3979_v56 = vld [vmem:[#allocation8 + $0x68] sm:$0xf0]  ;;  %v4022_v48 = vld [vmem:[#allocation8 + $0x20] sm:$0xf] }
 0x8d4   :  { %v2048_v12 = vor.u32 1.1754944e-38, %v2047_v5  ;;  %vm2046_vm13 = vcmp.eq.f32.partialorder %v2045_v8, 8.507059e+37  ;;  %v4372_v5 = vld [vmem:[#allocation6 + $0x74] sm:$0xf]  ;;  %v3969_v8 = vld [vmem:[#allocation8 + $0x50] sm:$0xf] }
 0x8d5   :  { %v2218_v60 = vadd.f32 %v2202_v58, %v2127_v59  ;;  %2408 = vmatpush.bf16.msrb.mxu2 %v3986_v51  ;;  %v3978_v58 = vor.u32 %v4379_v55, %v3977_v54  ;;  %v3982_v59 = vor.u32 %v4378_v46, %v3979_v56  ;;  %v4389_v49 = vld [vmem:[#allocation8 + $0x24] sm:$0xf0]  ;;  %v4388_v51 = vld [vmem:[#allocation8 + $0x24] sm:$0xf] }
 0x8d6   :  { %v4023_v54 = vor.u32 %v4389_v49, %v4022_v48 }
 0x8d7   :  { %v3922_v61 = vmul.f32 -1.442695, %v2218_v60 }
 0x8d8   :  { %v4503_v62 = vpop.eup %4502  ;;  %v2203_v63 = vpop.f32.mrf.mxu2 }
 0x8d9   :  { %v2216_v0 = vpop.f32.mrf.mxu3  ;;  %v2037_v57 = vmul.f32 %v4503_v62, %v2035_v53  ;;  %4504 = vpow2.f32 %v3922_v61  ;;  %vm2042_vm10 = vweird.f32 %v4503_v62  ;;  %v3987_v53 = vld [vmem:[#allocation8 + $0x78] sm:$0xf0]  ;;  %2409 = vmatpush.bf16.msrb.mxu2 %v3978_v58  ;;  %v3996_v58 = vld [vmem:[#allocation6] sm:$0xf] }
 0x8da   :  { %v2128_v1 = vpop.f32.mrf.mxu0  ;;  %v2141_v3 = vpop.f32.mrf.mxu1  ;;  %vm2043_vm12 = vmor %vm2041_vm11, %vm2042_vm10 }
 0x8db   :  { %v2038_v4 = vsub.f32 1.0, %v2037_v57  ;;  %v3951_v3 = vld [vmem:[#allocation6 + $0x70] sm:$0xf] }
 0x8dd   :  { %v2039_v7 = vmul.f32 %v4503_v62, %v2038_v4  ;;  %v4373_v4 = vld [vmem:[#allocation6 + $0x74] sm:$0xf0] }
 0x8de   :  { %v3952_v6 = vor.u32 %v4373_v4, %v3951_v3  ;;  %v4006_v3 = vld [vmem:[#allocation8] sm:$0xf]  ;;  %v4385_v4 = vld [vmem:[#allocation8 + $0x4] sm:$0xf0] }
 0x8df   :  { %v4505_v9 = vpop.eup %4504  ;;  %v2040_v11 = vadd.f32 %v4503_v62, %v2039_v7  ;;  %v3953_v7 = vld [vmem:[#allocation6 + $0x78] sm:$0xf0] }
 0x8e0   :  { %v2222_v13 = vadd.f32 1.0, %v4505_v9  ;;  %v4377_v9 = vld [vmem:[#allocation8 + $0x54] sm:$0xf0]  ;;  %v3956_v2 = vor.u32 %v4372_v5, %v3953_v7  ;;  %2333 = vmatpush.bf16.msrb.mxu0 %v3952_v6  ;;  %v4384_v5 = vld [vmem:[#allocation8 + $0x4] sm:$0xf]  ;;  %v4007_v7 = vor.u32 %v4385_v4, %v4006_v3 }
 0x8e1   :  { %v2044_v15 = vsel %vm2043_vm12, %v4503_v62, %v2040_v11  ;;  %v3970_v11 = vor.u32 %v4377_v9, %v3969_v8  ;;  %v4008_v6 = vld [vmem:[#allocation8 + $0x8] sm:$0xf0] }
 0x8e2   :  { %v2049_v16 = vsel %vm2046_vm13, %v2048_v12, %v2044_v15  ;;  %4506 = vrcp.f32 %v2222_v13  ;;  %v2234_v25 = vand.u32 2147483648, %v2222_v13  ;;  %v2232_v30 = vand.u32 2147483647, %v2222_v13  ;;  %v4376_v12 = vld [vmem:[#allocation8 + $0x54] sm:$0xf]  ;;  %2346 = vmatpush.bf16.msrb.mxu1 %v3956_v2 }
 0x8e3   :  { %v2051_v18 = vmul.f32 %v2049_v16, %v2028_v14  ;;  %vm2228_vm15 = vweird.f32 %v2222_v13  ;;  %v2054_v41 = vsub.f32 1.0, %v2049_v16  ;;  %v2064_v44 = vmul.f32 %v2062_v42, %v2049_v16  ;;  %v3943_v14 = vld [vmem:[#allocation6 + $0x60] sm:$0xf]  ;;  %v4371_v16 = vld [vmem:[#allocation6 + $0x64] sm:$0xf0]  ;;  %2410 = vmatpush.bf16.msrb.mxu2 %v3970_v11 }
 0x8e4   :  { %v2235_v33 = vor.u32 1.1754944e-38, %v2234_v25  ;;  %vm2233_vm3 = vcmp.eq.f32.partialorder %v2232_v30, 8.507059e+37  ;;  %v4369_v30 = vld [vmem:[#allocation6 + $0x54] sm:$0xf0]  ;;  %v4030_v42 = vld [vmem:[#allocation8 + $0x30] sm:$0xf]  ;;  %v4011_v8 = vor.u32 %v4384_v5, %v4008_v6 }
 0x8e5   :  { %v2052_v19 = vadd.f32 %v2051_v18, %v1953_v17  ;;  %v4370_v17 = vld [vmem:[#allocation6 + $0x64] sm:$0xf]  ;;  %v3945_v18 = vld [vmem:[#allocation6 + $0x68] sm:$0xf0] }
 0x8e6   :  { %v4382_v2 = vld [vmem:[#allocation6 + $0x4] sm:$0xf]  ;;  %v3998_v11 = vld [vmem:[#allocation6 + $0x8] sm:$0xf0] }
 0x8e7   :  { %4508 = vtanh.f32 %v2052_v19  ;;  %v3944_v19 = vor.u32 %v4371_v16, %v3943_v14 }
 0x8e8   :  { %v4507_v20 = vpop.eup %4506 }
 0x8e9   :  { %v2224_v21 = vmul.f32 %v4507_v20, %v2222_v13  ;;  %vm2229_vm14 = vweird.f32 %v4507_v20  ;;  %v3971_v13 = vld [vmem:[#allocation8 + $0x58] sm:$0xf0]  ;;  %2334 = vmatpush.bf16.msrb.mxu0 %v3944_v19  ;;  %v3923_v19 = vld [vmem:[%s5055_s4 + $0x2] sm:$0x3] }
 0x8ea   :  { %vm2230_vm2 = vmor %vm2228_vm15, %vm2229_vm14  ;;  %v3974_v15 = vor.u32 %v4376_v12, %v3971_v13  ;;  %v4001_v12 = vor.u32 %v4382_v2, %v3998_v11  ;;  %v2483_v13 = vld [vmem:[#allocation3 + $0x30] sm:$0xff]  ;;  %v2280_v49 = vperm.slane %v3923_v19, 1 }
 0x8eb   :  { %v2225_v22 = vsub.f32 1.0, %v2224_v21  ;;  %v3961_v21 = vld [vmem:[#allocation8 + $0x40] sm:$0xf]  ;;  %v2497_v14 = vpack.c.bf16 %v2483_v13, %v2483_v13 }
 0x8ed   :  { %v4509_v26 = vpop.eup %4508  ;;  %v2226_v28 = vmul.f32 %v4507_v20, %v2225_v22  ;;  %v4375_v22 = vld [vmem:[#allocation8 + $0x44] sm:$0xf0] }
 0x8ee   :  { %2056 = vrot.lane.b32.xlu2 %v4509_v26, %s4650_s15  ;;  %v3962_v25 = vor.u32 %v4375_v22, %v3961_v21  ;;  %v3963_v26 = vld [vmem:[#allocation8 + $0x48] sm:$0xf0]  ;;  %v2279_v21 = vperm.slane %v3923_v19, 0 }
 0x8ef   :  { %v2227_v29 = vadd.f32 %v4507_v20, %v2226_v28  ;;  %v3966_v27 = vor.u32 %v4374_v23, %v3963_v26  ;;  %v3935_v28 = vld [vmem:[#allocation6 + $0x50] sm:$0xf] }
 0x8f0   :  { %2411 = vmatpush.bf16.msrb.mxu2 %v3962_v25 }
 0x8f1   :  { %v2231_v35 = vsel %vm2230_vm2, %v4507_v20, %v2227_v29  ;;  %v3948_v20 = vor.u32 %v4370_v17, %v3945_v18  ;;  %v3936_v29 = vor.u32 %v4369_v30, %v3935_v28  ;;  %v3924_v18 = vld [vmem:[%s5056_s5 + $0x2] sm:$0x3] }
 0x8f2   :  { %v2236_v36 = vsel %vm2233_vm3, %v2235_v33, %v2231_v35  ;;  %v4368_v33 = vld [vmem:[#allocation6 + $0x54] sm:$0xf]  ;;  %v3927_v35 = vld [vmem:[#allocation6 + $0x40] sm:$0xf] }
 0x8f3   :  { %v2238_v37 = vmul.f32 %v2236_v36, %v2215_v34  ;;  %v2241_v61 = vsub.f32 1.0, %v2236_v36  ;;  %2347 = vmatpush.bf16.msrb.mxu1 %v3948_v20  ;;  %v3937_v34 = vld [vmem:[#allocation6 + $0x58] sm:$0xf0]  ;;  %2335 = vmatpush.bf16.msrb.mxu0 %v3936_v29  ;;  %v2357_v20 = vperm.slane %v3924_v18, 0 }
 0x8f5   :  { %v2239_v39 = vadd.f32 %v2238_v37, %v2140_v10  ;;  %v3940_v10 = vor.u32 %v4368_v33, %v3937_v34  ;;  %v4366_v37 = vld [vmem:[#allocation6 + $0x44] sm:$0xf] }
 0x8f6   :  { %2248 = vrot.lane.b32.xlu2 %v4876_v24, %s4650_s15  ;;  %v3990_v24 = vor.u32 %v4380_v50, %v3987_v53  ;;  %v4024_v53 = vld [vmem:[#allocation8 + $0x28] sm:$0xf0] }
 0x8f7   :  { %4510 = vtanh.f32 %v2239_v39  ;;  %2348 = vmatpush.bf16.msrb.mxu1 %v3940_v10  ;;  %v4027_v55 = vor.u32 %v4388_v51, %v4024_v53  ;;  %v2495_v53 = vld [vmem:[%s5055_s4] sm:$0x3] }
 0x8f8   :  { %2421 = vmatpush.bf16.msrb.mxu3 %v3990_v24 }
 0x8fc   :  { %2422 = vmatpush.bf16.msrb.mxu3 %v3982_v59  ;;  %v4383_v59 = vld [vmem:[#allocation6 + $0x4] sm:$0xf0] }
 0x8fd   :  { %v4511_v40 = vpop.eup %4510 }
 0x8fe   :  { %2243 = vrot.lane.b32.xlu1 %v4511_v40, %s4650_s15  ;;  %v3929_v40 = vld [vmem:[#allocation6 + $0x48] sm:$0xf0] }
 0x900   :  { %2423 = vmatpush.bf16.msrb.mxu3 %v3974_v15 }
 0x904   :  { %2424 = vmatpush.bf16.msrb.mxu3 %v3966_v27 }
 0x948   :  { %v2057_v43 = vpop.permute.xlu2 %2056 }
 0x949   :  { %v2059_v45 = vmul.f32 %v2057_v43, %v2054_v41  ;;  %v3932_v41 = vor.u32 %v4366_v37, %v3929_v40  ;;  %v4391_v43 = vld [vmem:[#allocation8 + $0x34] sm:$0xf0] }
 0x94b   :  { %v2065_v47 = vadd.f32 %v2064_v44, %v2059_v45  ;;  %2349 = vmatpush.bf16.msrb.mxu1 %v3932_v41  ;;  %v4390_v44 = vld [vmem:[#allocation8 + $0x34] sm:$0xf]  ;;  %v4031_v45 = vor.u32 %v4391_v43, %v4030_v42 }
 0x94d   :  { %2067 = vrot.lane.b32.xlu0 %v2065_v47, %s4650_s15  ;;  %v4032_v47 = vld [vmem:[#allocation8 + $0x38] sm:$0xf0]  ;;  %2595 = vmatpush.bf16.msra.mxu2 %v4031_v45  ;;  %v2358_v45 = vperm.slane %v3924_v18, 1 }
 0x94e   :  { %v4035_v50 = vor.u32 %v4390_v44, %v4032_v47 }
 0x94f   :  { %2536 = vmatpush.bf16.msra.mxu1 %v4001_v12 }
 0x950   :  { %v2249_v60 = vpop.permute.xlu2 %2248  ;;  %2608 = vmatpush.bf16.msra.mxu3 %v4035_v50 }
 0x951   :  { %v2251_v63 = vmul.f32 %v2249_v60, %v2236_v36  ;;  %v4367_v36 = vld [vmem:[#allocation6 + $0x44] sm:$0xf0]  ;;  %2596 = vmatpush.bf16.msra.mxu2 %v4023_v54  ;;  %v4014_v60 = vld [vmem:[#allocation8 + $0x10] sm:$0xf] }
 0x952   :  { %v3928_v39 = vor.u32 %v4367_v36, %v3927_v35 }
 0x954   :  { %2336 = vmatpush.bf16.msrb.mxu0 %v3928_v39  ;;  %2609 = vmatpush.bf16.msra.mxu3 %v4027_v55 }
 0x970   :  { %v2244_v62 = vpop.permute.xlu1 %2243 }
 0x971   :  { %v2246_v0 = vmul.f32 %v2244_v62, %v2241_v61  ;;  %v3997_v61 = vor.u32 %v4383_v59, %v3996_v58  ;;  %v4387_v62 = vld [vmem:[#allocation8 + $0x14] sm:$0xf0]  ;;  %v2496_v58 = vld [vmem:[%s5056_s5] sm:$0x3] }
 0x973   :  { %v2252_v57 = vadd.f32 %v2251_v63, %v2246_v0  ;;  %v4386_v63 = vld [vmem:[#allocation8 + $0x14] sm:$0xf]  ;;  %v4016_v0 = vld [vmem:[#allocation8 + $0x18] sm:$0xf0]  ;;  %2523 = vmatpush.bf16.msra.mxu0 %v3997_v61  ;;  %v2499_v61 = vperm.slane %v2495_v53, 0 }
 0x975   :  { %2254 = vrot.lane.b32.xlu1 %v2252_v57, %s4650_s15  ;;  %v2277_v1 = vpack.c.bf16 %v2252_v57, %v2252_v57  ;;  %v4015_v57 = vor.u32 %v4387_v62, %v4014_v60 }
 0x977   :  { %2284 = vrot.lane.b32.xlu2 %v2277_v1, %s4650_s15  ;;  %v4019_v1 = vor.u32 %v4386_v63, %v4016_v0  ;;  %2597 = vmatpush.bf16.msra.mxu2 %v4015_v57  ;;  %v2544_v63 = vperm.slane %v2496_v58, 0 }
 0x979   :  { %2610 = vmatpush.bf16.msra.mxu3 %v4019_v1 }
 0x97b   :  { %2598 = vmatpush.bf16.msra.mxu2 %v4007_v7 }
 0x97d   :  { %2611 = vmatpush.bf16.msra.mxu3 %v4011_v8 }
 0x9bf   :  { %v4903_v24 = vpop.permute.xlu0 %2067 }
 0x9c0   :  { %2070 = vst.msk [vmem:[#allocation2 + $0x8] sm:$0xff] %vm76_vm0, %v4903_v24 }
 0x9c7   :  { %v2258_v46 = vld [vmem:[#allocation2 + $0x8] sm:$0xff] }
 0x9c8   :  { %v2355_v56 = vpack.c.bf16 %v2258_v46, %v2258_v46  ;;  %2460 = vrot.lane.b32.xlu1 %v2258_v46, %s4650_s15 }
 0x9ca   :  { %3991 = vmatmul.msk.bf16.vlgmr.msrb.gmra.mxu2 %vm76_vm0, %v2355_v56  ;;  %3992 = vmatmul.msk.bf16.vlgmr.msrb.gmra.mxu3 %vm76_vm0, %v2355_v56 }
 0x9d1   :  { %v2285_v9 = vpop.permute.xlu2 %2284 }
 0x9d2   :  { %3957 = vmatmul.msk.bf16.vlgmr.msrb.gmra.mxu0 %vm76_vm0, %v2285_v9  ;;  %3958 = vmatmul.msk.bf16.vlgmr.msrb.gmra.mxu1 %vm76_vm0, %v2285_v9 }
 0x9e2   :  { %4002 = vmatmul.msk.bf16.vlgmr.msra.gmra.mxu0 %vm112_vm1, %v2497_v14  ;;  %4003 = vmatmul.msk.bf16.vlgmr.msra.gmra.mxu1 %vm112_vm1, %v2497_v14 }
 0x9e7   :  { %v2255_v15 = vpop.permute.xlu1 %2254 }
 0x9e8   :  { %2257 = vst.msk [vmem:[#allocation2] sm:$0xff] %vm76_vm0, %v2255_v15  ;;  %v2545_v15 = vperm.slane %v2496_v58, 1 }
 0x9ef   :  { %v4915_v16 = vld [vmem:[#allocation2] sm:$0xff] }
 0x9f0   :  { %v2542_v17 = vpack.c.bf16 %v4915_v16, %v4915_v16 }
 0x9f2   :  { %4036 = vmatmul.msk.bf16.vlgmr.msra.gmra.mxu2 %vm76_vm0, %v2542_v17  ;;  %4037 = vmatmul.msk.bf16.vlgmr.msra.gmra.mxu3 %vm76_vm0, %v2542_v17 }
 0xa4d   :  { %v2413_v22 = vpop.f32.mrf.mxu2  ;;  %v2426_v23 = vpop.f32.mrf.mxu3 }
 0xa4e   :  { %v2414_v27 = vadd.f32 %v2413_v22, %v2357_v20  ;;  %v2427_v54 = vadd.f32 %v2426_v23, %v2358_v45  ;;  %v2500_v20 = vperm.slane %v2495_v53, 1  ;;  %v4101_v45 = vld [vmem:[#allocation8 + $0x70] sm:$0xf]  ;;  %v4405_v53 = vld [vmem:[#allocation8 + $0x64] sm:$0xf0] }
 0xa4f   :  { %v2338_v25 = vpop.f32.mrf.mxu0  ;;  %v2351_v26 = vpop.f32.mrf.mxu1 }
 0xa50   :  { %v2339_v28 = vadd.f32 %v2338_v25, %v2279_v21  ;;  %v2352_v59 = vadd.f32 %v2351_v26, %v2280_v49 }
 0xa52   :  { %v2430_v30 = vadd.f32 %v2414_v27, %v2339_v28 }
 0xa54   :  { %v3993_v29 = vmul.f32 -1.442695, %v2430_v30 }
 0xa55   :  { %v2415_v33 = vpop.f32.mrf.mxu2  ;;  %v2428_v34 = vpop.f32.mrf.mxu3 }
 0xa56   :  { %4512 = vpow2.f32 %v3993_v29  ;;  %v2461_v33 = vpop.permute.xlu1 %2460 }
 0xa57   :  { %v2340_v10 = vpop.f32.mrf.mxu0  ;;  %v2353_v35 = vpop.f32.mrf.mxu1 }
 0xa5c   :  { %v4513_v36 = vpop.eup %4512 }
 0xa5d   :  { %v2434_v37 = vadd.f32 1.0, %v4513_v36 }
 0xa5f   :  { %4514 = vrcp.f32 %v2434_v37  ;;  %v2525_v39 = vpop.f32.mrf.mxu0  ;;  %v2446_v44 = vand.u32 2147483648, %v2434_v37  ;;  %v2444_v48 = vand.u32 2147483647, %v2434_v37  ;;  %vm2440_vm5 = vweird.f32 %v2434_v37  ;;  %v2538_v46 = vpop.f32.mrf.mxu1 }
 0xa60   :  { %v2526_v0 = vadd.f32 %v2525_v39, %v2499_v61  ;;  %v2539_v26 = vadd.f32 %v2538_v46, %v2500_v20  ;;  %v4095_v46 = vld [vmem:[#allocation8 + $0x68] sm:$0xf0]  ;;  %v4398_v61 = vld [vmem:[#allocation6 + $0x74] sm:$0xf]  ;;  %v4395_v20 = vld [vmem:[#allocation6 + $0x54] sm:$0xf0] }
 0xa61   :  { %v2447_v51 = vor.u32 1.1754944e-38, %v2446_v44  ;;  %vm2445_vm7 = vcmp.eq.f32.partialorder %v2444_v48, 8.507059e+37  ;;  %v4406_v48 = vld [vmem:[#allocation8 + $0x74] sm:$0xf] }
 0xa65   :  { %v4515_v40 = vpop.eup %4514 }
 0xa66   :  { %v2436_v41 = vmul.f32 %v4515_v40, %v2434_v37  ;;  %vm2441_vm4 = vweird.f32 %v4515_v40 }
 0xa67   :  { %v2527_v42 = vpop.f32.mrf.mxu0  ;;  %vm2442_vm6 = vmor %vm2440_vm5, %vm2441_vm4  ;;  %v2540_v4 = vpop.f32.mrf.mxu1 }
 0xa68   :  { %v2437_v43 = vsub.f32 1.0, %v2436_v41  ;;  %v4402_v4 = vld [vmem:[#allocation8 + $0x54] sm:$0xf] }
 0xa6a   :  { %v2438_v47 = vmul.f32 %v4515_v40, %v2437_v43 }
 0xa6c   :  { %v2439_v50 = vadd.f32 %v4515_v40, %v2438_v47  ;;  %v4407_v47 = vld [vmem:[#allocation8 + $0x74] sm:$0xf0] }
 0xa6d   :  { %v4102_v49 = vor.u32 %v4407_v47, %v4101_v45  ;;  %v4112_v47 = vld [vmem:[#allocation6] sm:$0xf] }
 0xa6e   :  { %v2443_v55 = vsel %vm2442_vm6, %v4515_v40, %v2439_v50  ;;  %v4103_v50 = vld [vmem:[#allocation8 + $0x78] sm:$0xf0] }
 0xa6f   :  { %v2448_v56 = vsel %vm2445_vm7, %v2447_v51, %v2443_v55  ;;  %v4093_v51 = vld [vmem:[#allocation8 + $0x60] sm:$0xf]  ;;  %v4404_v55 = vld [vmem:[#allocation8 + $0x64] sm:$0xf]  ;;  %2807 = vmatpush.bf16.msrb.mxu2 %v4102_v49  ;;  %v4130_v49 = vld [vmem:[#allocation8 + $0x10] sm:$0xf] }
 0xa70   :  { %v2450_v60 = vmul.f32 %v2448_v56, %v2427_v54  ;;  %v2453_v29 = vsub.f32 1.0, %v2448_v56  ;;  %v2463_v10 = vmul.f32 %v2461_v33, %v2448_v56  ;;  %v4106_v54 = vor.u32 %v4406_v48, %v4103_v50  ;;  %v4043_v33 = vld [vmem:[#allocation6 + $0x40] sm:$0xf]  ;;  %v4409_v48 = vld [vmem:[#allocation6 + $0x4] sm:$0xf0] }
 0xa71   :  { %v4094_v56 = vor.u32 %v4405_v53, %v4093_v51  ;;  %v4098_v58 = vor.u32 %v4404_v55, %v4095_v46  ;;  %v4113_v50 = vor.u32 %v4409_v48, %v4112_v47  ;;  %v4413_v51 = vld [vmem:[#allocation8 + $0x14] sm:$0xf0]  ;;  %v4412_v53 = vld [vmem:[#allocation8 + $0x14] sm:$0xf] }
 0xa72   :  { %v2451_v62 = vadd.f32 %v2450_v60, %v2352_v59  ;;  %2820 = vmatpush.bf16.msrb.mxu3 %v4106_v54  ;;  %v4067_v59 = vld [vmem:[#allocation6 + $0x70] sm:$0xf]  ;;  %v4399_v60 = vld [vmem:[#allocation6 + $0x74] sm:$0xf0]  ;;  %v4132_v54 = vld [vmem:[#allocation8 + $0x18] sm:$0xf0]  ;;  %v4131_v55 = vor.u32 %v4413_v51, %v4130_v49 }
 0xa73   :  { %2808 = vmatpush.bf16.msrb.mxu2 %v4094_v56  ;;  %v4135_v46 = vor.u32 %v4412_v53, %v4132_v54  ;;  %v4122_v56 = vld [vmem:[#allocation8] sm:$0xf] }
 0xa74   :  { %4516 = vtanh.f32 %v2451_v62  ;;  %v4068_v62 = vor.u32 %v4399_v60, %v4067_v59  ;;  %v4410_v59 = vld [vmem:[#allocation8 + $0x4] sm:$0xf]  ;;  %v4124_v60 = vld [vmem:[#allocation8 + $0x8] sm:$0xf0] }
 0xa75   :  { %v2600_v57 = vpop.f32.mrf.mxu2  ;;  %v2613_v1 = vpop.f32.mrf.mxu3 }
 0xa76   :  { %v2601_v3 = vadd.f32 %v2600_v57, %v2544_v63  ;;  %v2614_v23 = vadd.f32 %v2613_v1, %v2545_v15  ;;  %2821 = vmatpush.bf16.msrb.mxu3 %v4098_v58  ;;  %v4069_v63 = vld [vmem:[#allocation6 + $0x78] sm:$0xf0]  ;;  %v4403_v57 = vld [vmem:[#allocation8 + $0x54] sm:$0xf0]  ;;  %2732 = vmatpush.bf16.msrb.mxu0 %v4068_v62  ;;  %v4400_v15 = vld [vmem:[#allocation8 + $0x44] sm:$0xf] }
 0xa77   :  { %v4072_v1 = vor.u32 %v4398_v61, %v4069_v63  ;;  %v4411_v58 = vld [vmem:[#allocation8 + $0x4] sm:$0xf0]  ;;  %v4127_v63 = vor.u32 %v4410_v59, %v4124_v60 }
 0xa78   :  { %v2617_v5 = vadd.f32 %v2601_v3, %v2526_v0  ;;  %v4085_v0 = vld [vmem:[#allocation8 + $0x50] sm:$0xf]  ;;  %v4123_v61 = vor.u32 %v4411_v58, %v4122_v56 }
 0xa79   :  { %v4086_v3 = vor.u32 %v4403_v57, %v4085_v0  ;;  %2745 = vmatpush.bf16.msrb.mxu1 %v4072_v1  ;;  %v4408_v57 = vld [vmem:[#allocation6 + $0x4] sm:$0xf]  ;;  %v4114_v1 = vld [vmem:[#allocation6 + $0x8] sm:$0xf0] }
 0xa7a   :  { %v4517_v6 = vpop.eup %4516  ;;  %v4038_v7 = vmul.f32 -1.442695, %v2617_v5  ;;  %v4087_v5 = vld [vmem:[#allocation8 + $0x58] sm:$0xf0] }
 0xa7b   :  { %2455 = vrot.lane.b32.xlu0 %v4517_v6, %s4650_s15  ;;  %v4059_v6 = vld [vmem:[#allocation6 + $0x60] sm:$0xf]  ;;  %2809 = vmatpush.bf16.msrb.mxu2 %v4086_v3  ;;  %v4117_v3 = vor.u32 %v4408_v57, %v4114_v1 }
 0xa7c   :  { %4518 = vpow2.f32 %v4038_v7  ;;  %v4090_v7 = vor.u32 %v4402_v4, %v4087_v5 }
 0xa7d   :  { %v2602_v8 = vpop.f32.mrf.mxu2  ;;  %v2615_v9 = vpop.f32.mrf.mxu3 }
 0xa7e   :  { %v4397_v8 = vld [vmem:[#allocation6 + $0x64] sm:$0xf0]  ;;  %v4396_v9 = vld [vmem:[#allocation6 + $0x64] sm:$0xf]  ;;  %2822 = vmatpush.bf16.msrb.mxu3 %v4090_v7 }
 0xa82   :  { %v4519_v2 = vpop.eup %4518 }
 0xa83   :  { %v2621_v11 = vadd.f32 1.0, %v4519_v2  ;;  %2647 = vrot.lane.b32.xlu0 %v4915_v16, %s4650_s15  ;;  %v4061_v2 = vld [vmem:[#allocation6 + $0x68] sm:$0xf0] }
 0xa85   :  { %4520 = vrcp.f32 %v2621_v11  ;;  %v2633_v17 = vand.u32 2147483648, %v2621_v11  ;;  %v2631_v19 = vand.u32 2147483647, %v2621_v11  ;;  %vm2627_vm9 = vweird.f32 %v2621_v11 }
 0xa87   :  { %v2634_v22 = vor.u32 1.1754944e-38, %v2633_v17  ;;  %vm2632_vm11 = vcmp.eq.f32.partialorder %v2631_v19, 8.507059e+37  ;;  %v4051_v19 = vld [vmem:[#allocation6 + $0x50] sm:$0xf] }
 0xa8b   :  { %v4521_v12 = vpop.eup %4520 }
 0xa8c   :  { %v2623_v13 = vmul.f32 %v4521_v12, %v2621_v11  ;;  %vm2628_vm8 = vweird.f32 %v4521_v12  ;;  %v4060_v11 = vor.u32 %v4397_v8, %v4059_v6 }
 0xa8d   :  { %vm2629_vm10 = vmor %vm2627_vm9, %vm2628_vm8 }
 0xa8e   :  { %v2624_v14 = vsub.f32 1.0, %v2623_v13  ;;  %v4077_v13 = vld [vmem:[#allocation8 + $0x40] sm:$0xf]  ;;  %2733 = vmatpush.bf16.msrb.mxu0 %v4060_v11  ;;  %v4039_v11 = vld [vmem:[%s5055_s4 + $0x2] sm:$0x3] }
 0xa8f   :  { %v2679_v59 = vperm.slane %v4039_v11, 1 }
 0xa90   :  { %v2625_v18 = vmul.f32 %v4521_v12, %v2624_v14  ;;  %v4401_v14 = vld [vmem:[#allocation8 + $0x44] sm:$0xf0] }
 0xa91   :  { %v4078_v17 = vor.u32 %v4401_v14, %v4077_v13  ;;  %v2678_v13 = vperm.slane %v4039_v11, 0 }
 0xa92   :  { %v2626_v21 = vadd.f32 %v4521_v12, %v2625_v18  ;;  %v4079_v18 = vld [vmem:[#allocation8 + $0x48] sm:$0xf0] }
 0xa93   :  { %2810 = vmatpush.bf16.msrb.mxu2 %v4078_v17 }
 0xa94   :  { %v2630_v25 = vsel %vm2629_vm10, %v4521_v12, %v2626_v21  ;;  %v4064_v12 = vor.u32 %v4396_v9, %v4061_v2  ;;  %v4082_v21 = vor.u32 %v4400_v15, %v4079_v18  ;;  %v2882_v9 = vld [vmem:[#allocation3 + $0x38] sm:$0xff] }
 0xa95   :  { %v2635_v27 = vsel %vm2632_vm11, %v2634_v22, %v2630_v25  ;;  %v4052_v22 = vor.u32 %v4395_v20, %v4051_v19  ;;  %v4053_v25 = vld [vmem:[#allocation6 + $0x58] sm:$0xf0]  ;;  %v2896_v2 = vpack.c.bf16 %v2882_v9, %v2882_v9 }
 0xa96   :  { %v2637_v16 = vmul.f32 %v2635_v27, %v2614_v23  ;;  %v2640_v39 = vsub.f32 1.0, %v2635_v27  ;;  %2746 = vmatpush.bf16.msrb.mxu1 %v4064_v12  ;;  %v4394_v23 = vld [vmem:[#allocation6 + $0x54] sm:$0xf]  ;;  %2823 = vmatpush.bf16.msrb.mxu3 %v4082_v21  ;;  %v4040_v12 = vld [vmem:[%s5056_s5 + $0x2] sm:$0x3] }
 0xa97   :  { %2734 = vmatpush.bf16.msrb.mxu0 %v4052_v22  ;;  %v2756_v14 = vperm.slane %v4040_v12, 0 }
 0xa98   :  { %v2638_v28 = vadd.f32 %v2637_v16, %v2539_v26  ;;  %v4056_v26 = vor.u32 %v4394_v23, %v4053_v25  ;;  %v4417_v16 = vld [vmem:[#allocation8 + $0x34] sm:$0xf0] }
 0xa9a   :  { %4522 = vtanh.f32 %v2638_v28  ;;  %v4416_v28 = vld [vmem:[#allocation8 + $0x34] sm:$0xf]  ;;  %2747 = vmatpush.bf16.msrb.mxu1 %v4056_v26 }
 0xaa0   :  { %v4523_v30 = vpop.eup %4522 }
 0xaa1   :  { %2642 = vrot.lane.b32.xlu2 %v4523_v30, %s4650_s15 }
 0xaed   :  { %v2456_v34 = vpop.permute.xlu0 %2455 }
 0xaee   :  { %v2458_v35 = vmul.f32 %v2456_v34, %v2453_v29  ;;  %v4148_v29 = vld [vmem:[#allocation8 + $0x38] sm:$0xf0]  ;;  %v4393_v34 = vld [vmem:[#allocation6 + $0x44] sm:$0xf0] }
 0xaf0   :  { %v2464_v36 = vadd.f32 %v2463_v10, %v2458_v35  ;;  %v4151_v10 = vor.u32 %v4416_v28, %v4148_v29  ;;  %v4044_v35 = vor.u32 %v4393_v34, %v4043_v33  ;;  %v4967_v28 = vld [vmem:[%s5055_s4] sm:$0x3] }
 0xaf1   :  { %v2898_v33 = vperm.slane %v4967_v28, 0 }
 0xaf2   :  { %2466 = vrot.lane.b32.xlu1 %v2464_v36, %s4650_s15  ;;  %v4392_v36 = vld [vmem:[#allocation6 + $0x44] sm:$0xf]  ;;  %3007 = vmatpush.bf16.msra.mxu3 %v4151_v10 }
 0xaf3   :  { %2735 = vmatpush.bf16.msrb.mxu0 %v4044_v35 }
 0xaf5   :  { %v2648_v37 = vpop.permute.xlu0 %2647 }
 0xaf6   :  { %v2650_v41 = vmul.f32 %v2648_v37, %v2635_v27  ;;  %v4146_v27 = vld [vmem:[#allocation8 + $0x30] sm:$0xf]  ;;  %v4045_v37 = vld [vmem:[#allocation6 + $0x48] sm:$0xf0] }
 0xaf7   :  { %v4147_v30 = vor.u32 %v4417_v16, %v4146_v27  ;;  %2922 = vmatpush.bf16.msra.mxu0 %v4113_v50 }
 0xaf9   :  { %2994 = vmatpush.bf16.msra.mxu2 %v4147_v30  ;;  %v4972_v30 = vld [vmem:[%s5056_s5] sm:$0x3] }
 0xafa   :  { %v2943_v34 = vperm.slane %v4972_v30, 0 }
 0xafb   :  { %v2643_v40 = vpop.permute.xlu2 %2642 }
 0xafc   :  { %v2645_v42 = vmul.f32 %v2643_v40, %v2640_v39  ;;  %v4138_v39 = vld [vmem:[#allocation8 + $0x20] sm:$0xf]  ;;  %v4048_v40 = vor.u32 %v4392_v36, %v4045_v37 }
 0xafe   :  { %v2651_v43 = vadd.f32 %v2650_v41, %v2645_v42  ;;  %v4415_v41 = vld [vmem:[#allocation8 + $0x24] sm:$0xf0]  ;;  %v4414_v42 = vld [vmem:[#allocation8 + $0x24] sm:$0xf]  ;;  %2748 = vmatpush.bf16.msrb.mxu1 %v4048_v40 }
 0xb00   :  { %2653 = vrot.lane.b32.xlu2 %v2651_v43, %s4650_s15  ;;  %v2676_v44 = vpack.c.bf16 %v2651_v43, %v2651_v43  ;;  %v4140_v43 = vld [vmem:[#allocation8 + $0x28] sm:$0xf0] }
 0xb01   :  { %v4143_v45 = vor.u32 %v4414_v42, %v4140_v43 }
 0xb02   :  { %2683 = vrot.lane.b32.xlu0 %v2676_v44, %s4650_s15  ;;  %v4139_v44 = vor.u32 %v4415_v41, %v4138_v39  ;;  %2935 = vmatpush.bf16.msra.mxu1 %v4117_v3 }
 0xb03   :  { %3008 = vmatpush.bf16.msra.mxu3 %v4143_v45  ;;  %v4651_v45 = vmov 0  }
 0xb04   :  { %2995 = vmatpush.bf16.msra.mxu2 %v4139_v44  ;;  %4443 = vset.pattern.permute.xlu1 %v4651_v45 }
 0xb05   :  { %4444 = vset.pattern.permute.xlu2 %v4651_v45  ;;  %4445 = vset.pattern.permute.xlu0 %v4651_v45 }
 0xb07   :  { %3009 = vmatpush.bf16.msra.mxu3 %v4135_v46 }
 0xb08   :  { %2996 = vmatpush.bf16.msra.mxu2 %v4131_v55  ;;  %v2757_v55 = vperm.slane %v4040_v12, 1 }
 0xb0b   :  { %3010 = vmatpush.bf16.msra.mxu3 %v4127_v63 }
 0xb0c   :  { %2997 = vmatpush.bf16.msra.mxu2 %v4123_v61 }
 0xb5a   :  { %v2654_v62 = vpop.permute.xlu2 %2653 }
 0xb5b   :  { %2656 = vst.msk [vmem:[#allocation2] sm:$0xff] %vm76_vm0, %v2654_v62 }
 0xb62   :  { %v4950_v7 = vld [vmem:[#allocation2] sm:$0xff] }
 0xb63   :  { %v2941_v8 = vpack.c.bf16 %v4950_v7, %v4950_v7 }
 0xb64   :  { %v4941_v0 = vpop.permute.xlu1 %2466 }
 0xb65   :  { %2469 = vst.msk [vmem:[#allocation2 + $0x8] sm:$0xff] %vm76_vm0, %v4941_v0 }
 0xb6c   :  { %v2657_v4 = vld [vmem:[#allocation2 + $0x8] sm:$0xff] }
 0xb6d   :  { %v2754_v5 = vpack.c.bf16 %v2657_v4, %v2657_v4  ;;  %2859 = vrot.lane.b32.xlu2 %v2657_v4, %s4650_s15 }
 0xb6f   :  { %4107 = vmatmul.msk.bf16.vlgmr.msrb.gmra.mxu2 %vm76_vm0, %v2754_v5  ;;  %4108 = vmatmul.msk.bf16.vlgmr.msrb.gmra.mxu3 %vm76_vm0, %v2754_v5 }
 0xb74   :  { %v2684_v6 = vpop.permute.xlu0 %2683 }
 0xb75   :  { %4073 = vmatmul.msk.bf16.vlgmr.msrb.gmra.mxu0 %vm76_vm0, %v2684_v6  ;;  %4074 = vmatmul.msk.bf16.vlgmr.msrb.gmra.mxu1 %vm76_vm0, %v2684_v6 }
 0xb7f   :  { %4152 = vmatmul.msk.bf16.vlgmr.msra.gmra.mxu2 %vm76_vm0, %v2941_v8  ;;  %4153 = vmatmul.msk.bf16.vlgmr.msra.gmra.mxu3 %vm76_vm0, %v2941_v8 }
 0xb85   :  { %4118 = vmatmul.msk.bf16.vlgmr.msra.gmra.mxu0 %vm112_vm1, %v2896_v2  ;;  %4119 = vmatmul.msk.bf16.vlgmr.msra.gmra.mxu1 %vm112_vm1, %v2896_v2  ;;  %v2944_v2 = vperm.slane %v4972_v30, 1  ;;  %v4217_v30 = vld [vmem:[#allocation8 + $0x70] sm:$0xf] }
 0xbf2   :  { %v2737_v15 = vpop.f32.mrf.mxu0  ;;  %v2750_v17 = vpop.f32.mrf.mxu1 }
 0xbf3   :  { %v2738_v18 = vadd.f32 %v2737_v15, %v2678_v13  ;;  %v2812_v19 = vpop.f32.mrf.mxu2  ;;  %v2825_v20 = vpop.f32.mrf.mxu3  ;;  %v2751_v3 = vadd.f32 %v2750_v17, %v2679_v59  ;;  %v2899_v15 = vperm.slane %v4967_v28, 1  ;;  %v4201_v59 = vld [vmem:[#allocation8 + $0x50] sm:$0xf] }
 0xbf4   :  { %v2813_v21 = vadd.f32 %v2812_v19, %v2756_v14  ;;  %v2826_v63 = vadd.f32 %v2825_v20, %v2757_v55 }
 0xbf6   :  { %v2829_v22 = vadd.f32 %v2813_v21, %v2738_v18 }
 0xbf8   :  { %v4109_v23 = vmul.f32 -1.442695, %v2829_v22 }
 0xbfa   :  { %4524 = vpow2.f32 %v4109_v23  ;;  %v2739_v25 = vpop.f32.mrf.mxu0  ;;  %v2752_v26 = vpop.f32.mrf.mxu1 }
 0xbfb   :  { %v2814_v27 = vpop.f32.mrf.mxu2  ;;  %v2827_v16 = vpop.f32.mrf.mxu3  ;;  %v4985_v26 = vld [vmem:[%s5052_s1] sm:$0xff] }
 0xbfc   :  { %vm478_vm5 = vcmp.eq.s32.totalorder %v4985_v26, 1  ;;  %vm877_vm6 = vcmp.eq.s32.totalorder %v4985_v26, 2  ;;  %vm1276_vm7 = vcmp.eq.s32.totalorder %v4985_v26, 3  ;;  %vm2074_vm8 = vcmp.eq.s32.totalorder %v4985_v26, 5 }
 0xbfd   :  { %v480_v27 = vsel %vm478_vm5, 1, %v4651_v45  ;;  %vm2473_vm9 = vcmp.eq.s32.totalorder %v4985_v26, 6 }
 0xc00   :  { %v4525_v29 = vpop.eup %4524 }
 0xc01   :  { %v2833_v10 = vadd.f32 1.0, %v4525_v29  ;;  %v4433_v29 = vld [vmem:[#allocation8 + $0x74] sm:$0xf0] }
 0xc02   :  { %v2924_v35 = vpop.f32.mrf.mxu0  ;;  %v2937_v36 = vpop.f32.mrf.mxu1 }
 0xc03   :  { %4526 = vrcp.f32 %v2833_v10  ;;  %v2999_v37 = vpop.f32.mrf.mxu2  ;;  %v3012_v39 = vpop.f32.mrf.mxu3  ;;  %v2925_v40 = vadd.f32 %v2924_v35, %v2898_v33  ;;  %v2845_v54 = vand.u32 2147483648, %v2833_v10  ;;  %v2843_v56 = vand.u32 2147483647, %v2833_v10  ;;  %v4432_v33 = vld [vmem:[#allocation8 + $0x74] sm:$0xf] }
 0xc04   :  { %v3000_v41 = vadd.f32 %v2999_v37, %v2943_v34  ;;  %vm2839_vm12 = vweird.f32 %v2833_v10  ;;  %v3013_v19 = vadd.f32 %v3012_v39, %v2944_v2  ;;  %v2938_v21 = vadd.f32 %v2937_v36, %v2899_v15  ;;  %v2860_v34 = vpop.permute.xlu2 %2859  ;;  %v4219_v36 = vld [vmem:[#allocation8 + $0x78] sm:$0xf0]  ;;  %v4209_v37 = vld [vmem:[#allocation8 + $0x60] sm:$0xf]  ;;  %v4431_v39 = vld [vmem:[#allocation8 + $0x64] sm:$0xf0] }
 0xc05   :  { %v2846_v61 = vor.u32 1.1754944e-38, %v2845_v54  ;;  %vm2844_vm14 = vcmp.eq.f32.partialorder %v2843_v56, 8.507059e+37  ;;  %v4218_v35 = vor.u32 %v4433_v29, %v4217_v30  ;;  %v4425_v2 = vld [vmem:[#allocation6 + $0x74] sm:$0xf0]  ;;  %v4423_v15 = vld [vmem:[#allocation6 + $0x64] sm:$0xf0] }
 0xc06   :  { %v3016_v42 = vadd.f32 %v3000_v41, %v2925_v40  ;;  %v4222_v41 = vor.u32 %v4432_v33, %v4219_v36  ;;  %v4159_v30 = vld [vmem:[#allocation6 + $0x40] sm:$0xf]  ;;  %v4419_v29 = vld [vmem:[#allocation6 + $0x44] sm:$0xf0]  ;;  %v4418_v33 = vld [vmem:[#allocation6 + $0x44] sm:$0xf] }
 0xc07   :  { %3206 = vmatpush.bf16.msrb.mxu2 %v4218_v35 }
 0xc08   :  { %v4154_v43 = vmul.f32 -1.442695, %v3016_v42  ;;  %v4430_v42 = vld [vmem:[#allocation8 + $0x64] sm:$0xf]  ;;  %3219 = vmatpush.bf16.msrb.mxu3 %v4222_v41 }
 0xc09   :  { %v4527_v44 = vpop.eup %4526 }
 0xc0a   :  { %v2835_v47 = vmul.f32 %v4527_v44, %v2833_v10  ;;  %4528 = vpow2.f32 %v4154_v43  ;;  %v2926_v48 = vpop.f32.mrf.mxu0  ;;  %v2939_v49 = vpop.f32.mrf.mxu1  ;;  %vm2840_vm1 = vweird.f32 %v4527_v44  ;;  %v4211_v43 = vld [vmem:[#allocation8 + $0x68] sm:$0xf0] }
 0xc0b   :  { %v3001_v50 = vpop.f32.mrf.mxu2  ;;  %v3014_v51 = vpop.f32.mrf.mxu3  ;;  %vm2841_vm13 = vmor %vm2839_vm12, %vm2840_vm1  ;;  %v4214_v48 = vor.u32 %v4430_v42, %v4211_v43  ;;  %v879_v49 = vsel %vm877_vm6, 1, %v4651_v45 }
 0xc0c   :  { %v2836_v53 = vsub.f32 1.0, %v2835_v47 }
 0xc0d   :  { %3220 = vmatpush.bf16.msrb.mxu3 %v4214_v48 }
 0xc0e   :  { %v2837_v46 = vmul.f32 %v4527_v44, %v2836_v53 }
 0xc10   :  { %v4529_v58 = vpop.eup %4528  ;;  %v2838_v60 = vadd.f32 %v4527_v44, %v2837_v46 }
 0xc11   :  { %v3020_v62 = vadd.f32 1.0, %v4529_v58  ;;  %v1278_v58 = vsel %vm1276_vm7, 1, %v4651_v45 }
 0xc12   :  { %v2842_v57 = vsel %vm2841_vm13, %v4527_v44, %v2838_v60  ;;  %v4210_v44 = vor.u32 %v4431_v39, %v4209_v37  ;;  %v4429_v60 = vld [vmem:[#allocation8 + $0x54] sm:$0xf0]  ;;  %vm3271_vm13 = vcmp.eq.s32.totalorder %v4985_v26, 8 }
 0xc13   :  { %v2847_v1 = vsel %vm2844_vm14, %v2846_v61, %v2842_v57  ;;  %4530 = vrcp.f32 %v3020_v62  ;;  %v3032_v11 = vand.u32 2147483648, %v3020_v62  ;;  %v3030_v14 = vand.u32 2147483647, %v3020_v62  ;;  %v4428_v61 = vld [vmem:[#allocation8 + $0x54] sm:$0xf] }
 0xc14   :  { %v2849_v4 = vmul.f32 %v2847_v1, %v2826_v63  ;;  %vm3026_vm2 = vweird.f32 %v3020_v62  ;;  %v2852_v28 = vsub.f32 1.0, %v2847_v1  ;;  %3207 = vmatpush.bf16.msrb.mxu2 %v4210_v44  ;;  %v4203_v63 = vld [vmem:[#allocation8 + $0x58] sm:$0xf0]  ;;  %v4193_v57 = vld [vmem:[#allocation8 + $0x40] sm:$0xf]  ;;  %vm1675_vm14 = vcmp.eq.s32.totalorder %v4985_v26, 4 }
 0xc15   :  { %v3033_v17 = vor.u32 1.1754944e-38, %v3032_v11  ;;  %vm3031_vm4 = vcmp.eq.f32.partialorder %v3030_v14, 8.507059e+37  ;;  %v4424_v11 = vld [vmem:[#allocation6 + $0x74] sm:$0xf]  ;;  %v4175_v14 = vld [vmem:[#allocation6 + $0x60] sm:$0xf] }
 0xc16   :  { %v2850_v5 = vadd.f32 %v2849_v4, %v2751_v3  ;;  %v4206_v3 = vor.u32 %v4428_v61, %v4203_v63  ;;  %v4426_v4 = vld [vmem:[#allocation8 + $0x44] sm:$0xf]  ;;  %v4156_v44 = vld [vmem:[%s5056_s5 + $0x2] sm:$0x3] }
 0xc17   :  { %v3155_v48 = vperm.slane %v4156_v44, 0 }
 0xc18   :  { %4532 = vtanh.f32 %v2850_v5  ;;  %v4195_v5 = vld [vmem:[#allocation8 + $0x48] sm:$0xf0]  ;;  %3221 = vmatpush.bf16.msrb.mxu3 %v4206_v3 }
 0xc19   :  { %v4531_v6 = vpop.eup %4530 }
 0xc1a   :  { %v3022_v8 = vmul.f32 %v4531_v6, %v3020_v62  ;;  %vm3027_vm15 = vweird.f32 %v4531_v6  ;;  %v4202_v62 = vor.u32 %v4429_v60, %v4201_v59 }
 0xc1b   :  { %vm3028_vm3 = vmor %vm3026_vm2, %vm3027_vm15  ;;  %vm2872_vm15 = vcmp.eq.s32.totalorder %v4985_v26, 7  ;;  %v874_v26 = vsel %vm76_vm0, %v4788_v32, 0.0  ;;  %v2470_v32 = vsel %vm76_vm0, %v4941_v0, 0.0 }
 0xc1c   :  { %v3023_v9 = vsub.f32 1.0, %v3022_v8  ;;  %3208 = vmatpush.bf16.msrb.mxu2 %v4202_v62  ;;  %v4198_v8 = vor.u32 %v4426_v4, %v4195_v5  ;;  %v2076_v62 = vsel %vm2074_vm8, 1, %v4651_v45  ;;  %v3156_v5 = vperm.slane %v4156_v44, 1 }
 0xc1e   :  { %v4533_v12 = vpop.eup %4532  ;;  %v3024_v13 = vmul.f32 %v4531_v6, %v3023_v9  ;;  %3222 = vmatpush.bf16.msrb.mxu3 %v4198_v8  ;;  %v4183_v9 = vld [vmem:[#allocation6 + $0x70] sm:$0xf] }
 0xc1f   :  { %2854 = vrot.lane.b32.xlu1 %v4533_v12, %s4650_s15  ;;  %v4184_v12 = vor.u32 %v4425_v2, %v4183_v9 }
 0xc20   :  { %v3025_v18 = vadd.f32 %v4531_v6, %v3024_v13  ;;  %v4185_v13 = vld [vmem:[#allocation6 + $0x78] sm:$0xf0] }
 0xc21   :  { %3131 = vmatpush.bf16.msrb.mxu0 %v4184_v12 }
 0xc22   :  { %v3029_v20 = vsel %vm3028_vm3, %v4531_v6, %v3025_v18  ;;  %v4188_v18 = vor.u32 %v4424_v11, %v4185_v13 }
 0xc23   :  { %v3034_v22 = vsel %vm3031_vm4, %v3033_v17, %v3029_v20  ;;  %v4422_v17 = vld [vmem:[#allocation6 + $0x64] sm:$0xf]  ;;  %v4176_v20 = vor.u32 %v4423_v15, %v4175_v14 }
 0xc24   :  { %v3036_v23 = vmul.f32 %v3034_v22, %v3013_v19  ;;  %v3039_v51 = vsub.f32 1.0, %v3034_v22  ;;  %v4177_v19 = vld [vmem:[#allocation6 + $0x68] sm:$0xf0]  ;;  %3144 = vmatpush.bf16.msrb.mxu1 %v4188_v18 }
 0xc25   :  { %3132 = vmatpush.bf16.msrb.mxu0 %v4176_v20 }
 0xc26   :  { %v3037_v25 = vadd.f32 %v3036_v23, %v2938_v21  ;;  %v4180_v21 = vor.u32 %v4422_v17, %v4177_v19  ;;  %v4421_v23 = vld [vmem:[#allocation6 + $0x54] sm:$0xf0]  ;;  %v3273_v19 = vsel %vm3271_vm13, 1, %v4651_v45 }
 0xc27   :  { %3046 = vrot.lane.b32.xlu1 %v4950_v7, %s4650_s15  ;;  %v2862_v7 = vmul.f32 %v2860_v34, %v2847_v1  ;;  %v4427_v1 = vld [vmem:[#allocation8 + $0x44] sm:$0xf0]  ;;  %v4161_v34 = vld [vmem:[#allocation6 + $0x48] sm:$0xf0] }
 0xc28   :  { %4534 = vtanh.f32 %v3037_v25  ;;  %v4194_v6 = vor.u32 %v4427_v1, %v4193_v57  ;;  %v4420_v25 = vld [vmem:[#allocation6 + $0x54] sm:$0xf]  ;;  %3145 = vmatpush.bf16.msrb.mxu1 %v4180_v21  ;;  %v4164_v35 = vor.u32 %v4418_v33, %v4161_v34  ;;  %v2475_v57 = vsel %vm2473_vm9, 1, %v4651_v45 }
 0xc29   :  { %v1677_v21 = vsel %vm1675_vm14, 1, %v4651_v45 }
 0xc2a   :  { %3209 = vmatpush.bf16.msrb.mxu2 %v4194_v6 }
 0xc2e   :  { %v4535_v16 = vpop.eup %4534 }
 0xc2f   :  { %3041 = vrot.lane.b32.xlu0 %v4535_v16, %s4650_s15  ;;  %482 = vperm.xlu1 %4443, %v480_v27   ;;  %v4169_v27 = vld [vmem:[#allocation6 + $0x58] sm:$0xf0] }
 0xc91   :  { %v2855_v10 = vpop.permute.xlu1 %2854 }
 0xc92   :  { %v2857_v40 = vmul.f32 %v2855_v10, %v2852_v28  ;;  %v4172_v28 = vor.u32 %v4420_v25, %v4169_v27  ;;  %v4160_v10 = vor.u32 %v4419_v29, %v4159_v30 }
 0xc94   :  { %v2863_v47 = vadd.f32 %v2862_v7, %v2857_v40  ;;  %3146 = vmatpush.bf16.msrb.mxu1 %v4172_v28 }
 0xc96   :  { %2865 = vrot.lane.b32.xlu2 %v2863_v47, %s4650_s15  ;;  %v4155_v47 = vld [vmem:[%s5055_s4 + $0x2] sm:$0x3]  ;;  %s4652_s4 = smov [#allocation9]  }
 0xc97   :  { %v3078_v9 = vperm.slane %v4155_v47, 1  ;;  %s3285_s5 = sshll.u32 %s4652_s4, 4  ;;  %s3286_s5 = int_to_ptr.vmem [resolvable:$true] %s3285_s5 }
 0xc98   :  { %3147 = vmatpush.bf16.msrb.mxu1 %v4164_v35  ;;  %v1273_v35 = vsel %vm76_vm0, %v4826_v31, 0.0 }
 0xc99   :  { %v3047_v50 = vpop.permute.xlu1 %3046 }
 0xc9a   :  { %v3049_v54 = vmul.f32 %v3047_v50, %v3034_v22  ;;  %v4167_v22 = vld [vmem:[#allocation6 + $0x50] sm:$0xf] }
 0xc9b   :  { %v4168_v16 = vor.u32 %v4421_v23, %v4167_v22  ;;  %v2874_v22 = vsel %vm2872_vm15, 1, %v4651_v45  ;;  %v475_v45 = vsel %vm76_vm0, %v4751_v52, 0.0  ;;  %v2071_v52 = vsel %vm76_vm0, %v4903_v24, 0.0 }
 0xc9d   :  { %3133 = vmatpush.bf16.msrb.mxu0 %v4168_v16 }
 0xc9e   :  { %881 = vperm.xlu2 %4444, %v879_v49   ;;  %v3077_v49 = vperm.slane %v4155_v47, 0 }
 0xca1   :  { %v3042_v53 = vpop.permute.xlu0 %3041  ;;  %3134 = vmatpush.bf16.msrb.mxu0 %v4160_v10  ;;  %v483_v23 = vpop.permute.xlu1 %482 }
 0xca2   :  { %v3044_v55 = vmul.f32 %v3042_v53, %v3039_v51  ;;  %vm484_vm2 = vcmp.eq.s32.totalorder %v483_v23, 1 }
 0xca4   :  { %v4995_v46 = vadd.f32 %v3049_v54, %v3044_v55 }
 0xca6   :  { %v3075_v56 = vpack.c.bf16 %v4995_v46, %v4995_v46 }
 0xca8   :  { %3082 = vrot.lane.b32.xlu0 %v3075_v56, %s4650_s15 }
 0xcb0   :  { %1280 = vperm.xlu0 %4445, %v1278_v58  }
 0xcb8   :  { %2477 = vperm.xlu0 %4445, %v2475_v57  }
 0xcc0   :  { %3275 = vperm.xlu0 %4445, %v3273_v19  }
 0xcf0   :  { %v5002_v36 = vpop.permute.xlu2 %2865 }
 0xcf1   :  { %2868 = vst.msk [vmem:[#allocation2 + $0x8] sm:$0xff] %vm76_vm0, %v5002_v36  ;;  %v2869_v31 = vsel %vm76_vm0, %v5002_v36, 0.0 }
 0xcf8   :  { %v3056_v37 = vld [vmem:[#allocation2 + $0x8] sm:$0xff]  ;;  %v882_v25 = vpop.permute.xlu2 %881 }
 0xcf9   :  { %3258 = vrot.lane.b32.xlu2 %v3056_v37, %s4650_s15  ;;  %v3153_v39 = vpack.c.bf16 %v3056_v37, %v3056_v37  ;;  %vm883_vm3 = vcmp.eq.s32.totalorder %v882_v25, 1 }
 0xcfb   :  { %4223 = vmatmul.msk.bf16.vlgmr.msrb.gmra.mxu2 %vm76_vm0, %v3153_v39  ;;  %4224 = vmatmul.msk.bf16.vlgmr.msrb.gmra.mxu3 %vm76_vm0, %v3153_v39  ;;  %v1672_v39 = vsel %vm76_vm0, %v4866_v38, 0.0 }
 0xd01   :  { %2078 = vperm.xlu2 %4444, %v2076_v62  }
 0xd1a   :  { %v3083_v7 = vpop.permute.xlu0 %3082 }
 0xd1b   :  { %4189 = vmatmul.msk.bf16.vlgmr.msrb.gmra.mxu0 %vm76_vm0, %v3083_v7  ;;  %4190 = vmatmul.msk.bf16.vlgmr.msrb.gmra.mxu1 %vm76_vm0, %v3083_v7 }
 0xd22   :  { %v1281_v33 = vpop.permute.xlu0 %1280 }
 0xd23   :  { %vm1282_vm4 = vcmp.eq.s32.totalorder %v1281_v33, 1 }
 0xd53   :  { %v3259_v16 = vpop.permute.xlu2 %3258 }
 0xd7e   :  { %v3211_v40 = vpop.f32.mrf.mxu2  ;;  %v3224_v41 = vpop.f32.mrf.mxu3 }
 0xd7f   :  { %v3212_v53 = vadd.f32 %v3211_v40, %v3155_v48  ;;  %v3225_v12 = vadd.f32 %v3224_v41, %v3156_v5  ;;  %v2079_v40 = vpop.permute.xlu2 %2078 }
 0xd80   :  { %vm2080_vm6 = vcmp.eq.s32.totalorder %v2079_v40, 1 }
 0xd86   :  { %v3213_v42 = vpop.f32.mrf.mxu2  ;;  %v3226_v43 = vpop.f32.mrf.mxu3 }
 0xd87   :  { %v2478_v42 = vpop.permute.xlu0 %2477 }
 0xd88   :  { %vm2479_vm7 = vcmp.eq.s32.totalorder %v2478_v42, 1 }
 0xd98   :  { %v3136_v50 = vpop.f32.mrf.mxu0  ;;  %v3149_v51 = vpop.f32.mrf.mxu1 }
 0xd99   :  { %v3137_v54 = vadd.f32 %v3136_v50, %v3077_v49  ;;  %v3150_v15 = vadd.f32 %v3149_v51, %v3078_v9  ;;  %v3276_v49 = vpop.permute.xlu0 %3275 }
 0xd9a   :  { %vm3277_vm9 = vcmp.eq.s32.totalorder %v3276_v49, 1 }
 0xd9b   :  { %v3228_v55 = vadd.f32 %v3212_v53, %v3137_v54 }
 0xd9d   :  { %v4225_v56 = vmul.f32 -1.442695, %v3228_v55 }
 0xd9f   :  { %4536 = vpow2.f32 %v4225_v56 }
 0xda0   :  { %v3138_v58 = vpop.f32.mrf.mxu0  ;;  %v3151_v59 = vpop.f32.mrf.mxu1 }
 0xda5   :  { %v4537_v60 = vpop.eup %4536 }
 0xda6   :  { %v3232_v61 = vadd.f32 1.0, %v4537_v60 }
 0xda8   :  { %4538 = vrcp.f32 %v3232_v61  ;;  %v3244_v4 = vand.u32 2147483648, %v3232_v61  ;;  %v3242_v8 = vand.u32 2147483647, %v3232_v61  ;;  %vm3238_vm11 = vweird.f32 %v3232_v61 }
 0xdaa   :  { %v3245_v11 = vor.u32 1.1754944e-38, %v3244_v4  ;;  %vm3243_vm12 = vcmp.eq.f32.partialorder %v3242_v8, 8.507059e+37 }
 0xdae   :  { %v4539_v63 = vpop.eup %4538 }
 0xdaf   :  { %v3234_v1 = vmul.f32 %v4539_v63, %v3232_v61  ;;  %vm3239_vm10 = vweird.f32 %v4539_v63 }
 0xdb0   :  { %vm3240_vm1 = vmor %vm3238_vm11, %vm3239_vm10 }
 0xdb1   :  { %v3235_v3 = vsub.f32 1.0, %v3234_v1 }
 0xdb3   :  { %v3236_v6 = vmul.f32 %v4539_v63, %v3235_v3 }
 0xdb5   :  { %v3237_v2 = vadd.f32 %v4539_v63, %v3236_v6 }
 0xdb7   :  { %v3241_v13 = vsel %vm3240_vm1, %v4539_v63, %v3237_v2 }
 0xdb8   :  { %v3246_v14 = vsel %vm3243_vm12, %v3245_v11, %v3241_v13 }
 0xdb9   :  { %v3248_v18 = vmul.f32 %v3246_v14, %v3225_v12  ;;  %v3251_v27 = vsub.f32 1.0, %v3246_v14  ;;  %v3261_v30 = vmul.f32 %v3259_v16, %v3246_v14 }
 0xdbb   :  { %v3249_v17 = vadd.f32 %v3248_v18, %v3150_v15 }
 0xdbd   :  { %4540 = vtanh.f32 %v3249_v17 }
 0xdc3   :  { %v4541_v20 = vpop.eup %4540 }
 0xdc4   :  { %3253 = vrot.lane.b32.xlu1 %v4541_v20, %s4650_s15 }
 0xdcc   :  { %1679 = vperm.xlu1 %4443, %v1677_v21  }
 0xdd4   :  { %2876 = vperm.xlu1 %4443, %v2874_v22  }
 0xddc   :  { %3052 = vrot.lane.b32.xlu1 %v4995_v46, %s4650_s15  ;;  %v485_v46 = vsel %vm484_vm2, %v475_v45, 0.0 }
 0xddd   :  { %v884_v37 = vsel %vm883_vm3, %v874_v26, %v485_v46 }
 0xdde   :  { %v1283_v7 = vsel %vm1282_vm4, %v1273_v35, %v884_v37 }
 0xe36   :  { %v3254_v28 = vpop.permute.xlu1 %3253 }
 0xe37   :  { %v3256_v29 = vmul.f32 %v3254_v28, %v3251_v27 }
 0xe39   :  { %v3262_v34 = vadd.f32 %v3261_v30, %v3256_v29 }
 0xe3b   :  { %3264 = vrot.lane.b32.xlu2 %v3262_v34, %s4650_s15 }
 0xe3e   :  { %v1680_v10 = vpop.permute.xlu1 %1679 }
 0xe3f   :  { %vm1681_vm5 = vcmp.eq.s32.totalorder %v1680_v10, 1 }
 0xe40   :  { %v1682_v41 = vsel %vm1681_vm5, %v1672_v39, %v1283_v7 }
 0xe41   :  { %v2081_v43 = vsel %vm2080_vm6, %v2071_v52, %v1682_v41 }
 0xe42   :  { %v2480_v47 = vsel %vm2479_vm7, %v2470_v32, %v2081_v43 }
 0xe46   :  { %v2877_v44 = vpop.permute.xlu1 %2876 }
 0xe47   :  { %vm2878_vm8 = vcmp.eq.s32.totalorder %v2877_v44, 1 }
 0xe48   :  { %v2879_v38 = vsel %vm2878_vm8, %v2869_v31, %v2480_v47 }
 0xe4e   :  { %v3053_v48 = vpop.permute.xlu1 %3052 }
 0xe4f   :  { %3055 = vst.msk [vmem:[#allocation2] sm:$0xff] %vm76_vm0, %v3053_v48 }
 0xe95   :  { %v3265_v24 = vpop.permute.xlu2 %3264 }
 0xe96   :  { %3267 = vst.msk [vmem:[#allocation2 + $0x8] sm:$0xff] %vm76_vm0, %v3265_v24  ;;  %v3268_v0 = vsel %vm76_vm0, %v3265_v24, 0.0 }
 0xe97   :  { %v3278_v36 = vsel %vm3277_vm9, %v3268_v0, %v2879_v38 }
 0xe98   :  { %3279 = vst [vmem:[#allocation9] sm:$0xff] %v3278_v36 }
 0xe99   :  { %3290 = dma.vmem_to_hbm [thread:$0]  %s3286_s5, 128, %s3288_s26, [#allocation5]  }
 0xe9a   :  { %4642 = dma.done.wait [#allocation5], 128  }
 0xe9b   :  { %4643 = vsyncadd [#allocation5], 4294967168 }
 0xe9c   :  { %3295 = vsyncpa [#allocation4], 1 }
 0xe9d   :  { %3296 = vsyncpa [#allocation7], 1 }
 0xe9e   :  { %3297 = vsyncpa [#allocation5], 1 }

</bundles_post_ra>
